<compile_context>
chip_gen: v7x
topology: tpu7x:2x2x1
jax: 0.10.0
libtpu: 0.0.40
codegen_flags: <defaults>
</compile_context>

<pallas_src>
import functools
import numpy as np
import jax
import jax.numpy as jnp
from jax.experimental import pallas as pl
from jax.experimental.pallas import tpu as pltpu

NUM_HEADING_BIN = 12
N_CLASSES = 3
OUT_DIM = 3 + NUM_HEADING_BIN * 2 + 1 * 3   # = 30
OUT_PAD = 128                               # lane-dense output width
BN_EPS = 1e-5


# ----------------------------------------------------------------------------
# Deterministic synthetic parameters (shapes from the module __init__).
# ----------------------------------------------------------------------------
def _make_raw_params(key):
    keys = list(jax.random.split(key, 80))
    it = iter(keys)
    nxt = lambda: next(it)

    def lin(cin, cout):
        w = jax.random.normal(nxt(), (cin, cout), jnp.float32) / np.sqrt(cin)
        b = 0.01 * jax.random.normal(nxt(), (cout,), jnp.float32)
        return w, b

    def bn(c):
        gamma = 1.0 + 0.1 * jax.random.normal(nxt(), (c,), jnp.float32)
        beta = 0.1 * jax.random.normal(nxt(), (c,), jnp.float32)
        mean = 0.1 * jax.random.normal(nxt(), (c,), jnp.float32)
        var = jnp.abs(1.0 + 0.1 * jax.random.normal(nxt(), (c,), jnp.float32))
        return gamma, beta, mean, var

    p = {}
    p["conv1"], p["bn1"] = lin(3, 64), bn(64)
    p["conv2"], p["bn2"] = lin(64, 128), bn(128)
    p["conv3"], p["bn3"] = lin(128, 128), bn(128)
    p["conv4"], p["bn4"] = lin(128, 256), bn(256)
    p["conv5"], p["bn5"] = lin(256, 512), bn(512)
    p["class_fc"] = lin(N_CLASSES, 32)
    p["dist_fc"], p["fcbn_dist"] = lin(3, 32), bn(32)
    p["fc1"], p["fcbn1"] = lin(512 + 32 + 32, 512), bn(512)
    p["fc2"], p["fcbn2"] = lin(512, 256), bn(256)
    p["fc3"], p["fcbn3"] = lin(256, 64), bn(64)
    p["fc4"] = lin(64, OUT_DIM)
    return p


def _fold_bn(lin_params, bn_params):
    """Fold eval-mode BatchNorm1d into the preceding linear/1x1-conv weights."""
    w, b = lin_params
    gamma, beta, mean, var = bn_params
    s = gamma / jnp.sqrt(var + BN_EPS)
    return w * s[None, :], (b - mean) * s + beta


def make_folded_weights(key):
    """Flat ordered weight list fed to the kernel.

    Point-MLP layers 2-5 are bf16 (MXU native); layer 1 (K=3, VPU) and the FC
    head stay f32 for accuracy.  Layers 1-4 are stored transposed (Cout, Cin)
    for the channels-first point MLP; layer 5 and the head are channels-last.
    fc4 is zero-padded to OUT_PAD=128 output lanes for lane-dense stores.
    """
    p = _make_raw_params(key)

    w1, b1 = _fold_bn(p["conv1"], p["bn1"])
    w2, b2 = _fold_bn(p["conv2"], p["bn2"])
    w3, b3 = _fold_bn(p["conv3"], p["bn3"])
    w4, b4 = _fold_bn(p["conv4"], p["bn4"])
    w5, b5 = _fold_bn(p["conv5"], p["bn5"])
    wc, bc = p["class_fc"]
    wd, bd = _fold_bn(p["dist_fc"], p["fcbn_dist"])
    wf1, bf1 = _fold_bn(p["fc1"], p["fcbn1"])
    # split fc1 across the concat [global_feat(512), one_hot_embed(32), center_embed(32)]
    wf1a, wf1b, wf1c = wf1[:512], wf1[512:544], wf1[544:576]
    wf2, bf2 = _fold_bn(p["fc2"], p["fcbn2"])
    wf3, bf3 = _fold_bn(p["fc3"], p["fcbn3"])
    wf4, bf4 = p["fc4"]

    wf4p = jnp.zeros((64, OUT_PAD), jnp.float32).at[:, :OUT_DIM].set(wf4)
    bf4p = jnp.zeros((OUT_PAD,), jnp.float32).at[:OUT_DIM].set(bf4)

    bf16 = lambda w: w.astype(jnp.bfloat16)
    f32 = lambda w: w.astype(jnp.float32)
    col = lambda b: b.reshape(-1, 1).astype(jnp.float32)
    row = lambda b: b.reshape(1, -1).astype(jnp.float32)

    return [
        f32(w1.T), col(b1),            # layer 1: channels-first, VPU, f32
        bf16(w2.T), col(b2),           # layers 2-4: channels-first, MXU, bf16
        bf16(w3.T), col(b3),
        bf16(w4.T), col(b4),
        bf16(w5), row(b5),             # layer 5: channels-last (post transpose)
        f32(wc), row(bc), f32(wd), row(bd),
        f32(wf1a), f32(wf1b), f32(wf1c), row(bf1),
        f32(wf2), row(bf2), f32(wf3), row(bf3),
        f32(wf4p), row(bf4p),
    ]


# ----------------------------------------------------------------------------
# Pallas kernel: grid = (batch_tiles, point_tiles), running-max accumulator.
# ----------------------------------------------------------------------------
def _pointnet_kernel(b_tile,
                     pts_ref, oh_ref, ctr_ref,
                     w1t, b1c, w2t, b2c, w3t, b3c, w4t, b4c, w5cl, b5r,
                     wc, bc, wd, bd,
                     wf1a, wf1b, wf1c, bf1,
                     wf2, bf2, wf3, bf3, wf4, bf4,
                     out_ref, gf_acc):
    p_idx = pl.program_id(1)

    relu = lambda v: jnp.maximum(v, 0.0)
    bf16 = jnp.bfloat16
    f32mm = lambda a, b: jnp.dot(a, b, preferred_element_type=jnp.float32)

    @pl.when(p_idx == 0)
    def _init():
        gf_acc[...] = jnp.full(gf_acc.shape, -jnp.inf, dtype=gf_acc.dtype)

    # Resident-in-VMEM weights (hoisted loads).
    w1 = w1t[...]; b1 = b1c[...]
    w2 = w2t[...]; b2 = b2c[...]
    w3 = w3t[...]; b3 = b3c[...]
    w4 = w4t[...]; b4 = b4c[...]
    w5 = w5cl[...]; b5 = b5r[...]

    pts_blk = pts_ref[0]                           # (b_tile, 3, pt_tile) f32

    for b in range(b_tile):
        x = pts_blk[b]                             # (3, pt_tile), points on lanes
        # Layer 1 (Cin=3) on the VPU: three broadcast FMAs, coords stay f32.
        h = relu(w1[:, 0:1] * x[0:1, :]
                 + w1[:, 1:2] * x[1:2, :]
                 + w1[:, 2:3] * x[2:3, :] + b1)    # (64, pt_tile) f32
        h = h.astype(bf16)
        # Layers 2-4 channels-first on the MXU: bf16 operands, f32 accum,
        # f32 bias+ReLU epilogue, single bf16 cast per layer.
        h = relu(f32mm(w2, h) + b2).astype(bf16)   # (128, pt_tile)
        h = relu(f32mm(w3, h) + b3).astype(bf16)   # (128, pt_tile)
        h4 = relu(f32mm(w4, h) + b4)               # (256, pt_tile) f32
        # One aligned XLU transpose to channels-last for layer 5 + max-pool.
        h4t = jnp.transpose(h4).astype(bf16)       # (pt_tile, 256)
        h5 = relu(f32mm(h4t, w5) + b5)             # (pt_tile, 512) f32
        # Running global max-pool over point tiles (sublane reduction).
        tile_max = jnp.max(h5, axis=0, keepdims=True)          # (1, 512)
        gf_acc[b:b + 1, :] = jnp.maximum(gf_acc[b:b + 1, :], tile_max)

    # ---- FC head: once per batch tile (last point tile), batched, all f32.
    @pl.when(p_idx == pl.num_programs(1) - 1)
    def _head():
        gf = gf_acc[...]                           # (b_tile, 512)
        oh = oh_ref[0]                             # (b_tile, n_classes)
        ct = ctr_ref[0]                            # (b_tile, 3)
        wc_ = wc[...]; wd_ = wd[...]

        ohE = bc[...]                              # K=3 embeds on the VPU
        for c in range(oh.shape[1]):
            ohE = ohE + oh[:, c:c + 1] * wc_[c:c + 1, :]
        ohE = relu(ohE)                            # (b_tile, 32)
        ceE = bd[...]
        for c in range(ct.shape[1]):
            ceE = ceE + ct[:, c:c + 1] * wd_[c:c + 1, :]
        ceE = relu(ceE)                            # (b_tile, 32)

        z = (f32mm(gf, wf1a[...]) + f32mm(ohE, wf1b[...])
             + f32mm(ceE, wf1c[...]) + bf1[...])
        x1 = relu(z)                               # (b_tile, 512)
        x2 = relu(f32mm(x1, wf2[...]) + bf2[...])  # (b_tile, 256)
        x3 = relu(f32mm(x2, wf3[...]) + bf3[...])  # (b_tile, 64)
        out_ref[0] = f32mm(x3, wf4[...]) + bf4[...]   # (b_tile, OUT_PAD)


def _default_vmem_limit():
    """Generation-aware VMEM scoped limit (v5e/v6e: 128 MiB phys, v7x: 64 MiB)."""
    cap = 0
    try:
        info = pltpu.get_tpu_info()
        cap = int(getattr(info, "vmem_capacity_bytes", 0) or 0)
    except Exception:
        cap = 0
    if cap <= 0:
        cap = 64 * 1024 * 1024
    return int(min(max(cap // 2, 32 * 1024 * 1024), 100 * 1024 * 1024))


def pointnet_estimation(pts, one_hot_vec, stage1_center, weights,
                        *, b_tile=None, pt_tile=None, max_pt_tile=512):
    """pts: (bs, 3, n_pts), one_hot_vec: (bs, n_classes), stage1_center: (bs, 3)."""
    bs, three, n_pts = pts.shape
    assert three == 3
    n_classes = one_hot_vec.shape[1]

    # Batch tiling: >= 2 batch tiles when bs >= 2 (v7x 2-TC sharding), <= 4
    # samples per tile (in-kernel unroll).  Batch-tile axis becomes a leading
    # array dim so every BlockSpec's last-two dims stay (8,128)-compliant.
    if b_tile is None:
        b_tile = max(1, min(4, -(-bs // 2)))
    padded_bs = -(-bs // b_tile) * b_tile
    n_btiles = padded_bs // b_tile

    # Point tiling: lane-dense multiples of 128; edge padding (repeat the last
    # point) so padded columns can never change the global max -> no masking.
    npts_pad = -(-max(n_pts, 128) // 128) * 128
    if pt_tile is None:
        n_ptiles = -(-npts_pad // max_pt_tile)
        per_tile = -(-npts_pad // n_ptiles)
        pt_tile = -(-per_tile // 128) * 128
    if pt_tile % 128 != 0:
        raise ValueError("pt_tile must be a multiple of 128")
    padded_npts = -(-npts_pad // pt_tile) * pt_tile
    n_ptiles = padded_npts // pt_tile

    f32 = jnp.float32
    pts_cf = pts.astype(f32)
    pts_cf = jnp.pad(pts_cf, ((0, 0), (0, 0), (0, padded_npts - n_pts)), mode="edge")
    pts_cf = jnp.pad(pts_cf, ((0, padded_bs - bs), (0, 0), (0, 0)))
    pts4 = pts_cf.reshape(n_btiles, b_tile, 3, padded_npts)

    oh3 = jnp.pad(one_hot_vec.astype(f32), ((0, padded_bs - bs), (0, 0))
                  ).reshape(n_btiles, b_tile, n_classes)
    ct3 = jnp.pad(stage1_center.astype(f32), ((0, padded_bs - bs), (0, 0))
                  ).reshape(n_btiles, b_tile, 3)

    grid = (n_btiles, n_ptiles)

    # Whole-array, single-buffered, resident-in-VMEM weights (no re-DMA).
    vmem_full = pl.BlockSpec(memory_space=pltpu.MemorySpace.VMEM)
    in_specs = ([
        pl.BlockSpec((1, b_tile, 3, pt_tile), lambda b, p: (b, 0, 0, p)),
        pl.BlockSpec((1, b_tile, n_classes), lambda b, p: (b, 0, 0)),
        pl.BlockSpec((1, b_tile, 3), lambda b, p: (b, 0, 0)),
    ] + [vmem_full] * len(weights))

    # Advisory cost estimate for the XLA scheduler.
    pt_macs = 3 * 64 + 64 * 128 + 128 * 128 + 128 * 256 + 256 * 512
    head_macs = (n_classes * 32 + 3 * 32 + 576 * 512 + 512 * 256
                 + 256 * 64 + 64 * OUT_DIM)
    weight_bytes = int(sum(int(np.prod(w.shape)) * w.dtype.itemsize
                           for w in weights))
    cost = pl.CostEstimate(
        flops=2 * padded_bs * padded_npts * pt_macs + 2 * padded_bs * head_macs,
        transcendentals=0,
        bytes_accessed=int(pts4.size * 4 + oh3.size * 4 + ct3.size * 4
                           + padded_bs * OUT_PAD * 4 + weight_bytes))

    kernel = functools.partial(_pointnet_kernel, b_tile)

    out = pl.pallas_call(
        kernel,
        out_shape=jax.ShapeDtypeStruct((n_btiles, b_tile, OUT_PAD), jnp.float32),
        grid=grid,
        in_specs=in_specs,
        out_specs=pl.BlockSpec((1, b_tile, OUT_PAD), lambda b, p: (b, 0, 0)),
        scratch_shapes=[pltpu.VMEM((b_tile, 512), jnp.float32)],
        compiler_params=pltpu.CompilerParams(
            dimension_semantics=("parallel", "arbitrary"),
            vmem_limit_bytes=_default_vmem_limit()),
        cost_estimate=cost,
    )(pts4, oh3, ct3, *weights)

    return out.reshape(padded_bs, OUT_PAD)[:bs, :OUT_DIM]


# ----------------------------------------------------------------------------
# Pure-JAX reference (same folded weights, f32 math) for correctness checking.
# ----------------------------------------------------------------------------
def pointnet_reference(pts, one_hot_vec, stage1_center, weights):
    (w1t, b1c, w2t, b2c, w3t, b3c, w4t, b4c, w5, b5r,
     wc, bc, wd, bd,
     wf1a, wf1b, wf1c, bf1,
     wf2, bf2, wf3, bf3, wf4, bf4) = weights

    f = lambda w: w.astype(jnp.float32)
    relu = lambda x: jnp.maximum(x, 0.0)
    rowb = lambda b: b.reshape(1, 1, -1)

    x = jnp.transpose(pts, (0, 2, 1)).astype(jnp.float32)   # (bs, n_pts, 3)
    h = relu(x @ f(w1t).T + rowb(b1c))
    h = relu(h @ f(w2t).T + rowb(b2c))
    h = relu(h @ f(w3t).T + rowb(b3c))
    h = relu(h @ f(w4t).T + rowb(b4c))
    h = relu(h @ f(w5) + rowb(b5r))
    gf = jnp.max(h, axis=1)                                  # (bs, 512)
    ohE = relu(one_hot_vec @ f(wc) + bc)
    ceE = relu(stage1_center @ f(wd) + bd)
    z = gf @ f(wf1a) + ohE @ f(wf1b) + ceE @ f(wf1c) + bf1
    x1 = relu(z)
    x2 = relu(x1 @ f(wf2) + bf2)
    x3 = relu(x2 @ f(wf3) + bf3)
    return (x3 @ f(wf4) + bf4)[:, :OUT_DIM]


if __name__ == "__main__":
    key = jax.random.PRNGKey(0)
    k_w, k1, k2, k3 = jax.random.split(key, 4)
    weights = make_folded_weights(k_w)

    def run_case(k, bs, n_pts, **kw):
        kp, ko, kc = jax.random.split(k, 3)
        pts = jax.random.normal(kp, (bs, 3, n_pts), jnp.float32)
        cls_ids = jax.random.randint(ko, (bs,), 0, N_CLASSES)
        one_hot = jax.nn.one_hot(cls_ids, N_CLASSES, dtype=jnp.float32)
        ctr = jax.random.normal(kc, (bs, 3), jnp.float32)

        got = jax.block_until_ready(
            pointnet_estimation(pts, one_hot, ctr, weights, **kw))
        ref = pointnet_reference(pts, one_hot, ctr, weights)
        assert got.shape == (bs, OUT_DIM)
        # bf16 MXU operands in the point MLP => loosened tolerance vs f32 ref.
        np.testing.assert_allclose(np.asarray(got), np.asarray(ref),
                                   rtol=5e-2, atol=5e-2)

    # Single point tile (16 pts edge-padded to 128), 2 batch tiles of 1 sample.
    run_case(k1, bs=2, n_pts=16)
    # 3 point tiles: exercises the running-max accumulator, point edge-padding
    # (300 -> 384) and batch padding (bs=3 -> 4, b_tile=2).
    run_case(k2, bs=3, n_pts=300, pt_tile=128)
    # Default tiling path: 2 batch tiles x 2 point tiles (700 -> 768, pt_tile=384).
    run_case(k3, bs=4, n_pts=700)

    print("KERNEL_OK")
</pallas_src>

<mosaic_0001>
module attributes {stable_mosaic.version = 11 : i64} {
  func.func @_pointnet_kernel(%arg0: i32, %arg1: i32, %arg2: memref<1x1x3x128xf32, #tpu.memory_space<vmem>>, %arg3: memref<1x1x3xf32, #tpu.memory_space<vmem>>, %arg4: memref<1x1x3xf32, #tpu.memory_space<vmem>>, %arg5: memref<64x3xf32, #tpu.memory_space<vmem>>, %arg6: memref<64x1xf32, #tpu.memory_space<vmem>>, %arg7: memref<128x64xbf16, #tpu.memory_space<vmem>>, %arg8: memref<128x1xf32, #tpu.memory_space<vmem>>, %arg9: memref<128x128xbf16, #tpu.memory_space<vmem>>, %arg10: memref<128x1xf32, #tpu.memory_space<vmem>>, %arg11: memref<256x128xbf16, #tpu.memory_space<vmem>>, %arg12: memref<256x1xf32, #tpu.memory_space<vmem>>, %arg13: memref<256x512xbf16, #tpu.memory_space<vmem>>, %arg14: memref<1x512xf32, #tpu.memory_space<vmem>>, %arg15: memref<3x32xf32, #tpu.memory_space<vmem>>, %arg16: memref<1x32xf32, #tpu.memory_space<vmem>>, %arg17: memref<3x32xf32, #tpu.memory_space<vmem>>, %arg18: memref<1x32xf32, #tpu.memory_space<vmem>>, %arg19: memref<512x512xf32, #tpu.memory_space<vmem>>, %arg20: memref<32x512xf32, #tpu.memory_space<vmem>>, %arg21: memref<32x512xf32, #tpu.memory_space<vmem>>, %arg22: memref<1x512xf32, #tpu.memory_space<vmem>>, %arg23: memref<512x256xf32, #tpu.memory_space<vmem>>, %arg24: memref<1x256xf32, #tpu.memory_space<vmem>>, %arg25: memref<256x64xf32, #tpu.memory_space<vmem>>, %arg26: memref<1x64xf32, #tpu.memory_space<vmem>>, %arg27: memref<64x128xf32, #tpu.memory_space<vmem>>, %arg28: memref<1x128xf32, #tpu.memory_space<vmem>>, %arg29: memref<1x1x128xf32, #tpu.memory_space<vmem>>, %arg30: memref<1x512xf32, #tpu.memory_space<vmem>>) attributes {dimension_semantics = [#tpu.dimension_semantics<parallel>, #tpu.dimension_semantics<arbitrary>], iteration_bounds = array<i64: 2, 1>, scalar_prefetch = 0 : i64, scratch_operands = 1 : i64, tpu.core_type = #tpu.core_type<tc>, window_params = [{transform_indices = @transform_0, window_bounds = array<i64: 1, 1, 3, 128>}, {transform_indices = @transform_1, window_bounds = array<i64: 1, 1, 3>}, {transform_indices = @transform_2, window_bounds = array<i64: 1, 1, 3>}, {pipeline_mode = #tpu.pipeline_mode<synchronous>, transform_indices = @transform_3, window_bounds = array<i64: 64, 3>}, {pipeline_mode = #tpu.pipeline_mode<synchronous>, transform_indices = @transform_4, window_bounds = array<i64: 64, 1>}, {pipeline_mode = #tpu.pipeline_mode<synchronous>, transform_indices = @transform_5, window_bounds = array<i64: 128, 64>}, {pipeline_mode = #tpu.pipeline_mode<synchronous>, transform_indices = @transform_6, window_bounds = array<i64: 128, 1>}, {pipeline_mode = #tpu.pipeline_mode<synchronous>, transform_indices = @transform_7, window_bounds = array<i64: 128, 128>}, {pipeline_mode = #tpu.pipeline_mode<synchronous>, transform_indices = @transform_8, window_bounds = array<i64: 128, 1>}, {pipeline_mode = #tpu.pipeline_mode<synchronous>, transform_indices = @transform_9, window_bounds = array<i64: 256, 128>}, {pipeline_mode = #tpu.pipeline_mode<synchronous>, transform_indices = @transform_10, window_bounds = array<i64: 256, 1>}, {pipeline_mode = #tpu.pipeline_mode<synchronous>, transform_indices = @transform_11, window_bounds = array<i64: 256, 512>}, {pipeline_mode = #tpu.pipeline_mode<synchronous>, transform_indices = @transform_12, window_bounds = array<i64: 1, 512>}, {pipeline_mode = #tpu.pipeline_mode<synchronous>, transform_indices = @transform_13, window_bounds = array<i64: 3, 32>}, {pipeline_mode = #tpu.pipeline_mode<synchronous>, transform_indices = @transform_14, window_bounds = array<i64: 1, 32>}, {pipeline_mode = #tpu.pipeline_mode<synchronous>, transform_indices = @transform_15, window_bounds = array<i64: 3, 32>}, {pipeline_mode = #tpu.pipeline_mode<synchronous>, transform_indices = @transform_16, window_bounds = array<i64: 1, 32>}, {pipeline_mode = #tpu.pipeline_mode<synchronous>, transform_indices = @transform_17, window_bounds = array<i64: 512, 512>}, {pipeline_mode = #tpu.pipeline_mode<synchronous>, transform_indices = @transform_18, window_bounds = array<i64: 32, 512>}, {pipeline_mode = #tpu.pipeline_mode<synchronous>, transform_indices = @transform_19, window_bounds = array<i64: 32, 512>}, {pipeline_mode = #tpu.pipeline_mode<synchronous>, transform_indices = @transform_20, window_bounds = array<i64: 1, 512>}, {pipeline_mode = #tpu.pipeline_mode<synchronous>, transform_indices = @transform_21, window_bounds = array<i64: 512, 256>}, {pipeline_mode = #tpu.pipeline_mode<synchronous>, transform_indices = @transform_22, window_bounds = array<i64: 1, 256>}, {pipeline_mode = #tpu.pipeline_mode<synchronous>, transform_indices = @transform_23, window_bounds = array<i64: 256, 64>}, {pipeline_mode = #tpu.pipeline_mode<synchronous>, transform_indices = @transform_24, window_bounds = array<i64: 1, 64>}, {pipeline_mode = #tpu.pipeline_mode<synchronous>, transform_indices = @transform_25, window_bounds = array<i64: 64, 128>}, {pipeline_mode = #tpu.pipeline_mode<synchronous>, transform_indices = @transform_26, window_bounds = array<i64: 1, 128>}, {transform_indices = @transform_27, window_bounds = array<i64: 1, 1, 128>}]} {
    %c0_i32 = arith.constant 0 : i32
    %0 = arith.cmpi eq, %arg1, %c0_i32 : i32
    %1 = arith.extui %0 : i1 to i32
    %c0_i32_0 = arith.constant 0 : i32
    %2 = arith.cmpi ne, %1, %c0_i32_0 : i32
    scf.if %2 {
      %cst_39 = arith.constant 0xFF800000 : f32
      %70 = vector.broadcast %cst_39 : f32 to vector<1x512xf32>
      %c0_40 = arith.constant 0 : index
      %c0_41 = arith.constant 0 : index
      %71 = vector.load %arg30[%c0_40, %c0_41] : memref<1x512xf32, #tpu.memory_space<vmem>>, vector<1x512xf32>
      tpu.vector_store %arg30[%c0_40, %c0_41], %70 {strides = array<i32>} : memref<1x512xf32, #tpu.memory_space<vmem>>, vector<1x512xf32>,
    } else {
    }
    %c0 = arith.constant 0 : index
    %c0_1 = arith.constant 0 : index
    %3 = vector.load %arg5[%c0, %c0_1] : memref<64x3xf32, #tpu.memory_space<vmem>>, vector<64x3xf32>
    %c0_2 = arith.constant 0 : index
    %c0_3 = arith.constant 0 : index
    %4 = vector.load %arg6[%c0_2, %c0_3] : memref<64x1xf32, #tpu.memory_space<vmem>>, vector<64x1xf32>
    %c0_4 = arith.constant 0 : index
    %c0_5 = arith.constant 0 : index
    %5 = vector.load %arg7[%c0_4, %c0_5] : memref<128x64xbf16, #tpu.memory_space<vmem>>, vector<128x64xbf16>
    %c0_6 = arith.constant 0 : index
    %c0_7 = arith.constant 0 : index
    %6 = vector.load %arg8[%c0_6, %c0_7] : memref<128x1xf32, #tpu.memory_space<vmem>>, vector<128x1xf32>
    %c0_8 = arith.constant 0 : index
    %c0_9 = arith.constant 0 : index
    %7 = vector.load %arg9[%c0_8, %c0_9] : memref<128x128xbf16, #tpu.memory_space<vmem>>, vector<128x128xbf16>
    %c0_10 = arith.constant 0 : index
    %c0_11 = arith.constant 0 : index
    %8 = vector.load %arg10[%c0_10, %c0_11] : memref<128x1xf32, #tpu.memory_space<vmem>>, vector<128x1xf32>
    %c0_12 = arith.constant 0 : index
    %c0_13 = arith.constant 0 : index
    %9 = vector.load %arg11[%c0_12, %c0_13] : memref<256x128xbf16, #tpu.memory_space<vmem>>, vector<256x128xbf16>
    %c0_14 = arith.constant 0 : index
    %c0_15 = arith.constant 0 : index
    %10 = vector.load %arg12[%c0_14, %c0_15] : memref<256x1xf32, #tpu.memory_space<vmem>>, vector<256x1xf32>
    %c0_16 = arith.constant 0 : index
    %c0_17 = arith.constant 0 : index
    %11 = vector.load %arg13[%c0_16, %c0_17] : memref<256x512xbf16, #tpu.memory_space<vmem>>, vector<256x512xbf16>
    %c0_18 = arith.constant 0 : index
    %c0_19 = arith.constant 0 : index
    %12 = vector.load %arg14[%c0_18, %c0_19] : memref<1x512xf32, #tpu.memory_space<vmem>>, vector<1x512xf32>
    %c0_20 = arith.constant 0 : index
    %c0_21 = arith.constant 0 : index
    %c0_22 = arith.constant 0 : index
    %c0_23 = arith.constant 0 : index
    %13 = vector.load %arg2[%c0_20, %c0_21, %c0_22, %c0_23] : memref<1x1x3x128xf32, #tpu.memory_space<vmem>>, vector<1x1x3x128xf32>
    %14 = vector.shape_cast %13 : vector<1x1x3x128xf32> to vector<1x3x128xf32>
    %15 = vector.shape_cast %14 : vector<1x3x128xf32> to vector<3x128xf32>
    %16 = vector.extract_strided_slice %3 {offsets = [0, 0], sizes = [64, 1], strides = [1, 1]} : vector<64x3xf32> to vector<64x1xf32>
    %17 = vector.extract_strided_slice %15 {offsets = [0, 0], sizes = [1, 128], strides = [1, 1]} : vector<3x128xf32> to vector<1x128xf32>
    %18 = vector.broadcast %16 : vector<64x1xf32> to vector<64x128xf32>
    %19 = vector.broadcast %17 : vector<1x128xf32> to vector<64x128xf32>
    %20 = arith.mulf %18, %19 : vector<64x128xf32>
    %21 = vector.extract_strided_slice %3 {offsets = [0, 1], sizes = [64, 1], strides = [1, 1]} : vector<64x3xf32> to vector<64x1xf32>
    %22 = vector.extract_strided_slice %15 {offsets = [1, 0], sizes = [1, 128], strides = [1, 1]} : vector<3x128xf32> to vector<1x128xf32>
    %23 = vector.broadcast %21 : vector<64x1xf32> to vector<64x128xf32>
    %24 = vector.broadcast %22 : vector<1x128xf32> to vector<64x128xf32>
    %25 = arith.mulf %23, %24 : vector<64x128xf32>
    %26 = arith.addf %20, %25 : vector<64x128xf32>
    %27 = vector.extract_strided_slice %3 {offsets = [0, 2], sizes = [64, 1], strides = [1, 1]} : vector<64x3xf32> to vector<64x1xf32>
    %28 = vector.extract_strided_slice %15 {offsets = [2, 0], sizes = [1, 128], strides = [1, 1]} : vector<3x128xf32> to vector<1x128xf32>
    %29 = vector.broadcast %27 : vector<64x1xf32> to vector<64x128xf32>
    %30 = vector.broadcast %28 : vector<1x128xf32> to vector<64x128xf32>
    %31 = arith.mulf %29, %30 : vector<64x128xf32>
    %32 = arith.addf %26, %31 : vector<64x128xf32>
    %33 = vector.broadcast %4 : vector<64x1xf32> to vector<64x128xf32>
    %34 = arith.addf %32, %33 : vector<64x128xf32>
    %cst = arith.constant 0.000000e+00 : f32
    %35 = vector.broadcast %cst : f32 to vector<64x128xf32>
    %36 = arith.maximumf %34, %35 : vector<64x128xf32>
    %37 = arith.truncf %36 : vector<64x128xf32> to vector<64x128xbf16>
    %cst_24 = arith.constant dense<0.000000e+00> : vector<128x128xf32>
    %38 = tpu.matmul %5, %37, %cst_24 {dimension_numbers = #tpu.dot_dimension_numbers<[1], [0], [0], [1], [0, 0, 1, 1], [], []>} : vector<128x64xbf16>, vector<64x128xbf16>, vector<128x128xf32> -> vector<128x128xf32>
    %39 = vector.broadcast %6 : vector<128x1xf32> to vector<128x128xf32>
    %40 = arith.addf %38, %39 : vector<128x128xf32>
    %cst_25 = arith.constant 0.000000e+00 : f32
    %41 = vector.broadcast %cst_25 : f32 to vector<128x128xf32>
    %42 = arith.maximumf %40, %41 : vector<128x128xf32>
    %43 = arith.truncf %42 : vector<128x128xf32> to vector<128x128xbf16>
    %cst_26 = arith.constant dense<0.000000e+00> : vector<128x128xf32>
    %44 = tpu.matmul %7, %43, %cst_26 {dimension_numbers = #tpu.dot_dimension_numbers<[1], [0], [0], [1], [0, 0, 1, 1], [], []>} : vector<128x128xbf16>, vector<128x128xbf16>, vector<128x128xf32> -> vector<128x128xf32>
    %45 = vector.broadcast %8 : vector<128x1xf32> to vector<128x128xf32>
    %46 = arith.addf %44, %45 : vector<128x128xf32>
    %cst_27 = arith.constant 0.000000e+00 : f32
    %47 = vector.broadcast %cst_27 : f32 to vector<128x128xf32>
    %48 = arith.maximumf %46, %47 : vector<128x128xf32>
    %49 = arith.truncf %48 : vector<128x128xf32> to vector<128x128xbf16>
    %cst_28 = arith.constant dense<0.000000e+00> : vector<256x128xf32>
    %50 = tpu.matmul %9, %49, %cst_28 {dimension_numbers = #tpu.dot_dimension_numbers<[1], [0], [0], [1], [0, 0, 1, 1], [], []>} : vector<256x128xbf16>, vector<128x128xbf16>, vector<256x128xf32> -> vector<256x128xf32>
    %51 = vector.broadcast %10 : vector<256x1xf32> to vector<256x128xf32>
    %52 = arith.addf %50, %51 : vector<256x128xf32>
    %cst_29 = arith.constant 0.000000e+00 : f32
    %53 = vector.broadcast %cst_29 : f32 to vector<256x128xf32>
    %54 = arith.maximumf %52, %53 : vector<256x128xf32>
    %55 = tpu.transpose %54, [1, 0] : vector<256x128xf32> -> vector<128x256xf32>
    %56 = arith.truncf %55 : vector<128x256xf32> to vector<128x256xbf16>
    %cst_30 = arith.constant dense<0.000000e+00> : vector<128x512xf32>
    %57 = tpu.matmul %56, %11, %cst_30 {dimension_numbers = #tpu.dot_dimension_numbers<[1], [0], [0], [1], [0, 0, 1, 1], [], []>} : vector<128x256xbf16>, vector<256x512xbf16>, vector<128x512xf32> -> vector<128x512xf32>
    %58 = vector.broadcast %12 : vector<1x512xf32> to vector<128x512xf32>
    %59 = arith.addf %57, %58 : vector<128x512xf32>
    %cst_31 = arith.constant 0.000000e+00 : f32
    %60 = vector.broadcast %cst_31 : f32 to vector<128x512xf32>
    %61 = arith.maximumf %59, %60 : vector<128x512xf32>
    %cst_32 = arith.constant dense<0xFF800000> : vector<512xf32>
    %62 = vector.multi_reduction <maximumf>, %61, %cst_32 [0] : vector<128x512xf32> to vector<512xf32>
    %63 = vector.shape_cast %62 : vector<512xf32> to vector<1x512xf32>
    %c0_33 = arith.constant 0 : index
    %c0_34 = arith.constant 0 : index
    %64 = vector.load %arg30[%c0_33, %c0_34] : memref<1x512xf32, #tpu.memory_space<vmem>>, vector<1x512xf32>
    %65 = arith.maximumf %64, %63 : vector<1x512xf32>
    %c0_35 = arith.constant 0 : index
    %c0_36 = arith.constant 0 : index
    %66 = vector.load %arg30[%c0_35, %c0_36] : memref<1x512xf32, #tpu.memory_space<vmem>>, vector<1x512xf32>
    tpu.vector_store %arg30[%c0_35, %c0_36], %65 {strides = array<i32>} : memref<1x512xf32, #tpu.memory_space<vmem>>, vector<1x512xf32>,
    %c0_i32_37 = arith.constant 0 : i32
    %67 = arith.cmpi eq, %arg1, %c0_i32_37 : i32
    %68 = arith.extui %67 : i1 to i32
    %c0_i32_38 = arith.constant 0 : i32
    %69 = arith.cmpi ne, %68, %c0_i32_38 : i32
    scf.if %69 {
      %c0_39 = arith.constant 0 : index
      %c0_40 = arith.constant 0 : index
      %70 = vector.load %arg30[%c0_39, %c0_40] : memref<1x512xf32, #tpu.memory_space<vmem>>, vector<1x512xf32>
      %c0_41 = arith.constant 0 : index
      %c0_42 = arith.constant 0 : index
      %c0_43 = arith.constant 0 : index
      %71 = vector.load %arg3[%c0_41, %c0_42, %c0_43] : memref<1x1x3xf32, #tpu.memory_space<vmem>>, vector<1x1x3xf32>
      %72 = vector.shape_cast %71 : vector<1x1x3xf32> to vector<1x3xf32>
      %c0_44 = arith.constant 0 : index
      %c0_45 = arith.constant 0 : index
      %c0_46 = arith.constant 0 : index
      %73 = vector.load %arg4[%c0_44, %c0_45, %c0_46] : memref<1x1x3xf32, #tpu.memory_space<vmem>>, vector<1x1x3xf32>
      %74 = vector.shape_cast %73 : vector<1x1x3xf32> to vector<1x3xf32>
      %c0_47 = arith.constant 0 : index
      %c0_48 = arith.constant 0 : index
      %75 = vector.load %arg15[%c0_47, %c0_48] : memref<3x32xf32, #tpu.memory_space<vmem>>, vector<3x32xf32>
      %c0_49 = arith.constant 0 : index
      %c0_50 = arith.constant 0 : index
      %76 = vector.load %arg17[%c0_49, %c0_50] : memref<3x32xf32, #tpu.memory_space<vmem>>, vector<3x32xf32>
      %c0_51 = arith.constant 0 : index
      %c0_52 = arith.constant 0 : index
      %77 = vector.load %arg16[%c0_51, %c0_52] : memref<1x32xf32, #tpu.memory_space<vmem>>, vector<1x32xf32>
      %78 = vector.extract_strided_slice %72 {offsets = [0, 0], sizes = [1, 1], strides = [1, 1]} : vector<1x3xf32> to vector<1x1xf32>
      %79 = vector.extract_strided_slice %75 {offsets = [0, 0], sizes = [1, 32], strides = [1, 1]} : vector<3x32xf32> to vector<1x32xf32>
      %80 = vector.broadcast %78 : vector<1x1xf32> to vector<1x32xf32>
      %81 = arith.mulf %80, %79 : vector<1x32xf32>
      %82 = arith.addf %77, %81 : vector<1x32xf32>
      %83 = vector.extract_strided_slice %72 {offsets = [0, 1], sizes = [1, 1], strides = [1, 1]} : vector<1x3xf32> to vector<1x1xf32>
      %84 = vector.extract_strided_slice %75 {offsets = [1, 0], sizes = [1, 32], strides = [1, 1]} : vector<3x32xf32> to vector<1x32xf32>
      %85 = vector.broadcast %83 : vector<1x1xf32> to vector<1x32xf32>
      %86 = arith.mulf %85, %84 : vector<1x32xf32>
      %87 = arith.addf %82, %86 : vector<1x32xf32>
      %88 = vector.extract_strided_slice %72 {offsets = [0, 2], sizes = [1, 1], strides = [1, 1]} : vector<1x3xf32> to vector<1x1xf32>
      %89 = vector.extract_strided_slice %75 {offsets = [2, 0], sizes = [1, 32], strides = [1, 1]} : vector<3x32xf32> to vector<1x32xf32>
      %90 = vector.broadcast %88 : vector<1x1xf32> to vector<1x32xf32>
      %91 = arith.mulf %90, %89 : vector<1x32xf32>
      %92 = arith.addf %87, %91 : vector<1x32xf32>
      %cst_53 = arith.constant 0.000000e+00 : f32
      %93 = vector.broadcast %cst_53 : f32 to vector<1x32xf32>
      %94 = arith.maximumf %92, %93 : vector<1x32xf32>
      %c0_54 = arith.constant 0 : index
      %c0_55 = arith.constant 0 : index
      %95 = vector.load %arg18[%c0_54, %c0_55] : memref<1x32xf32, #tpu.memory_space<vmem>>, vector<1x32xf32>
      %96 = vector.extract_strided_slice %74 {offsets = [0, 0], sizes = [1, 1], strides = [1, 1]} : vector<1x3xf32> to vector<1x1xf32>
      %97 = vector.extract_strided_slice %76 {offsets = [0, 0], sizes = [1, 32], strides = [1, 1]} : vector<3x32xf32> to vector<1x32xf32>
      %98 = vector.broadcast %96 : vector<1x1xf32> to vector<1x32xf32>
      %99 = arith.mulf %98, %97 : vector<1x32xf32>
      %100 = arith.addf %95, %99 : vector<1x32xf32>
      %101 = vector.extract_strided_slice %74 {offsets = [0, 1], sizes = [1, 1], strides = [1, 1]} : vector<1x3xf32> to vector<1x1xf32>
      %102 = vector.extract_strided_slice %76 {offsets = [1, 0], sizes = [1, 32], strides = [1, 1]} : vector<3x32xf32> to vector<1x32xf32>
      %103 = vector.broadcast %101 : vector<1x1xf32> to vector<1x32xf32>
      %104 = arith.mulf %103, %102 : vector<1x32xf32>
      %105 = arith.addf %100, %104 : vector<1x32xf32>
      %106 = vector.extract_strided_slice %74 {offsets = [0, 2], sizes = [1, 1], strides = [1, 1]} : vector<1x3xf32> to vector<1x1xf32>
      %107 = vector.extract_strided_slice %76 {offsets = [2, 0], sizes = [1, 32], strides = [1, 1]} : vector<3x32xf32> to vector<1x32xf32>
      %108 = vector.broadcast %106 : vector<1x1xf32> to vector<1x32xf32>
      %109 = arith.mulf %108, %107 : vector<1x32xf32>
      %110 = arith.addf %105, %109 : vector<1x32xf32>
      %cst_56 = arith.constant 0.000000e+00 : f32
      %111 = vector.broadcast %cst_56 : f32 to vector<1x32xf32>
      %112 = arith.maximumf %110, %111 : vector<1x32xf32>
      %c0_57 = arith.constant 0 : index
      %c0_58 = arith.constant 0 : index
      %113 = vector.load %arg19[%c0_57, %c0_58] : memref<512x512xf32, #tpu.memory_space<vmem>>, vector<512x512xf32>
      %cst_59 = arith.constant dense<0.000000e+00> : vector<1x512xf32>
      %114 = tpu.matmul %70, %113, %cst_59 {dimension_numbers = #tpu.dot_dimension_numbers<[1], [0], [0], [1], [0, 0, 1, 1], [], []>} : vector<1x512xf32>, vector<512x512xf32>, vector<1x512xf32> -> vector<1x512xf32>
      %c0_60 = arith.constant 0 : index
      %c0_61 = arith.constant 0 : index
      %115 = vector.load %arg20[%c0_60, %c0_61] : memref<32x512xf32, #tpu.memory_space<vmem>>, vector<32x512xf32>
      %cst_62 = arith.constant dense<0.000000e+00> : vector<1x512xf32>
      %116 = tpu.matmul %94, %115, %cst_62 {dimension_numbers = #tpu.dot_dimension_numbers<[1], [0], [0], [1], [0, 0, 1, 1], [], []>} : vector<1x32xf32>, vector<32x512xf32>, vector<1x512xf32> -> vector<1x512xf32>
      %117 = arith.addf %114, %116 : vector<1x512xf32>
      %c0_63 = arith.constant 0 : index
      %c0_64 = arith.constant 0 : index
      %118 = vector.load %arg21[%c0_63, %c0_64] : memref<32x512xf32, #tpu.memory_space<vmem>>, vector<32x512xf32>
      %cst_65 = arith.constant dense<0.000000e+00> : vector<1x512xf32>
      %119 = tpu.matmul %112, %118, %cst_65 {dimension_numbers = #tpu.dot_dimension_numbers<[1], [0], [0], [1], [0, 0, 1, 1], [], []>} : vector<1x32xf32>, vector<32x512xf32>, vector<1x512xf32> -> vector<1x512xf32>
      %120 = arith.addf %117, %119 : vector<1x512xf32>
      %c0_66 = arith.constant 0 : index
      %c0_67 = arith.constant 0 : index
      %121 = vector.load %arg22[%c0_66, %c0_67] : memref<1x512xf32, #tpu.memory_space<vmem>>, vector<1x512xf32>
      %122 = arith.addf %120, %121 : vector<1x512xf32>
      %cst_68 = arith.constant 0.000000e+00 : f32
      %123 = vector.broadcast %cst_68 : f32 to vector<1x512xf32>
      %124 = arith.maximumf %122, %123 : vector<1x512xf32>
      %c0_69 = arith.constant 0 : index
      %c0_70 = arith.constant 0 : index
      %125 = vector.load %arg23[%c0_69, %c0_70] : memref<512x256xf32, #tpu.memory_space<vmem>>, vector<512x256xf32>
      %cst_71 = arith.constant dense<0.000000e+00> : vector<1x256xf32>
      %126 = tpu.matmul %124, %125, %cst_71 {dimension_numbers = #tpu.dot_dimension_numbers<[1], [0], [0], [1], [0, 0, 1, 1], [], []>} : vector<1x512xf32>, vector<512x256xf32>, vector<1x256xf32> -> vector<1x256xf32>
      %c0_72 = arith.constant 0 : index
      %c0_73 = arith.constant 0 : index
      %127 = vector.load %arg24[%c0_72, %c0_73] : memref<1x256xf32, #tpu.memory_space<vmem>>, vector<1x256xf32>
      %128 = arith.addf %126, %127 : vector<1x256xf32>
      %cst_74 = arith.constant 0.000000e+00 : f32
      %129 = vector.broadcast %cst_74 : f32 to vector<1x256xf32>
      %130 = arith.maximumf %128, %129 : vector<1x256xf32>
      %c0_75 = arith.constant 0 : index
      %c0_76 = arith.constant 0 : index
      %131 = vector.load %arg25[%c0_75, %c0_76] : memref<256x64xf32, #tpu.memory_space<vmem>>, vector<256x64xf32>
      %cst_77 = arith.constant dense<0.000000e+00> : vector<1x64xf32>
      %132 = tpu.matmul %130, %131, %cst_77 {dimension_numbers = #tpu.dot_dimension_numbers<[1], [0], [0], [1], [0, 0, 1, 1], [], []>} : vector<1x256xf32>, vector<256x64xf32>, vector<1x64xf32> -> vector<1x64xf32>
      %c0_78 = arith.constant 0 : index
      %c0_79 = arith.constant 0 : index
      %133 = vector.load %arg26[%c0_78, %c0_79] : memref<1x64xf32, #tpu.memory_space<vmem>>, vector<1x64xf32>
      %134 = arith.addf %132, %133 : vector<1x64xf32>
      %cst_80 = arith.constant 0.000000e+00 : f32
      %135 = vector.broadcast %cst_80 : f32 to vector<1x64xf32>
      %136 = arith.maximumf %134, %135 : vector<1x64xf32>
      %c0_81 = arith.constant 0 : index
      %c0_82 = arith.constant 0 : index
      %137 = vector.load %arg27[%c0_81, %c0_82] : memref<64x128xf32, #tpu.memory_space<vmem>>, vector<64x128xf32>
      %cst_83 = arith.constant dense<0.000000e+00> : vector<1x128xf32>
      %138 = tpu.matmul %136, %137, %cst_83 {dimension_numbers = #tpu.dot_dimension_numbers<[1], [0], [0], [1], [0, 0, 1, 1], [], []>} : vector<1x64xf32>, vector<64x128xf32>, vector<1x128xf32> -> vector<1x128xf32>
      %c0_84 = arith.constant 0 : index
      %c0_85 = arith.constant 0 : index
      %139 = vector.load %arg28[%c0_84, %c0_85] : memref<1x128xf32, #tpu.memory_space<vmem>>, vector<1x128xf32>
      %140 = arith.addf %138, %139 : vector<1x128xf32>
      %c0_86 = arith.constant 0 : index
      %c0_87 = arith.constant 0 : index
      %c0_88 = arith.constant 0 : index
      %141 = vector.load %arg29[%c0_86, %c0_87, %c0_88] : memref<1x1x128xf32, #tpu.memory_space<vmem>>, vector<1x1x128xf32>
      %142 = vector.shape_cast %141 : vector<1x1x128xf32> to vector<1x128xf32>
      %143 = vector.shape_cast %140 : vector<1x128xf32> to vector<1x1x128xf32>
      tpu.vector_store %arg29[%c0_86, %c0_87, %c0_88], %143 {strides = array<i32>} : memref<1x1x128xf32, #tpu.memory_space<vmem>>, vector<1x1x128xf32>,
    } else {
    }
    return
  }
  func.func @transform_0(%arg0: i32, %arg1: i32) -> (i32, i32, i32, i32) {
    %c0_i32 = arith.constant 0 : i32
    %c0_i32_0 = arith.constant 0 : i32
    %c0_i32_1 = arith.constant 0 : i32
    return %arg0, %c0_i32, %c0_i32_0, %arg1 : i32, i32, i32, i32
  }
  func.func @transform_1(%arg0: i32, %arg1: i32) -> (i32, i32, i32) {
    %c0_i32 = arith.constant 0 : i32
    %c0_i32_0 = arith.constant 0 : i32
    %c0_i32_1 = arith.constant 0 : i32
    return %arg0, %c0_i32, %c0_i32_0 : i32, i32, i32
  }
  func.func @transform_2(%arg0: i32, %arg1: i32) -> (i32, i32, i32) {
    %c0_i32 = arith.constant 0 : i32
    %c0_i32_0 = arith.constant 0 : i32
    %c0_i32_1 = arith.constant 0 : i32
    return %arg0, %c0_i32, %c0_i32_0 : i32, i32, i32
  }
  func.func @transform_3(%arg0: i32, %arg1: i32) -> (i32, i32) {
    %c0_i32 = arith.constant 0 : i32
    %c0_i32_0 = arith.constant 0 : i32
    %c0_i32_1 = arith.constant 0 : i32
    return %c0_i32, %c0_i32_0 : i32, i32
  }
  func.func @transform_4(%arg0: i32, %arg1: i32) -> (i32, i32) {
    %c0_i32 = arith.constant 0 : i32
    %c0_i32_0 = arith.constant 0 : i32
    %c0_i32_1 = arith.constant 0 : i32
    return %c0_i32, %c0_i32_0 : i32, i32
  }
  func.func @transform_5(%arg0: i32, %arg1: i32) -> (i32, i32) {
    %c0_i32 = arith.constant 0 : i32
    %c0_i32_0 = arith.constant 0 : i32
    %c0_i32_1 = arith.constant 0 : i32
    return %c0_i32, %c0_i32_0 : i32, i32
  }
  func.func @transform_6(%arg0: i32, %arg1: i32) -> (i32, i32) {
    %c0_i32 = arith.constant 0 : i32
    %c0_i32_0 = arith.constant 0 : i32
    %c0_i32_1 = arith.constant 0 : i32
    return %c0_i32, %c0_i32_0 : i32, i32
  }
  func.func @transform_7(%arg0: i32, %arg1: i32) -> (i32, i32) {
    %c0_i32 = arith.constant 0 : i32
    %c0_i32_0 = arith.constant 0 : i32
    %c0_i32_1 = arith.constant 0 : i32
    return %c0_i32, %c0_i32_0 : i32, i32
  }
  func.func @transform_8(%arg0: i32, %arg1: i32) -> (i32, i32) {
    %c0_i32 = arith.constant 0 : i32
    %c0_i32_0 = arith.constant 0 : i32
    %c0_i32_1 = arith.constant 0 : i32
    return %c0_i32, %c0_i32_0 : i32, i32
  }
  func.func @transform_9(%arg0: i32, %arg1: i32) -> (i32, i32) {
    %c0_i32 = arith.constant 0 : i32
    %c0_i32_0 = arith.constant 0 : i32
    %c0_i32_1 = arith.constant 0 : i32
    return %c0_i32, %c0_i32_0 : i32, i32
  }
  func.func @transform_10(%arg0: i32, %arg1: i32) -> (i32, i32) {
    %c0_i32 = arith.constant 0 : i32
    %c0_i32_0 = arith.constant 0 : i32
    %c0_i32_1 = arith.constant 0 : i32
    return %c0_i32, %c0_i32_0 : i32, i32
  }
  func.func @transform_11(%arg0: i32, %arg1: i32) -> (i32, i32) {
    %c0_i32 = arith.constant 0 : i32
    %c0_i32_0 = arith.constant 0 : i32
    %c0_i32_1 = arith.constant 0 : i32
    return %c0_i32, %c0_i32_0 : i32, i32
  }
  func.func @transform_12(%arg0: i32, %arg1: i32) -> (i32, i32) {
    %c0_i32 = arith.constant 0 : i32
    %c0_i32_0 = arith.constant 0 : i32
    %c0_i32_1 = arith.constant 0 : i32
    return %c0_i32, %c0_i32_0 : i32, i32
  }
  func.func @transform_13(%arg0: i32, %arg1: i32) -> (i32, i32) {
    %c0_i32 = arith.constant 0 : i32
    %c0_i32_0 = arith.constant 0 : i32
    %c0_i32_1 = arith.constant 0 : i32
    return %c0_i32, %c0_i32_0 : i32, i32
  }
  func.func @transform_14(%arg0: i32, %arg1: i32) -> (i32, i32) {
    %c0_i32 = arith.constant 0 : i32
    %c0_i32_0 = arith.constant 0 : i32
    %c0_i32_1 = arith.constant 0 : i32
    return %c0_i32, %c0_i32_0 : i32, i32
  }
  func.func @transform_15(%arg0: i32, %arg1: i32) -> (i32, i32) {
    %c0_i32 = arith.constant 0 : i32
    %c0_i32_0 = arith.constant 0 : i32
    %c0_i32_1 = arith.constant 0 : i32
    return %c0_i32, %c0_i32_0 : i32, i32
  }
  func.func @transform_16(%arg0: i32, %arg1: i32) -> (i32, i32) {
    %c0_i32 = arith.constant 0 : i32
    %c0_i32_0 = arith.constant 0 : i32
    %c0_i32_1 = arith.constant 0 : i32
    return %c0_i32, %c0_i32_0 : i32, i32
  }
  func.func @transform_17(%arg0: i32, %arg1: i32) -> (i32, i32) {
    %c0_i32 = arith.constant 0 : i32
    %c0_i32_0 = arith.constant 0 : i32
    %c0_i32_1 = arith.constant 0 : i32
    return %c0_i32, %c0_i32_0 : i32, i32
  }
  func.func @transform_18(%arg0: i32, %arg1: i32) -> (i32, i32) {
    %c0_i32 = arith.constant 0 : i32
    %c0_i32_0 = arith.constant 0 : i32
    %c0_i32_1 = arith.constant 0 : i32
    return %c0_i32, %c0_i32_0 : i32, i32
  }
  func.func @transform_19(%arg0: i32, %arg1: i32) -> (i32, i32) {
    %c0_i32 = arith.constant 0 : i32
    %c0_i32_0 = arith.constant 0 : i32
    %c0_i32_1 = arith.constant 0 : i32
    return %c0_i32, %c0_i32_0 : i32, i32
  }
  func.func @transform_20(%arg0: i32, %arg1: i32) -> (i32, i32) {
    %c0_i32 = arith.constant 0 : i32
    %c0_i32_0 = arith.constant 0 : i32
    %c0_i32_1 = arith.constant 0 : i32
    return %c0_i32, %c0_i32_0 : i32, i32
  }
  func.func @transform_21(%arg0: i32, %arg1: i32) -> (i32, i32) {
    %c0_i32 = arith.constant 0 : i32
    %c0_i32_0 = arith.constant 0 : i32
    %c0_i32_1 = arith.constant 0 : i32
    return %c0_i32, %c0_i32_0 : i32, i32
  }
  func.func @transform_22(%arg0: i32, %arg1: i32) -> (i32, i32) {
    %c0_i32 = arith.constant 0 : i32
    %c0_i32_0 = arith.constant 0 : i32
    %c0_i32_1 = arith.constant 0 : i32
    return %c0_i32, %c0_i32_0 : i32, i32
  }
  func.func @transform_23(%arg0: i32, %arg1: i32) -> (i32, i32) {
    %c0_i32 = arith.constant 0 : i32
    %c0_i32_0 = arith.constant 0 : i32
    %c0_i32_1 = arith.constant 0 : i32
    return %c0_i32, %c0_i32_0 : i32, i32
  }
  func.func @transform_24(%arg0: i32, %arg1: i32) -> (i32, i32) {
    %c0_i32 = arith.constant 0 : i32
    %c0_i32_0 = arith.constant 0 : i32
    %c0_i32_1 = arith.constant 0 : i32
    return %c0_i32, %c0_i32_0 : i32, i32
  }
  func.func @transform_25(%arg0: i32, %arg1: i32) -> (i32, i32) {
    %c0_i32 = arith.constant 0 : i32
    %c0_i32_0 = arith.constant 0 : i32
    %c0_i32_1 = arith.constant 0 : i32
    return %c0_i32, %c0_i32_0 : i32, i32
  }
  func.func @transform_26(%arg0: i32, %arg1: i32) -> (i32, i32) {
    %c0_i32 = arith.constant 0 : i32
    %c0_i32_0 = arith.constant 0 : i32
    %c0_i32_1 = arith.constant 0 : i32
    return %c0_i32, %c0_i32_0 : i32, i32
  }
  func.func @transform_27(%arg0: i32, %arg1: i32) -> (i32, i32, i32) {
    %c0_i32 = arith.constant 0 : i32
    %c0_i32_0 = arith.constant 0 : i32
    %c0_i32_1 = arith.constant 0 : i32
    return %arg0, %c0_i32, %c0_i32_0 : i32, i32, i32
  }
}

</mosaic_0001>

<bundles_post_ra>
// kernel: tpu_custom_call.1
= control target key start
LH: loop header
LB: loop body
LE: loop exit
PB: predicated region body
PF: predicated region fallthrough
CT: control target
= control target key end

     0   :  { %s8601_s0 = inlined_call_operand.vmem [shape: f32[2,1,3,128], index: 0, kind: input, shape index: {}]   ;;  %s8602_s1 = inlined_call_operand.vmem [shape: f32[2,1,3], index: 1, kind: input, shape index: {}]   ;;  %s8603_s2 = inlined_call_operand.hbm [shape: f32[2,1,3], index: 2, kind: input, shape index: {}]   ;;  %s8604_s3 = inlined_call_operand.vmem [shape: f32[64,3], index: 3, kind: input, shape index: {}]   ;;  %s8605_s4 = inlined_call_operand.vmem [shape: f32[64,1], index: 4, kind: input, shape index: {}]   ;;  %s8606_s5 = inlined_call_operand.vmem [shape: bf16[128,64], index: 5, kind: input, shape index: {}]   ;;  %s8607_s6 = inlined_call_operand.vmem [shape: f32[128,1], index: 6, kind: input, shape index: {}]   ;;  %s8608_s7 = inlined_call_operand.vmem [shape: bf16[128,128], index: 7, kind: input, shape index: {}]   ;;  %s8609_s8 = inlined_call_operand.vmem [shape: f32[128,1], index: 8, kind: input, shape index: {}]   ;;  %s8610_s9 = inlined_call_operand.vmem [shape: bf16[256,128], index: 9, kind: input, shape index: {}]   ;;  %s8611_s10 = inlined_call_operand.vmem [shape: f32[256,1], index: 10, kind: input, shape index: {}]   ;;  %s8612_s11 = inlined_call_operand.hbm [shape: bf16[256,512], index: 11, kind: input, shape index: {}]   ;;  %s8613_s12 = inlined_call_operand.vmem [shape: f32[1,512], index: 12, kind: input, shape index: {}]   ;;  %s8614_s13 = inlined_call_operand.hbm [shape: f32[3,32], index: 13, kind: input, shape index: {}]   ;;  %s8615_s14 = inlined_call_operand.hbm [shape: f32[1,32], index: 14, kind: input, shape index: {}]   ;;  %s8616_s15 = inlined_call_operand.hbm [shape: f32[3,32], index: 15, kind: input, shape index: {}]   ;;  %s8617_s16 = inlined_call_operand.hbm [shape: f32[1,32], index: 16, kind: input, shape index: {}]   ;;  %s8618_s17 = inlined_call_operand.hbm [shape: f32[512,512], index: 17, kind: input, shape index: {}]   ;;  %s8619_s18 = inlined_call_operand.hbm [shape: f32[32,512], index: 18, kind: input, shape index: {}]   ;;  %s8620_s19 = inlined_call_operand.hbm [shape: f32[32,512], index: 19, kind: input, shape index: {}]   ;;  %s8621_s20 = inlined_call_operand.hbm [shape: f32[1,512], index: 20, kind: input, shape index: {}]   ;;  %s8622_s21 = inlined_call_operand.vmem [shape: f32[512,256], index: 21, kind: input, shape index: {}]   ;;  %s8623_s22 = inlined_call_operand.hbm [shape: f32[1,256], index: 22, kind: input, shape index: {}]   ;;  %s8624_s23 = inlined_call_operand.vmem [shape: f32[256,64], index: 23, kind: input, shape index: {}]   ;;  %s8625_s24 = inlined_call_operand.vmem [shape: f32[1,64], index: 24, kind: input, shape index: {}]   ;;  %s8626_s25 = inlined_call_operand.hbm [shape: f32[64,128], index: 25, kind: input, shape index: {}]   ;;  %s8627_s26 = inlined_call_operand.vmem [shape: f32[1,128], index: 26, kind: input, shape index: {}]   ;;  %s8628_s27 = inlined_call_operand.hbm [shape: f32[2,1,128], index: 27, kind: output, shape index: {}]  }
   0x1   :  { %8661 = sst [smem:[#allocation36_spill]] %s8601_s0 }
   0x2   :  { %8662 = sst [smem:[#allocation37_spill]] %s8602_s1 }
   0x3   :  { %8663 = sst [smem:[#allocation38_spill]] %s8603_s2 }
   0x4   :  { %8664 = sst [smem:[#allocation39_spill]] %s8604_s3 }
   0x5   :  { %8665 = sst [smem:[#allocation40_spill]] %s8605_s4 }
   0x6   :  { %8666 = sst [smem:[#allocation41_spill]] %s8606_s5 }
   0x7   :  { %8667 = sst [smem:[#allocation42_spill]] %s8607_s6 }
   0x8   :  { %8668 = sst [smem:[#allocation43_spill]] %s8608_s7 }
   0x9   :  { %8669 = sst [smem:[#allocation44_spill]] %s8609_s8 }
   0xa   :  { %8670 = sst [smem:[#allocation45_spill]] %s8610_s9 }
   0xb   :  { %8671 = sst [smem:[#allocation46_spill]] %s8611_s10 }
   0xc   :  { %8672 = sst [smem:[#allocation47_spill]] %s8612_s11 }
   0xd   :  { %8673 = sst [smem:[#allocation48_spill]] %s8613_s12 }
   0xe   :  { %8674 = sst [smem:[#allocation49_spill]] %s8614_s13 }
   0xf   :  { %8675 = sst [smem:[#allocation50_spill]] %s8615_s14 }
  0x10   :  { %8676 = sst [smem:[#allocation51_spill]] %s8616_s15 }
  0x11   :  { %8677 = sst [smem:[#allocation52_spill]] %s8617_s16 }
  0x12   :  { %8678 = sst [smem:[#allocation53_spill]] %s8618_s17 }
  0x13   :  { %8679 = sst [smem:[#allocation54_spill]] %s8622_s21 }
  0x14   :  { %8680 = sst [smem:[#allocation55_spill]] %s8624_s23 }
  0x15   :  { %8681 = sst [smem:[#allocation56_spill]] %s8625_s24 }
  0x16   :  { %8682 = sst [smem:[#allocation57_spill]] %s8627_s26 }
  0x17   :  { %8683 = sst [smem:[#allocation58_spill]] %s8628_s27 }
  0x18   :  { %32 = vsyncpa [#allocation4], 0 }
  0x19   :  { %34 = vsyncpa [#allocation4 + $0x1], 0 }
  0x1a   :  { %35 = vsyncpa [#allocation7], 0 }
  0x1b   :  { %36 = vsyncpa [#allocation10], 0 }
  0x1c   :  { %37 = vsyncpa [#allocation13], 0 }
  0x1d   :  { %38 = vsyncpa [#allocation16], 0 }
  0x1e   :  { %39 = vsyncpa [#allocation19], 0 }
  0x1f   :  { %40 = vsyncpa [#allocation22], 0 }
  0x20   :  { %41 = vsyncpa [#allocation5], 0 }
  0x21   :  { %43 = vsyncpa [#allocation5 + $0x1], 0  ;;  %s6905_s7 = smov 0   ;;  %s6907_s4 = smov 0  }
  0x22   :  { %s6909_s8 = smov 0   ;;  %s6911_s30 = smov 0  }
  0x23   :  { %s6913_s9 = smov 0   ;;  %s6915_s5 = smov 0  }
  0x24 LB: > { %8684 = sst [smem:[#allocation32_spill]] %s6716_s7  ;;  %s8639_s28 = sadd.s32 4294967295, %s6736_s5   ;;  %s6736_s5 = sphi %s6915_s5, %s49_s5   ;;  %s6732_s9 = sphi %s6913_s9, %s8744_s9   ;;  %s6728_s30 = sphi %s6911_s30, %s8743_s30   ;;  %s6724_s8 = sphi %s6909_s8, %s8742_s8   ;;  %s6720_s4 = sphi %s6907_s4, %s8741_s4   ;;  %s6716_s7 = sphi %s6905_s7, %s8740_s7  }
  0x25   : > { %8685 = sst [smem:[#allocation33_spill]] %s6728_s30  ;;  %p5009_p0 = scmp.ge.s32.totalorder %s6736_s5, 1 }
  0x26   : > { %p6939_p1 = scmp.eq.s32.totalorder %s8639_s28, 0  ;;  %p676_p2 = scmp.lt.s32.totalorder %s6736_s5, 3 }
  0x27   : > { %s6738_s29 = smov [#allocation6]   ;;  %s6739_s11 = smov [#allocation9]  }
  0x28   : > { %s8686_s0 = scalar_select %p6939_p1, 1, 0 }
  0x29   : > { %p6944_p3 = pnand %p5009_p0, %p676_p2  ;;  %s712_s1 = sshll.u32 %s6738_s29, 4  ;;  %s6948_s1 = int_to_ptr.vmem [resolvable:$true] %s712_s1 }
  0x2a   : > { %8687 = sst [smem:[#allocation34_spill]] %s8686_s0  ;;  %s740_s2 = sshll.u32 %s6739_s11, 4  ;;  %s6959_s2 = int_to_ptr.vmem [resolvable:$true] %s740_s2 }
  0x2b   : > { %s8688_s10 = scalar_select %p6944_p3, 1, 0 }
  0x2c   : > { %p5891_p4 = pneg %p6944_p3  ;;  %s6740_s3 = smov [#allocation12]  }
  0x2d   : > { %8689 = sst [smem:[#allocation35_spill]] %s8688_s10  ;;  %s6961_s28 = sshll.u32 %s6740_s3, 4  ;;  %s763_s28 = int_to_ptr.vmem [resolvable:$true] %s6961_s28 }
  0x2e   : > { %p6955_p6 = pnand %p5891_p4, %p6939_p1  ;;  %s8691_s26 = sld [smem:[#allocation47_spill]] }
  0x30   : > { %p6971_p8 = pneg %p6955_p6 }
  0x34   : > { %s6292_s24 = scalar_lea.hbm %s8691_s26, 8192 }
  0x35   : > { %p6293_p7 = scmp.ne.s32.totalorder %s8691_s26, %s6292_s24  ;;  %p6299_p11 = scmp.lt.u32.totalorder %s6292_s24, %s8691_s26 }
  0x37   : > { %p6295_p9 = pnand %p6971_p8, %p6293_p7 }
  0x39   : > { %p6296_p10 = pneg %p6295_p9 }
  0x3b   : > { %p6301_p12 = pnand %p6299_p11, %p6296_p10 }
  0x3d   : > { %6304 = shalt.err (!%p6301_p12)
}
  0x3e   : > { %s6305_s21 = scalar_lea.vmem %s6948_s1, 8192  ;;  %p6313_p4 = scmp.lt.s32.totalorder %s6948_s1, %s6948_s1 }
  0x3f   : > { %p6306_p13 = scmp.ne.s32.totalorder %s6948_s1, %s6305_s21  ;;  %p6314_p5 = scmp.lt.s32.totalorder %s6305_s21, %s6305_s21 }
  0x41   : > { %p6308_p0 = pnand %p6306_p13, %p6971_p8  ;;  %p6315_p7 = por %p6314_p5, %p6313_p4 }
  0x43   : > { %p6309_p2 = pneg %p6308_p0 }
  0x45   : > { %p6316_p9 = pnand %p6315_p7, %p6309_p2 }
  0x47   : > { %6319 = shalt.err (!%p6316_p9)
}
  0x48   : > { %s6741_s23 = smov 256   ;;  %s6742_s24 = smov 16  }
  0x49   : > { %5894 = dma.hbm_to_vmem [thread:$0]  (!%p6955_p6), %s8691_s26, 8192, %s6948_s1, [#allocation7], %s6741_s23, %s6741_s23, %s6742_s24  }
  0x4a   : > { %s8693_s14 = sld [smem:[#allocation50_spill]] }
  0x50   : > { %s6320_s30 = scalar_lea.hbm %s8693_s14, 16 }
  0x51   : > { %p6321_p5 = scmp.ne.s32.totalorder %s8693_s14, %s6320_s30  ;;  %p6327_p12 = scmp.lt.u32.totalorder %s6320_s30, %s8693_s14 }
  0x53   : > { %p6323_p10 = pnand %p6321_p5, %p6971_p8 }
  0x55   : > { %p6324_p11 = pneg %p6323_p10 }
  0x57   : > { %p6329_p13 = pnand %p6327_p12, %p6324_p11 }
  0x59   : > { %6332 = shalt.err (!%p6329_p13)
}
  0x5a   : > { %s6333_s1 = scalar_lea.vmem %s6959_s2, 16  ;;  %s6340_s0 = scalar_lea.vmem %s6959_s2, 32 }
  0x5b   : > { %p6334_p0 = scmp.ne.s32.totalorder %s6959_s2, %s6333_s1  ;;  %p6341_p7 = scmp.lt.s32.totalorder %s6959_s2, %s6959_s2 }
  0x5c   : > { %p6342_p9 = scmp.lt.s32.totalorder %s6340_s0, %s6333_s1 }
  0x5d   : > { %p6336_p2 = pnand %p6334_p0, %p6971_p8 }
  0x5e   : > { %p6343_p5 = por %p6342_p9, %p6341_p7 }
  0x5f   : > { %p6337_p4 = pneg %p6336_p2 }
  0x61   : > { %p6344_p10 = pnand %p6343_p5, %p6337_p4 }
  0x63   : > { %6347 = shalt.err (!%p6344_p10)
}
  0x64   : > { %5900 = dma.hbm_to_vmem [thread:$0]  (!%p6955_p6), %s8693_s14, 16, %s6959_s2, [#allocation10]  }
  0x65   : > { %s8694_s16 = sld [smem:[#allocation52_spill]] }
  0x6b   : > { %s6348_s24 = scalar_lea.hbm %s8694_s16, 16 }
  0x6c   : > { %p6349_p11 = scmp.ne.s32.totalorder %s8694_s16, %s6348_s24  ;;  %p6355_p0 = scmp.lt.u32.totalorder %s6348_s24, %s8694_s16 }
  0x6e   : > { %p6351_p12 = pnand %p6349_p11, %p6971_p8 }
  0x70   : > { %p6352_p13 = pneg %p6351_p12 }
  0x72   : > { %p6357_p2 = pnand %p6355_p0, %p6352_p13 }
  0x74   : > { %6360 = shalt.err (!%p6357_p2)
}
  0x75   : > { %s6361_s21 = scalar_lea.vmem %s763_s28, 16  ;;  %s6368_s2 = scalar_lea.vmem %s763_s28, 32 }
  0x76   : > { %p6362_p4 = scmp.ne.s32.totalorder %s763_s28, %s6361_s21  ;;  %p6369_p5 = scmp.lt.s32.totalorder %s763_s28, %s763_s28 }
  0x77   : > { %p6370_p10 = scmp.lt.s32.totalorder %s6368_s2, %s6361_s21 }
  0x78   : > { %p6364_p7 = pnand %p6362_p4, %p6971_p8 }
  0x79   : > { %p6371_p3 = por %p6370_p10, %p6369_p5 }
  0x7a   : > { %p6365_p9 = pneg %p6364_p7 }
  0x7c   : > { %p6372_p1 = pnand %p6371_p3, %p6365_p9 }
  0x7e   : > { %6375 = shalt.err (!%p6372_p1)
}
  0x7f   : > { %5906 = dma.hbm_to_vmem [thread:$0]  (!%p6955_p6), %s8694_s16, 16, %s763_s28, [#allocation13]  }
  0x80   : > { %s6743_s7 = smov [#allocation15]   ;;  %s6744_s10 = smov [#allocation18]  }
  0x81   : > { %s785_s30 = sshll.u32 %s6743_s7, 4  ;;  %s812_s23 = sshll.u32 %s6744_s10, 4  ;;  %s786_s30 = int_to_ptr.vmem [resolvable:$true] %s785_s30  ;;  %s813_s23 = int_to_ptr.vmem [resolvable:$true] %s812_s23 }
  0x82   : > { %s6376_s29 = scalar_lea.hbm %s8619_s18, 2048 }
  0x83   : > { %p6377_p1 = scmp.ne.s32.totalorder %s8619_s18, %s6376_s29  ;;  %p6383_p12 = scmp.lt.u32.totalorder %s6376_s29, %s8619_s18 }
  0x85   : > { %p6379_p3 = pnand %p6377_p1, %p6971_p8 }
  0x87   : > { %p6380_p11 = pneg %p6379_p3 }
  0x89   : > { %p6385_p13 = pnand %p6383_p12, %p6380_p11 }
  0x8b   : > { %6388 = shalt.err (!%p6385_p13)
}
  0x8c   : > { %s6389_s28 = scalar_lea.vmem %s786_s30, 2048  ;;  %p6397_p7 = scmp.lt.s32.totalorder %s786_s30, %s786_s30 }
  0x8d   : > { %p6390_p0 = scmp.ne.s32.totalorder %s786_s30, %s6389_s28  ;;  %p6398_p9 = scmp.lt.s32.totalorder %s6389_s28, %s6389_s28 }
  0x8f   : > { %p6392_p2 = pnand %p6390_p0, %p6971_p8  ;;  %p6399_p5 = por %p6398_p9, %p6397_p7 }
  0x91   : > { %p6393_p4 = pneg %p6392_p2 }
  0x93   : > { %p6400_p10 = pnand %p6399_p5, %p6393_p4 }
  0x95   : > { %6403 = shalt.err (!%p6400_p10)
}
  0x96   : > { %s8650_s1 = smov 512   ;;  %s6746_s0 = smov 32  }
  0x97   : > { %5912 = dma.hbm_to_vmem [thread:$0]  (!%p6955_p6), %s8619_s18, 2048, %s786_s30, [#allocation16], %s8650_s1, %s8650_s1, %s6746_s0  }
  0x98   : > { %s6404_s29 = scalar_lea.hbm %s8621_s20, 64 }
  0x99   : > { %p6405_p1 = scmp.ne.s32.totalorder %s8621_s20, %s6404_s29  ;;  %p6411_p12 = scmp.lt.u32.totalorder %s6404_s29, %s8621_s20 }
  0x9b   : > { %p6407_p3 = pnand %p6405_p1, %p6971_p8 }
  0x9d   : > { %p6408_p11 = pneg %p6407_p3 }
  0x9f   : > { %p6413_p13 = pnand %p6411_p12, %p6408_p11 }
  0xa1   : > { %6416 = shalt.err (!%p6413_p13)
}
  0xa2   : > { %s6417_s28 = scalar_lea.vmem %s813_s23, 64  ;;  %p6425_p7 = scmp.lt.s32.totalorder %s813_s23, %s813_s23 }
  0xa3   : > { %p6418_p0 = scmp.ne.s32.totalorder %s813_s23, %s6417_s28  ;;  %p6426_p9 = scmp.lt.s32.totalorder %s6417_s28, %s6417_s28 }
  0xa5   : > { %p6420_p2 = pnand %p6418_p0, %p6971_p8  ;;  %p6427_p5 = por %p6426_p9, %p6425_p7 }
  0xa7   : > { %p6421_p4 = pneg %p6420_p2 }
  0xa9   : > { %p6428_p10 = pnand %p6427_p5, %p6421_p4 }
  0xab   : > { %6431 = shalt.err (!%p6428_p10)
}
  0xac   : > { %5918 = dma.hbm_to_vmem [thread:$0]  (!%p6955_p6), %s8621_s20, 64, %s813_s23, [#allocation19]  }
  0xad   : > { %s6747_s10 = smov [#allocation8]   ;;  %s6748_s27 = smov [#allocation11]  }
  0xae   : > { %s729_s24 = sshll.u32 %s6747_s10, 4  ;;  %s751_s29 = sshll.u32 %s6748_s27, 4  ;;  %s730_s24 = int_to_ptr.vmem [resolvable:$true] %s729_s24  ;;  %s752_s29 = int_to_ptr.vmem [resolvable:$true] %s751_s29 }
  0xaf   : > { %s8695_s13 = sld [smem:[#allocation49_spill]] }
  0xb5   : > { %s6432_s21 = scalar_lea.hbm %s8695_s13, 64 }
  0xb6   : > { %p6433_p1 = scmp.ne.s32.totalorder %s8695_s13, %s6432_s21  ;;  %p6439_p12 = scmp.lt.u32.totalorder %s6432_s21, %s8695_s13 }
  0xb8   : > { %p6435_p3 = pnand %p6433_p1, %p6971_p8 }
  0xba   : > { %p6436_p11 = pneg %p6435_p3 }
  0xbc   : > { %p6441_p13 = pnand %p6439_p12, %p6436_p11 }
  0xbe   : > { %6444 = shalt.err (!%p6441_p13)
}
  0xbf   : > { %s6445_s23 = scalar_lea.vmem %s730_s24, 64  ;;  %p6453_p7 = scmp.lt.s32.totalorder %s730_s24, %s730_s24 }
  0xc0   : > { %p6446_p0 = scmp.ne.s32.totalorder %s730_s24, %s6445_s23  ;;  %p6454_p9 = scmp.lt.s32.totalorder %s6445_s23, %s6445_s23 }
  0xc2   : > { %p6448_p2 = pnand %p6446_p0, %p6971_p8  ;;  %p6455_p5 = por %p6454_p9, %p6453_p7 }
  0xc4   : > { %p6449_p4 = pneg %p6448_p2 }
  0xc6   : > { %p6456_p10 = pnand %p6455_p5, %p6449_p4 }
  0xc8   : > { %6459 = shalt.err (!%p6456_p10)
}
  0xc9   : > { %5897 = dma.hbm_to_vmem [thread:$0]  (!%p6955_p6), %s8695_s13, 64, %s730_s24, [#allocation7]  }
  0xca   : > { %s8696_s15 = sld [smem:[#allocation51_spill]] }
  0xd0   : > { %s6460_s11 = scalar_lea.hbm %s8696_s15, 64 }
  0xd1   : > { %p6461_p1 = scmp.ne.s32.totalorder %s8696_s15, %s6460_s11  ;;  %p6467_p12 = scmp.lt.u32.totalorder %s6460_s11, %s8696_s15 }
  0xd3   : > { %p6463_p3 = pnand %p6461_p1, %p6971_p8 }
  0xd5   : > { %p6464_p11 = pneg %p6463_p3 }
  0xd7   : > { %p6469_p13 = pnand %p6467_p12, %p6464_p11 }
  0xd9   : > { %6472 = shalt.err (!%p6469_p13)
}
  0xda   : > { %s6473_s30 = scalar_lea.vmem %s752_s29, 64  ;;  %p6481_p7 = scmp.lt.s32.totalorder %s752_s29, %s752_s29 }
  0xdb   : > { %p6474_p0 = scmp.ne.s32.totalorder %s752_s29, %s6473_s30  ;;  %p6482_p9 = scmp.lt.s32.totalorder %s6473_s30, %s6473_s30 }
  0xdd   : > { %p6476_p2 = pnand %p6474_p0, %p6971_p8  ;;  %p6483_p5 = por %p6482_p9, %p6481_p7 }
  0xdf   : > { %p6477_p4 = pneg %p6476_p2 }
  0xe1   : > { %p6484_p10 = pnand %p6483_p5, %p6477_p4 }
  0xe3   : > { %6487 = shalt.err (!%p6484_p10)
}
  0xe4   : > { %5903 = dma.hbm_to_vmem [thread:$0]  (!%p6955_p6), %s8696_s15, 64, %s752_s29, [#allocation10]  }
  0xe5   : > { %s6749_s7 = smov [#allocation14]   ;;  %s6750_s1 = smov [#allocation17]  }
  0xe6   : > { %s772_s10 = sshll.u32 %s6749_s7, 4  ;;  %s798_s27 = sshll.u32 %s6750_s1, 4  ;;  %s773_s10 = int_to_ptr.vmem [resolvable:$true] %s772_s10  ;;  %s799_s27 = int_to_ptr.vmem [resolvable:$true] %s798_s27 }
  0xe7   : > { %s8697_s17 = sld [smem:[#allocation53_spill]] }
  0xed   : > { %s6488_s21 = scalar_lea.hbm %s8697_s17, 32768 }
  0xee   : > { %p6489_p1 = scmp.ne.s32.totalorder %s8697_s17, %s6488_s21  ;;  %p6495_p12 = scmp.lt.u32.totalorder %s6488_s21, %s8697_s17 }
  0xf0   : > { %p6491_p3 = pnand %p6489_p1, %p6971_p8 }
  0xf2   : > { %p6492_p11 = pneg %p6491_p3 }
  0xf4   : > { %p6497_p13 = pnand %p6495_p12, %p6492_p11 }
  0xf6   : > { %6500 = shalt.err (!%p6497_p13)
}
  0xf7   : > { %s6501_s29 = scalar_lea.vmem %s773_s10, 32768  ;;  %p6509_p7 = scmp.lt.s32.totalorder %s773_s10, %s773_s10 }
  0xf8   : > { %p6502_p0 = scmp.ne.s32.totalorder %s773_s10, %s6501_s29  ;;  %p6510_p9 = scmp.lt.s32.totalorder %s6501_s29, %s6501_s29 }
  0xfa   : > { %p6504_p2 = pnand %p6502_p0, %p6971_p8  ;;  %p6511_p5 = por %p6510_p9, %p6509_p7 }
  0xfc   : > { %p6505_p4 = pneg %p6504_p2 }
  0xfe   : > { %p6512_p10 = pnand %p6511_p5, %p6505_p4 }
 0x100   : > { %6515 = shalt.err (!%p6512_p10)
}
 0x101   : > { %s8698_s23 = smov 512   ;;  %s6516_s21 = scalar_lea.hbm %s8620_s19, 2048 }
 0x102   : > { %5909 = dma.hbm_to_vmem [thread:$0]  (!%p6955_p6), %s8697_s17, 32768, %s773_s10, [#allocation13], %s8698_s23, %s8698_s23, %s6746_s0  }
 0x103   : > { %p6517_p1 = scmp.ne.s32.totalorder %s8620_s19, %s6516_s21  ;;  %p6523_p12 = scmp.lt.u32.totalorder %s6516_s21, %s8620_s19 }
 0x105   : > { %p6519_p3 = pnand %p6517_p1, %p6971_p8 }
 0x107   : > { %p6520_p11 = pneg %p6519_p3 }
 0x109   : > { %p6525_p13 = pnand %p6523_p12, %p6520_p11 }
 0x10b   : > { %6528 = shalt.err (!%p6525_p13)
}
 0x10c   : > { %s6529_s29 = scalar_lea.vmem %s799_s27, 2048  ;;  %p6537_p7 = scmp.lt.s32.totalorder %s799_s27, %s799_s27 }
 0x10d   : > { %p6530_p0 = scmp.ne.s32.totalorder %s799_s27, %s6529_s29  ;;  %p6538_p9 = scmp.lt.s32.totalorder %s6529_s29, %s6529_s29 }
 0x10f   : > { %p6532_p2 = pnand %p6530_p0, %p6971_p8  ;;  %p6539_p5 = por %p6538_p9, %p6537_p7 }
 0x111   : > { %p6533_p4 = pneg %p6532_p2 }
 0x113   : > { %p6540_p10 = pnand %p6539_p5, %p6533_p4 }
 0x115   : > { %6543 = shalt.err (!%p6540_p10)
}
 0x116   : > { %5915 = dma.hbm_to_vmem [thread:$0]  (!%p6955_p6), %s8620_s19, 2048, %s799_s27, [#allocation16], %s8698_s23, %s8698_s23, %s6746_s0  }
 0x117   : > { %s6751_s1 = smov [#allocation20]   ;;  %s6752_s3 = smov [#allocation21]  }
 0x118   : > { %s826_s11 = sshll.u32 %s6751_s1, 4  ;;  %s842_s21 = sshll.u32 %s6752_s3, 4  ;;  %s827_s11 = int_to_ptr.vmem [resolvable:$true] %s826_s11  ;;  %s843_s21 = int_to_ptr.vmem [resolvable:$true] %s842_s21 }
 0x119   : > { %s6544_s30 = scalar_lea.hbm %s8623_s22, 32 }
 0x11a   : > { %p6545_p1 = scmp.ne.s32.totalorder %s8623_s22, %s6544_s30  ;;  %p6551_p12 = scmp.lt.u32.totalorder %s6544_s30, %s8623_s22 }
 0x11c   : > { %p6547_p3 = pnand %p6545_p1, %p6971_p8 }
 0x11e   : > { %p6548_p11 = pneg %p6547_p3 }
 0x120   : > { %p6553_p13 = pnand %p6551_p12, %p6548_p11 }
 0x122   : > { %6556 = shalt.err (!%p6553_p13)
}
 0x123   : > { %s6557_s0 = scalar_lea.vmem %s827_s11, 32  ;;  %p6565_p7 = scmp.lt.s32.totalorder %s827_s11, %s827_s11 }
 0x124   : > { %p6558_p0 = scmp.ne.s32.totalorder %s827_s11, %s6557_s0  ;;  %p6566_p9 = scmp.lt.s32.totalorder %s6557_s0, %s6557_s0 }
 0x126   : > { %p6560_p2 = pnand %p6558_p0, %p6971_p8  ;;  %p6567_p5 = por %p6566_p9, %p6565_p7 }
 0x128   : > { %p6561_p4 = pneg %p6560_p2 }
 0x12a   : > { %p6568_p10 = pnand %p6567_p5, %p6561_p4 }
 0x12c   : > { %6571 = shalt.err (!%p6568_p10)
}
 0x12d   : > { %5921 = dma.hbm_to_vmem [thread:$0]  (!%p6955_p6), %s8623_s22, 32, %s827_s11, [#allocation19]  }
 0x12e   : > { %s6572_s1 = scalar_lea.hbm %s8626_s25, 1024 }
 0x12f   : > { %p6573_p1 = scmp.ne.s32.totalorder %s8626_s25, %s6572_s1  ;;  %p6579_p12 = scmp.lt.u32.totalorder %s6572_s1, %s8626_s25 }
 0x131   : > { %p6575_p3 = pnand %p6573_p1, %p6971_p8 }
 0x133   : > { %p6576_p11 = pneg %p6575_p3 }
 0x135   : > { %p6581_p13 = pnand %p6579_p12, %p6576_p11 }
 0x137   : > { %6584 = shalt.err (!%p6581_p13)
}
 0x138   : > { %s6585_s24 = scalar_lea.vmem %s843_s21, 1024  ;;  %p6593_p7 = scmp.lt.s32.totalorder %s843_s21, %s843_s21 }
 0x139   : > { %p6586_p0 = scmp.ne.s32.totalorder %s843_s21, %s6585_s24  ;;  %p6594_p9 = scmp.lt.s32.totalorder %s6585_s24, %s6585_s24 }
 0x13b   : > { %p6588_p2 = pnand %p6586_p0, %p6971_p8  ;;  %p6595_p5 = por %p6594_p9, %p6593_p7 }
 0x13d   : > { %p6589_p4 = pneg %p6588_p2 }
 0x13f   : > { %p6596_p10 = pnand %p6595_p5, %p6589_p4 }
 0x141   : > { %6599 = shalt.err (!%p6596_p10)
}
 0x142   : > { %s6753_s11 = smov 128   ;;  %s8699_s29 = sld [smem:[#allocation32_spill]] }
 0x143   : > { %s8700_s10 = sld [smem:[#allocation34_spill]]  ;;  %s6754_s12 = smov 8  }
 0x144   : > { %5924 = dma.hbm_to_vmem [thread:$0]  (!%p6955_p6), %s8626_s25, 1024, %s843_s21, [#allocation22], %s6753_s11, %s6753_s11, %s6754_s12  }
 0x145   : > { %s5008_s23 = sadd.s32 4294967294, %s6736_s5   ;;  %s61_s13 = sadd.s32 1, %s6732_s9 }
 0x146   : > { %s122_s7 = sadd.s32 1, %s6724_s8  ;;  %p63_p8 = scmp.ge.s32.totalorder %s61_s13, 2 }
 0x147   : > { %p129_p1 = scmp.ne.s32.totalorder %s6724_s8, %s6720_s4  ;;  %p130_p3 = scmp.eq.s32.totalorder %s6736_s5, 0 }
 0x148   : > { %p135_p11 = scmp.ne.s32.totalorder %s6720_s4, %s8699_s29  ;;  %s8746_s13 = smov (%p63_p8, %s61_s13), 0 }
 0x149   : > { %p7198_p12 = por %p130_p3, %p129_p1  ;;  %p8702_p13 = scmp.ne.s32.totalorder %s8700_s10, 0 }
 0x14a   : > { %s119_s1 = ssub.s32 %s6732_s9, %s8746_s13  ;;  %s8704_s3 = sadd.s32 4294967295, %s6736_s5  }
 0x14b   : > { %p7204_p6 = por %p8702_p13, %p135_p11  ;;  %p663_p0 = scmp.eq.s32.totalorder %s8704_s3, 1 }
 0x14c   : > { %p120_p2 = scmp.eq.s32.totalorder %s119_s1, 0  ;;  %p669_p4 = scmp.eq.s32.totalorder %s5008_s23, 1 }
 0x14d   : > { %p7212_p7 = por %p663_p0, %p129_p1  ;;  %p5944_p9 = scmp.lt.s32.totalorder %s6736_s5, 2 }
 0x14e   : > { %s7218_s28 = scalar_select %p120_p2, %s6724_s8, %s122_s7  }
 0x14f   : > { %s8705_s2 = scalar_select %p7212_p7, 1, 0 }
 0x150   : > { %p7220_p5 = por %p669_p4, %p135_p11  ;;  %s875_s24 = sand.u32 1, %s6724_s8  }
 0x151   : > { %s5022_s11 = sshll.u32 %s6732_s9, 4  ;;  %s878_s29 = scalar_lea.vmem [#allocation3], %s875_s24 }
 0x152   : > { %s8706_s30 = scalar_select %p7220_p5, 1, 0 }
 0x153   : > { %s885_s10 = sshll.u32 %s878_s29, 4  ;;  %s8707_s27 = sld [smem:[#allocation38_spill]]  ;;  %s7231_s10 = int_to_ptr.vmem [resolvable:$true] %s885_s10 }
 0x154   : > { %p7235_p10 = pnand %p5944_p9, %p7198_p12  ;;  %s876_s7 = scalar_lea.sflag [#allocation4], %s875_s24 }
 0x156   : > { %p6602_p1 = pneg %p7235_p10 }
 0x159   : > { %s7229_s1 = scalar_lea.hbm %s8707_s27, %s5022_s11  ;;  %s6605_s12 = scalar_lea.hbm %s8707_s27, 32 }
 0x15a   : > { %s6600_s3 = scalar_lea.hbm %s7229_s1, 16  ;;  %p6606_p12 = scmp.lt.u32.totalorder %s7229_s1, %s8707_s27 }
 0x15b   : > { %p6601_p8 = scmp.ne.s32.totalorder %s7229_s1, %s6600_s3  ;;  %p6607_p13 = scmp.lt.u32.totalorder %s6605_s12, %s6600_s3 }
 0x15c   : > { %p6609_p2 = scmp.lt.u32.totalorder %s6600_s3, %s7229_s1 }
 0x15d   : > { %p6603_p3 = pnand %p6602_p1, %p6601_p8  ;;  %p6608_p0 = por %p6607_p13, %p6606_p12 }
 0x15f   : > { %p6604_p11 = pneg %p6603_p3  ;;  %p6610_p4 = por %p6609_p2, %p6608_p0 }
 0x161   : > { %p6611_p9 = pnand %p6610_p4, %p6604_p11 }
 0x163   : > { %6614 = shalt.err (!%p6611_p9)
}
 0x164   : > { %s6615_s24 = scalar_lea.vmem %s7231_s10, 16  ;;  %s6755_s11 = smov [#allocation3]  }
 0x165   : > { %p6616_p8 = scmp.ne.s32.totalorder %s7231_s10, %s6615_s24  ;;  %s6620_s29 = sshll.u32 %s6755_s11, 4  ;;  %s6621_s29 = int_to_ptr.vmem [resolvable:$false] %s6620_s29 }
 0x166   : > { %s6622_s6 = scalar_lea.vmem %s6621_s29, 32  ;;  %p6623_p7 = scmp.lt.s32.totalorder %s7231_s10, %s6621_s29 }
 0x167   : > { %p6618_p3 = pnand %p6616_p8, %p6602_p1  ;;  %p6624_p12 = scmp.lt.s32.totalorder %s6622_s6, %s6615_s24 }
 0x169   : > { %p6619_p5 = pneg %p6618_p3  ;;  %p6625_p13 = por %p6624_p12, %p6623_p7 }
 0x16b   : > { %p6626_p0 = pnand %p6625_p13, %p6619_p5 }
 0x16d   : > { %6629 = shalt.err (!%p6626_p0)
}
 0x16e   : > { %5928 = dma.hbm_to_vmem [thread:$0]  (!%p7235_p10), %s7229_s1, 16, %s7231_s10, %s876_s7  }
 0x16f   : > { %s8709_s3 = sld [smem:[#allocation35_spill]] }
 0x175   : > { %p8710_p11 = scmp.ne.s32.totalorder %s8709_s3, 0 }
 0x176   : > { %s7267_s12 = sand.u32 (!%p8710_p11), 1, %s6720_s4  }
 0x177   : > { %894 = sbr.rel (%p8710_p11) target bundleno = 3050 (0xbea), region = 128  ;;  %s897_s0 = scalar_lea.sflag (!%p8710_p11), [#allocation4], %s7267_s12 }
 0x17e   : > { %6683 = dma.done.wait (%p7204_p6), %s897_s0, 16  }
 0x17f   : > { %6685 = vsyncadd (%p7204_p6), %s897_s0, 4294967280  ;;  %s8711_s23 = sld [smem:[#allocation34_spill]] }
 0x185   : > { %p8712_p7 = scmp.ne.s32.totalorder %s8711_s23, 0 }
 0x187   : > { %6687 = dma.done.wait (%p8712_p7), [#allocation7], 8256  }
 0x188   : > { %6689 = vsyncadd (%p8712_p7), [#allocation7], 4294959040 }
 0x189   : > { %6691 = dma.done.wait (%p8712_p7), [#allocation10], 80  }
 0x18a   : > { %6693 = vsyncadd (%p8712_p7), [#allocation10], 4294967216 }
 0x18b   : > { %6695 = dma.done.wait (%p8712_p7), [#allocation13], 32784  }
 0x18c   : > { %6697 = vsyncadd (%p8712_p7), [#allocation13], 4294934512 }
 0x18d   : > { %6699 = dma.done.wait (%p8712_p7), [#allocation16], 4096  }
 0x18e   : > { %6701 = vsyncadd (%p8712_p7), [#allocation16], 4294963200 }
 0x18f   : > { %6703 = dma.done.wait (%p8712_p7), [#allocation19], 96  }
 0x190   : > { %6705 = vsyncadd (%p8712_p7), [#allocation19], 4294967200 }
 0x191   : > { %6707 = dma.done.wait (%p8712_p7), [#allocation22], 1024  }
 0x192   : > { %6709 = vsyncadd (%p8712_p7), [#allocation22], 4294966272  ;;  %v6756_v0 = vmov 2   ;;  %v6757_v1 = vmov 1   ;;  %s8713_s1 = sld [smem:[#allocation39_spill]]  ;;  %v6758_v7 = vmov 0   ;;  %v1037_v62 = vlaneseq }
 0x193   : > { %6031 = vset.pattern.permute.xlu0 %v6756_v0  ;;  %6030 = vset.pattern.permute.xlu1 %v6757_v1  ;;  %s8714_s0 = sld [smem:[#allocation40_spill]]  ;;  %s8715_s10 = sld [smem:[#allocation42_spill]]  ;;  %vm1588_vm0 = vcmask 523264   ;;  %vm3677_vm1 = vcmask 261120   ;;  %vm6763_vm3 = vmmov 0  }
 0x194   : > { %s8716_s6 = sld [smem:[#allocation44_spill]]  ;;  %s8718_s7 = sld [smem:[#allocation46_spill]]  ;;  %vm7920_vm2 = vcmp.lt.s32.totalorder %v1037_v62, 512 }
 0x195   : > { %s8720_s16 = sld [smem:[#allocation33_spill]]  ;;  %s8726_s23 = sld [smem:[#allocation48_spill]] }
 0x196   : > { %s8721_s3 = sld [smem:[#allocation36_spill]]  ;;  %s8729_s17 = scalar_lea.vmem [#allocation3], %s7267_s12 }
 0x197   : > { %s1021_s15 = scalar_lea.vmem [#allocation23], %s7267_s12  ;;  %p8736_p10 = scmp.ne.s32.totalorder %s8705_s2, 0 }
 0x198   : > { %v1042_v2 = vld [vmem:[%s8713_s1] sm:$0xff]  ;;  %v1044_v3 = vld [vmem:[%s8713_s1 + $0x10] sm:$0xff]  ;;  %v1043_v4 = vld [vmem:[%s8713_s1 + $0x8] sm:$0xff] }
 0x199   : > { %1357 = vperm.xlu0 %6031, %v1042_v2   ;;  %1305 = vperm.xlu1 %6030, %v1042_v2   ;;  %v1047_v5 = vld [vmem:[%s8713_s1 + $0x28] sm:$0xff]  ;;  %v1046_v6 = vld [vmem:[%s8713_s1 + $0x20] sm:$0xff]  ;;  %v1049_v8 = vld [vmem:[%s8713_s1 + $0x38] sm:$0xff] }
 0x19a   : > { %v1045_v9 = vld [vmem:[%s8713_s1 + $0x18] sm:$0xff]  ;;  %v1050_v10 = vld [vmem:[%s8714_s0] sm:$0xff]  ;;  %v1051_v11 = vld [vmem:[%s8714_s0 + $0x8] sm:$0xff]  ;;  %s8719_s24 = smov %s8718_s7 }
 0x19b   : > { %v1048_v12 = vld [vmem:[%s8713_s1 + $0x30] sm:$0xff]  ;;  %v1054_v13 = vld [vmem:[%s8714_s0 + $0x20] sm:$0xff]  ;;  %v1057_v14 = vld [vmem:[%s8714_s0 + $0x38] sm:$0xff]  ;;  %p1022_p6 = scmp.lt.s32.totalorder %s8720_s16, 1 }
 0x19c   : > { %v1075_v15 = vld [vmem:[%s8715_s10 + $0x8] sm:$0xff]  ;;  %v1077_v16 = vld [vmem:[%s8715_s10 + $0x18] sm:$0xff]  ;;  %v1052_v17 = vld [vmem:[%s8714_s0 + $0x10] sm:$0xff] }
 0x19d   : > { %1365 = vperm.xlu0 %6031, %v1044_v3   ;;  %1309 = vperm.xlu1 %6030, %v1043_v4   ;;  %v1079_v18 = vld [vmem:[%s8715_s10 + $0x28] sm:$0xff]  ;;  %v1053_v19 = vld [vmem:[%s8714_s0 + $0x18] sm:$0xff]  ;;  %v1056_v28 = vld [vmem:[%s8714_s0 + $0x30] sm:$0xff]  ;;  %s7477_s1 = scalar_select %p1022_p6, %s8720_s16, 1 }
 0x19e   : > { %v1081_v20 = vld [vmem:[%s8715_s10 + $0x38] sm:$0xff]  ;;  %v1083_v21 = vld [vmem:[%s8715_s10 + $0x48] sm:$0xff]  ;;  %v1074_v30 = vld [vmem:[%s8715_s10] sm:$0xff] }
 0x19f   : > { %v1085_v22 = vld [vmem:[%s8715_s10 + $0x58] sm:$0xff]  ;;  %v1087_v23 = vld [vmem:[%s8715_s10 + $0x68] sm:$0xff]  ;;  %v1076_v32 = vld [vmem:[%s8715_s10 + $0x10] sm:$0xff]  ;;  %s5035_s21 = sshll.u32 %s7477_s1, 2 }
 0x1a0   : > { %v1089_v24 = vld [vmem:[%s8715_s10 + $0x78] sm:$0xff]  ;;  %v1107_v25 = vld [vmem:[%s8716_s6 + $0x8] sm:$0xff]  ;;  %v1078_v35 = vld [vmem:[%s8715_s10 + $0x20] sm:$0xff]  ;;  %s1028_s14 = scalar_lea.vmem %s8721_s3, %s5035_s21  ;;  %s8725_s3 = sld [smem:[#allocation37_spill]] }
 0x1a1   : > { %1377 = vperm.xlu0 %6031, %v1047_v5   ;;  %6032 = vset.pattern.permute.xlu1 %v6756_v0  ;;  %v1055_v26 = vld [vmem:[%s8714_s0 + $0x28] sm:$0xff]  ;;  %v1109_v27 = vld [vmem:[%s8716_s6 + $0x18] sm:$0xff]  ;;  %s8717_s0 = sld [smem:[#allocation41_spill]]  ;;  %v1080_v37 = vld [vmem:[%s8715_s10 + $0x30] sm:$0xff] }
 0x1a2   : > { %1361 = vperm.xlu1 %6032, %v1043_v4   ;;  %v1111_v29 = vld [vmem:[%s8716_s6 + $0x28] sm:$0xff]  ;;  %v1113_v31 = vld [vmem:[%s8716_s6 + $0x38] sm:$0xff]  ;;  %v1082_v39 = vld [vmem:[%s8715_s10 + $0x40] sm:$0xff] }
 0x1a3   : > { %v1115_v34 = vld [vmem:[%s8716_s6 + $0x48] sm:$0xff]  ;;  %v1117_v36 = vld [vmem:[%s8716_s6 + $0x58] sm:$0xff]  ;;  %v1084_v41 = vld [vmem:[%s8715_s10 + $0x50] sm:$0xff] }
 0x1a4   : > { %v1119_v38 = vld [vmem:[%s8716_s6 + $0x68] sm:$0xff]  ;;  %v1121_v40 = vld [vmem:[%s8716_s6 + $0x78] sm:$0xff]  ;;  %v1154_v42 = vld [vmem:[%s8718_s7] sm:$0xff]  ;;  %s8723_s7 = sld [smem:[#allocation45_spill]] }
 0x1a5   : > { %6039 = vset.pattern.permute.xlu0 %v6757_v1  ;;  %v1086_v43 = vld [vmem:[%s8715_s10 + $0x60] sm:$0xff]  ;;  %v1155_v44 = vld [vmem:[%s8719_s24 + $0x8] sm:$0xff]  ;;  %v1088_v45 = vld [vmem:[%s8715_s10 + $0x70] sm:$0xff]  ;;  %s8722_s10 = sld [smem:[#allocation43_spill]] }
 0x1a6   : > { %1321 = vperm.xlu0 %6039, %v1046_v6   ;;  %6033 = vset.pattern.permute.xlu1 %v6758_v7  ;;  %v1156_v46 = vld [vmem:[%s8719_s24 + $0x10] sm:$0xff]  ;;  %v1106_v47 = vld [vmem:[%s8716_s6] sm:$0xff]  ;;  %v1157_v48 = vld [vmem:[%s8719_s24 + $0x18] sm:$0xff] }
 0x1a7   : > { %1264 = vperm.xlu1 %6033, %v1044_v3   ;;  %v6164_v33 = vld [vmem:[%s8717_s0] sm:$0xff]   ;;  %v1108_v49 = vld [vmem:[%s8716_s6 + $0x10] sm:$0xff]  ;;  %v1159_v56 = vld [vmem:[%s8719_s24 + $0x28] sm:$0xff] }
 0x1a8   : > { %5252 = vmatprep.mubr.msk.bf16.mxu0 %vm1588_vm0, %v6164_v33  ;;  %v1158_v52 = vld [vmem:[%s8719_s24 + $0x20] sm:$0xff]  ;;  %v1112_v57 = vld [vmem:[%s8716_s6 + $0x30] sm:$0xff]  ;;  %v1161_v63 = vld [vmem:[%s8719_s24 + $0x38] sm:$0xff] }
 0x1a9   : > { %v1110_v53 = vld [vmem:[%s8716_s6 + $0x20] sm:$0xff]  ;;  %v1160_v59 = vld [vmem:[%s8719_s24 + $0x30] sm:$0xff] }
 0x1aa   : > { %1333 = vperm.xlu0 %6039, %v1049_v8   ;;  %v1114_v61 = vld [vmem:[%s8716_s6 + $0x40] sm:$0xff]  ;;  %s8724_s11 = smov %s8723_s7 }
 0x1ab   : > { %6034 = vset.pattern.permute.xlu1 %v6757_v1 }
 0x1ac   : > { %1313 = vperm.xlu1 %6034, %v1044_v3   ;;  %v1116_v3 = vld [vmem:[%s8716_s6 + $0x50] sm:$0xff] }
 0x1ae   : > { %6042 = vset.pattern.permute.xlu0 %v6758_v7 }
 0x1af   : > { %1254 = vperm.xlu0 %6042, %v1042_v2  }
 0x1b0   : > { %1317 = vperm.xlu1 %6034, %v1045_v9  }
 0x1b3   : > { %1259 = vperm.xlu0 %6042, %v1043_v4   ;;  %v7492_v4 = vshrl.u32 %v1037_v62, 7 }
 0x1b4   : > { %6035 = vset.pattern.permute.xlu1 %v6756_v0 }
 0x1b5   : > { %1369 = vperm.xlu1 %6035, %v1045_v9  }
 0x1b7   : > { %1269 = vperm.xlu0 %6042, %v1045_v9   ;;  %v1118_v9 = vld [vmem:[%s8716_s6 + $0x60] sm:$0xff] }
 0x1b9   : > { %6036 = vset.pattern.permute.xlu1 %v6758_v7 }
 0x1ba   : > { %1410 = vperm.xlu1 %6036, %v1050_v10   ;;  %v7508_v10 = vsub.s32 1, %v7492_v4 }
 0x1bb   : > { %1415 = vperm.xlu0 %6042, %v1051_v11   ;;  %v7511_v11 = vsub.s32 0, %v7492_v4 }
 0x1be   : > { %1274 = vperm.xlu1 %6036, %v1046_v6  }
 0x1bf   : > { %1284 = vperm.xlu0 %6042, %v1048_v12  }
 0x1c2   : > { %1279 = vperm.xlu1 %6036, %v1047_v5  }
 0x1c3   : > { %1430 = vperm.xlu0 %6042, %v1054_v13  }
 0x1c6   : > { %6037 = vset.pattern.permute.xlu1 %v6757_v1 }
 0x1c7   : > { %1445 = vperm.xlu0 %6042, %v1057_v14   ;;  %1325 = vperm.xlu1 %6037, %v1047_v5   ;;  %v1163_v14 = vld [vmem:[%s8719_s24 + $0x48] sm:$0xff] }
 0x1cb   : > { %1475 = vperm.xlu0 %6042, %v1075_v15   ;;  %6038 = vset.pattern.permute.xlu1 %v6756_v0  ;;  %v1120_v15 = vld [vmem:[%s8716_s6 + $0x70] sm:$0xff]  ;;  %s8732_s6 = sld [smem:[#allocation56_spill]] }
 0x1cc   : > { %1373 = vperm.xlu1 %6038, %v1046_v6   ;;  %v1162_v6 = vld [vmem:[%s8719_s24 + $0x40] sm:$0xff] }
 0x1cf   : > { %1485 = vperm.xlu0 %6042, %v1077_v16  }
 0x1d0   : > { %6040 = vset.pattern.permute.xlu1 %v6758_v7 }
 0x1d1   : > { %1420 = vperm.xlu1 %6040, %v1052_v17   ;;  %v7523_v17 = vsub.s32 2, %v7492_v4 }
 0x1d3   : > { %1495 = vperm.xlu0 %6042, %v1079_v18  }
 0x1d5   : > { %1425 = vperm.xlu1 %6040, %v1053_v19  }
 0x1d7   : > { %1505 = vperm.xlu0 %6042, %v1081_v20  }
 0x1d9   : > { %1289 = vperm.xlu1 %6040, %v1049_v8  }
 0x1db   : > { %1515 = vperm.xlu0 %6042, %v1083_v21  }
 0x1dd   : > { %6041 = vset.pattern.permute.xlu1 %v6757_v1 }
 0x1de   : > { %1329 = vperm.xlu1 %6041, %v1048_v12  }
 0x1df   : > { %1525 = vperm.xlu0 %6042, %v1085_v22   ;;  %v1164_v22 = vld [vmem:[%s8719_s24 + $0x50] sm:$0xff] }
 0x1e2   : > { %6043 = vset.pattern.permute.xlu1 %v6756_v0 }
 0x1e3   : > { %1535 = vperm.xlu0 %6042, %v1087_v23   ;;  %1381 = vperm.xlu1 %6043, %v1048_v12   ;;  %v1251_v12 = vld [vmem:[%s1028_s14] sm:$0x7]  ;;  %s1031_s14 = scalar_lea.vmem %s8725_s3, %s7477_s1  ;;  %s5145_s1 = sshll.u32 %s8720_s16, 4 }
 0x1e4   : > { %v7520_v16 = vrot.slane %v1251_v12, %v7508_v10  ;;  %v7526_v18 = vrot.slane %v1251_v12, %v7511_v11  ;;  %v1170_v23 = vld [vmem:[%s8719_s24 + $0x80] sm:$0xff]  ;;  %s6764_s16 = smov [#allocation23]  }
 0x1e5   : > { %s6634_s3 = sshll.u32 %s6764_s16, 4  ;;  %s6635_s3 = int_to_ptr.vmem [resolvable:$false] %s6634_s3 }
 0x1e7   : > { %1545 = vperm.xlu0 %6042, %v1089_v24   ;;  %1385 = vperm.xlu1 %6043, %v1049_v8  }
 0x1eb   : > { %1741 = vperm.xlu0 %6042, %v1107_v25   ;;  %6044 = vset.pattern.permute.xlu1 %v6758_v7  ;;  %v7537_v25 = vrot.slane %v1251_v12, %v7523_v17 }
 0x1ec   : > { %1435 = vperm.xlu1 %6044, %v1055_v26  }
 0x1ef   : > { %1751 = vperm.xlu0 %6042, %v1109_v27  }
 0x1f0   : > { %1440 = vperm.xlu1 %6044, %v1056_v28  }
 0x1f3   : > { %1761 = vperm.xlu0 %6042, %v1111_v29  }
 0x1f4   : > { %1470 = vperm.xlu1 %6044, %v1074_v30  }
 0x1f7   : > { %1771 = vperm.xlu0 %6042, %v1113_v31  }
 0x1f8   : > { %1480 = vperm.xlu1 %6044, %v1076_v32   ;;  %v1165_v32 = vld [vmem:[%s8719_s24 + $0x58] sm:$0xff] }
 0x1fb   : > { %1781 = vperm.xlu0 %6042, %v1115_v34   ;;  %v1171_v34 = vld [vmem:[%s8719_s24 + $0x88] sm:$0xff] }
 0x1fc   : > { %1490 = vperm.xlu1 %6044, %v1078_v35  }
 0x1ff   : > { %1791 = vperm.xlu0 %6042, %v1117_v36  }
 0x200   : > { %1500 = vperm.xlu1 %6044, %v1080_v37  }
 0x203   : > { %1801 = vperm.xlu0 %6042, %v1119_v38   ;;  %v1166_v38 = vld [vmem:[%s8719_s24 + $0x60] sm:$0xff] }
 0x204   : > { %1510 = vperm.xlu1 %6044, %v1082_v39  }
 0x207   : > { %1811 = vperm.xlu0 %6042, %v1121_v40  }
 0x208   : > { %1520 = vperm.xlu1 %6044, %v1084_v41   ;;  %v1172_v41 = vld [vmem:[%s8719_s24 + $0x90] sm:$0xff] }
 0x20b   : > { %1985 = vperm.xlu0 %6042, %v1154_v42  }
 0x20c   : > { %1530 = vperm.xlu1 %6044, %v1086_v43  }
 0x20f   : > { %1990 = vperm.xlu0 %6042, %v1155_v44  }
 0x210   : > { %1540 = vperm.xlu1 %6044, %v1088_v45  }
 0x213   : > { %1995 = vperm.xlu0 %6042, %v1156_v46   ;;  %v1167_v46 = vld [vmem:[%s8719_s24 + $0x68] sm:$0xff] }
 0x214   : > { %1736 = vperm.xlu1 %6044, %v1106_v47  }
 0x217   : > { %2000 = vperm.xlu0 %6042, %v1157_v48  }
 0x218   : > { %1746 = vperm.xlu1 %6044, %v1108_v49   ;;  %v1306_v50 = vpop.permute.xlu1 %1305  ;;  %v1358_v51 = vpop.permute.xlu0 %1357  ;;  %v1173_v49 = vld [vmem:[%s8719_s24 + $0x98] sm:$0xff] }
 0x219   : > { %v1340_v24 = vmul.f32 %v7520_v16, %v1306_v50  ;;  %v1392_v29 = vmul.f32 %v7537_v25, %v1358_v51  ;;  %v1168_v51 = vld [vmem:[%s8719_s24 + $0x70] sm:$0xff] }
 0x21b   : > { %2005 = vperm.xlu0 %6042, %v1158_v52  }
 0x21c   : > { %1756 = vperm.xlu1 %6044, %v1110_v53   ;;  %v1310_v54 = vpop.permute.xlu1 %1309  ;;  %v7462_v55 = vpop.permute.xlu0 %1365  ;;  %v1174_v53 = vld [vmem:[%s8719_s24 + $0xa0] sm:$0xff] }
 0x21d   : > { %v1341_v27 = vmul.f32 %v7520_v16, %v1310_v54  ;;  %v1169_v54 = vld [vmem:[%s8719_s24 + $0x78] sm:$0xff] }
 0x21f   : > { %2010 = vperm.xlu0 %6042, %v1159_v56   ;;  %v1175_v56 = vld [vmem:[%s8719_s24 + $0xa8] sm:$0xff] }
 0x220   : > { %1766 = vperm.xlu1 %6044, %v1112_v57   ;;  %v7471_v58 = vpop.permute.xlu0 %1377 }
 0x221   : > { %v1362_v60 = vpop.permute.xlu1 %1361 }
 0x222   : > { %v1393_v36 = vmul.f32 %v7537_v25, %v1362_v60  ;;  %v1176_v60 = vld [vmem:[%s8719_s24 + $0xb0] sm:$0xff] }
 0x223   : > { %2015 = vperm.xlu0 %6042, %v1160_v59  }
 0x224   : > { %1776 = vperm.xlu1 %6044, %v1114_v61  }
 0x225   : > { %v7486_v2 = vpop.permute.xlu0 %1321 }
 0x226   : > { %v7494_v5 = vpop.permute.xlu1 %1264 }
 0x227   : > { %2020 = vperm.xlu0 %6042, %v1161_v63   ;;  %v1298_v61 = vmul.f32 %v7526_v18, %v7494_v5 }
 0x228   : > { %1786 = vperm.xlu1 %6044, %v1116_v3  }
 0x229   : > { %v7502_v8 = vpop.permute.xlu0 %1333 }
 0x22b   : > { %2025 = vperm.xlu0 %6042, %v1162_v6   ;;  %v1314_v13 = vpop.permute.xlu1 %1313  ;;  %v1394_v6 = vmul.f32 %v7537_v25, %v7462_v55 }
 0x22c   : > { %1796 = vperm.xlu1 %6044, %v1118_v9   ;;  %v1342_v59 = vmul.f32 %v7520_v16, %v1314_v13  ;;  %v1177_v13 = vld [vmem:[%s8719_s24 + $0xb8] sm:$0xff] }
 0x22e   : > { %v1255_v19 = vpop.permute.xlu0 %1254  ;;  %v1350_v9 = vadd.f32 %v1342_v59, %v1298_v61 }
 0x22f   : > { %2030 = vperm.xlu0 %6042, %v1163_v14   ;;  %v1318_v20 = vpop.permute.xlu1 %1317  ;;  %v1296_v21 = vmul.f32 %v7526_v18, %v1255_v19 }
 0x230   : > { %1806 = vperm.xlu1 %6044, %v1120_v15   ;;  %v1343_v12 = vmul.f32 %v7520_v16, %v1318_v20  ;;  %v1402_v19 = vadd.f32 %v1394_v6, %v1350_v9  ;;  %v1179_v20 = vld [vmem:[%s8719_s24 + $0xc8] sm:$0xff] }
 0x231   : > { %v1348_v30 = vadd.f32 %v1340_v24, %v1296_v21  ;;  %v1178_v21 = vld [vmem:[%s8719_s24 + $0xc0] sm:$0xff] }
 0x232   : > { %v1260_v26 = vpop.permute.xlu0 %1259 }
 0x233   : > { %v1297_v28 = vmul.f32 %v7526_v18, %v1260_v26  ;;  %2035 = vperm.xlu0 %6042, %v1164_v22   ;;  %v1400_v37 = vadd.f32 %v1392_v29, %v1348_v30  ;;  %v1180_v30 = vld [vmem:[%s8719_s24 + $0xd0] sm:$0xff] }
 0x234   : > { %2065 = vperm.xlu1 %6044, %v1170_v23   ;;  %v1370_v31 = vpop.permute.xlu1 %1369 }
 0x235   : > { %v1349_v33 = vadd.f32 %v1341_v27, %v1297_v28  ;;  %v1395_v5 = vmul.f32 %v7537_v25, %v1370_v31 }
 0x236   : > { %v1270_v35 = vpop.permute.xlu0 %1269 }
 0x237   : > { %2040 = vperm.xlu0 %6042, %v1165_v32   ;;  %v1401_v40 = vadd.f32 %v1393_v36, %v1349_v33  ;;  %v1299_v63 = vmul.f32 %v7526_v18, %v1270_v35  ;;  %v1181_v32 = vld [vmem:[%s8719_s24 + $0xd8] sm:$0xff]  ;;  %v1344_v33 = vmul.f32 %v7520_v16, %v7486_v2  ;;  %v1182_v36 = vld [vmem:[%s8719_s24 + $0xe0] sm:$0xff]  ;;  %v1183_v2 = vld [vmem:[%s8719_s24 + $0xe8] sm:$0xff] }
 0x238   : > { %2070 = vperm.xlu1 %6044, %v1171_v34  }
 0x239   : > { %v1411_v39 = vpop.permute.xlu1 %1410  ;;  %v1351_v14 = vadd.f32 %v1343_v12, %v1299_v63 }
 0x23a   : > { %v1448_v42 = vadd.f32 %v1411_v39, %v1400_v37  ;;  %v1416_v43 = vpop.permute.xlu0 %1415 }
 0x23b   : > { %v1449_v44 = vadd.f32 %v1416_v43, %v1401_v40  ;;  %2045 = vperm.xlu0 %6042, %v1166_v38   ;;  %v1403_v23 = vadd.f32 %v1395_v5, %v1351_v14  ;;  %v1347_v43 = vmul.f32 %v7520_v16, %v7502_v8  ;;  %v6165_v5 = vld [vmem:[%s8717_s0 + $0x8] sm:$0xff]  }
 0x23c   : > { %v1456_v45 = vmax.f32 %v1448_v42, 0.0  ;;  %2075 = vperm.xlu1 %6044, %v1172_v41  }
 0x23d   : > { %v1457_v47 = vmax.f32 %v1449_v44, 0.0  ;;  %v1275_v48 = vpop.permute.xlu1 %1274 }
 0x23e   : > { %v1300_v34 = vmul.f32 %v7526_v18, %v1275_v48  ;;  %v1285_v35 = vpop.permute.xlu0 %1284 }
 0x23f   : > { %2050 = vperm.xlu0 %6042, %v1167_v46   ;;  %v1464_v50 = vpack.c.bf16 %v1457_v47, %v1456_v45 }
 0x240   : > { %2080 = vperm.xlu1 %6044, %v1173_v49   ;;  %v1352_v40 = vadd.f32 %v1344_v33, %v1300_v34  ;;  %v1397_v49 = vmul.f32 %v7537_v25, %v7471_v58 }
 0x241   : > { %5244 = vmatprep.subr.bf16.mxu0 %v1464_v50  ;;  %v1280_v52 = vpop.permute.xlu1 %1279 }
 0x242   : > { %5245 = vmatpush3.bf16.msra.mxu0 %v1464_v50  ;;  %v1301_v41 = vmul.f32 %v7526_v18, %v1280_v52  ;;  %v1431_v47 = vpop.permute.xlu0 %1430  ;;  %v1302_v52 = vmul.f32 %v7526_v18, %v1285_v35 }
 0x243   : > { %2055 = vperm.xlu0 %6042, %v1168_v51  }
 0x244   : > { %2085 = vperm.xlu1 %6044, %v1174_v53   ;;  %v1184_v53 = vld [vmem:[%s8719_s24 + $0xf0] sm:$0xff] }
 0x246   : > { %v1326_v57 = vpop.permute.xlu1 %1325  ;;  %v1446_v58 = vpop.permute.xlu0 %1445 }
 0x247   : > { %2060 = vperm.xlu0 %6042, %v1169_v54   ;;  %v1345_v37 = vmul.f32 %v7520_v16, %v1326_v57 }
 0x248   : > { %2090 = vperm.xlu1 %6044, %v1175_v56  }
 0x249   : > { %v1353_v44 = vadd.f32 %v1345_v37, %v1301_v41 }
 0x24b   : > { %v1374_v3 = vpop.permute.xlu1 %1373  ;;  %6157 = vset.pattern.permute.xlu0 %v6757_v1  ;;  %v1405_v57 = vadd.f32 %v1397_v49, %v1353_v44 }
 0x24c   : > { %2095 = vperm.xlu1 %6044, %v1176_v60   ;;  %v1396_v38 = vmul.f32 %v7537_v25, %v1374_v3 }
 0x24e   : > { %v1404_v45 = vadd.f32 %v1396_v38, %v1352_v40 }
 0x250   : > { %2100 = vperm.xlu1 %6044, %v1177_v13   ;;  %v1421_v15 = vpop.permute.xlu1 %1420  ;;  %v1452_v8 = vadd.f32 %v1431_v47, %v1404_v45 }
 0x251   : > { %v1450_v22 = vadd.f32 %v1421_v15, %v1402_v19  ;;  %v6166_v19 = vld [vmem:[%s8717_s0 + $0x10] sm:$0xff]  }
 0x252   : > { %v1460_v63 = vmax.f32 %v1452_v8, 0.0 }
 0x253   : > { %v1458_v26 = vmax.f32 %v1450_v22, 0.0  ;;  %v6168_v22 = vld [vmem:[%s8717_s0 + $0x20] sm:$0xff]  }
 0x254   : > { %2105 = vperm.xlu1 %6044, %v1178_v21   ;;  %v1426_v55 = vpop.permute.xlu1 %1425  ;;  %v6167_v21 = vld [vmem:[%s8717_s0 + $0x18] sm:$0xff]  }
 0x255   : > { %v1451_v24 = vadd.f32 %v1426_v55, %v1403_v23  ;;  %v6169_v23 = vld [vmem:[%s8717_s0 + $0x28] sm:$0xff]   ;;  %v6170_v55 = vld [vmem:[%s8717_s0 + $0x30] sm:$0xff]  }
 0x257   : > { %v1459_v27 = vmax.f32 %v1451_v24, 0.0  ;;  %v6171_v24 = vld [vmem:[%s8717_s0 + $0x38] sm:$0xff]   ;;  %s8730_s0 = sld [smem:[#allocation54_spill]] }
 0x258   : > { %2110 = vperm.xlu1 %6044, %v1179_v20   ;;  %v1290_v28 = vpop.permute.xlu1 %1289  ;;  %v6172_v20 = vld [vmem:[%s8722_s10] sm:$0xff]  }
 0x259   : > { %v1465_v29 = vpack.c.bf16 %v1459_v27, %v1458_v26  ;;  %v1303_v42 = vmul.f32 %v7526_v18, %v1290_v28  ;;  %5284 = vmatprep.mubr.bf16.mxu1 %v6172_v20  ;;  %v1476_v27 = vpop.permute.xlu0 %1475 }
 0x25b   : > { %5246 = vmatprep.subr.bf16.mxu0 %v1465_v29  ;;  %v1355_v50 = vadd.f32 %v1347_v43, %v1303_v42 }
 0x25c   : > { %2115 = vperm.xlu1 %6044, %v1180_v30   ;;  %5247 = vmatpush3.bf16.msra.mxu0 %v1465_v29 }
 0x25d   : > { %v1330_v31 = vpop.permute.xlu1 %1329  ;;  %v1486_v29 = vpop.permute.xlu0 %1485 }
 0x25e   : > { %v1346_v51 = vmul.f32 %v7520_v16, %v1330_v31  ;;  %v1185_v16 = vld [vmem:[%s8719_s24 + $0xf8] sm:$0xff] }
 0x260   : > { %2120 = vperm.xlu1 %6044, %v1181_v32   ;;  %v1354_v60 = vadd.f32 %v1346_v51, %v1302_v52 }
 0x261   : > { %v1496_v31 = vpop.permute.xlu0 %1495 }
 0x262   : > { %v1382_v39 = vpop.permute.xlu1 %1381 }
 0x263   : > { %v1398_v54 = vmul.f32 %v7537_v25, %v1382_v39 }
 0x264   : > { %2125 = vperm.xlu1 %6044, %v1182_v36  }
 0x265   : > { %v1406_v6 = vadd.f32 %v1398_v54, %v1354_v60  ;;  %v1506_v36 = vpop.permute.xlu0 %1505 }
 0x266   : > { %v1386_v46 = vpop.permute.xlu1 %1385 }
 0x267   : > { %v1399_v48 = vmul.f32 %v7537_v25, %v1386_v46 }
 0x268   : > { %2130 = vperm.xlu1 %6044, %v1183_v2  }
 0x269   : > { %v1407_v56 = vadd.f32 %v1399_v48, %v1355_v50  ;;  %v1516_v47 = vpop.permute.xlu0 %1515 }
 0x26b   : > { %v1436_v59 = vpop.permute.xlu1 %1435  ;;  %v1455_v18 = vadd.f32 %v1446_v58, %v1407_v56 }
 0x26c   : > { %v1453_v61 = vadd.f32 %v1436_v59, %v1405_v57  ;;  %2135 = vperm.xlu1 %6044, %v1184_v53  }
 0x26d   : > { %v1463_v25 = vmax.f32 %v1455_v18, 0.0 }
 0x26e   : > { %v1461_v3 = vmax.f32 %v1453_v61, 0.0  ;;  %v1526_v61 = vpop.permute.xlu0 %1525 }
 0x26f   : > { %v1441_v9 = vpop.permute.xlu1 %1440 }
 0x270   : > { %v1454_v12 = vadd.f32 %v1441_v9, %v1406_v6  ;;  %2140 = vperm.xlu1 %6044, %v1185_v16   ;;  %v1466_v13 = vpack.c.bf16 %v1461_v3, %v1460_v63 }
 0x272   : > { %v1462_v14 = vmax.f32 %v1454_v12, 0.0  ;;  %5248 = vmatprep.subr.bf16.mxu0 %v1466_v13 }
 0x273   : > { %5249 = vmatpush3.bf16.msra.mxu0 %v1466_v13  ;;  %v1471_v26 = vpop.permute.xlu1 %1470 }
 0x274   : > { %v1467_v15 = vpack.c.bf16 %v1463_v25, %v1462_v14 }
 0x276   : > { %5250 = vmatprep.subr.bf16.mxu0 %v1467_v15 }
 0x277   : > { %5251 = vmatpush3.bf16.msra.mxu0 %v1467_v15  ;;  %v1481_v28 = vpop.permute.xlu1 %1480 }
 0x27a   : > { %5253 = vmatmul.mubr.msk.bf16.vlgmr.msra.gmra.mrb[0].mxu0 %vm1588_vm0, %v6165_v5  ;;  %v1536_v5 = vpop.permute.xlu0 %1535 }
 0x27b   : > { %5256 = vmatprep.mubr.msk.bf16.mxu0 %vm1588_vm0, %v6166_v19  ;;  %v1491_v30 = vpop.permute.xlu1 %1490 }
 0x27f   : > { %v1501_v32 = vpop.permute.xlu1 %1500 }
 0x282   : > { %5257 = vmatmul.mubr.msk.bf16.gmra.mrb[4].mxu0 %vm1588_vm0, %v6167_v21 }
 0x283   : > { %5260 = vmatprep.mubr.msk.bf16.mxu0 %vm1588_vm0, %v6168_v22  ;;  %v1511_v43 = vpop.permute.xlu1 %1510 }
 0x287   : > { %v1521_v56 = vpop.permute.xlu1 %1520 }
 0x28a   : > { %5261 = vmatmul.mubr.msk.bf16.gmra.mrb[8].mxu0 %vm1588_vm0, %v6169_v23 }
 0x28b   : > { %5264 = vmatprep.mubr.msk.bf16.mxu0 %vm1588_vm0, %v6170_v55  ;;  %v1531_v12 = vpop.permute.xlu1 %1530 }
 0x28f   : > { %v1541_v20 = vpop.permute.xlu1 %1540 }
 0x292   : > { %5265 = vmatmul.mubr.msk.bf16.gmra.mrb[12].mxu0 %vm1588_vm0, %v6171_v24 }
 0x34d   : > { %v5254_v33 = vpop.f32.mrb[0].mxu0 }
 0x34e   : > { %v1656_v34 = vadd.f32 %v5254_v33, %v1481_v28  ;;  %v1647_v35 = vpop.f32.mrb[1].mxu0 }
 0x34f   : > { %v1648_v37 = vadd.f32 %v1647_v35, %v1471_v26  ;;  %v5255_v38 = vpop.f32.mrb[2].mxu0 }
 0x350   : > { %v1659_v39 = vadd.f32 %v5255_v38, %v1486_v29  ;;  %v1650_v40 = vpop.f32.mrb[3].mxu0  ;;  %v1712_v42 = vmax.f32 %v1656_v34, 0.0 }
 0x351   : > { %v1651_v41 = vadd.f32 %v1650_v40, %v1476_v27  ;;  %v1710_v44 = vmax.f32 %v1648_v37, 0.0 }
 0x352   : > { %v1713_v2 = vmax.f32 %v1659_v39, 0.0 }
 0x353   : > { %v1711_v45 = vmax.f32 %v1651_v41, 0.0 }
 0x354   : > { %v1727_v46 = vpack.c.bf16 %v1713_v2, %v1712_v42  ;;  %v6173_v42 = vld [vmem:[%s8722_s10 + $0x8] sm:$0xff]   ;;  %v6174_v2 = vld [vmem:[%s8722_s10 + $0x10] sm:$0xff]  }
 0x355   : > { %v5258_v48 = vpop.f32.mrb[4].mxu0  ;;  %v1726_v49 = vpack.c.bf16 %v1711_v45, %v1710_v44  ;;  %v6176_v44 = vld [vmem:[%s8722_s10 + $0x20] sm:$0xff]   ;;  %v6177_v45 = vld [vmem:[%s8722_s10 + $0x28] sm:$0xff]  }
 0x356   : > { %v1672_v50 = vadd.f32 %v5258_v48, %v1501_v32  ;;  %v1663_v51 = vpop.f32.mrb[5].mxu0  ;;  %v6180_v48 = vld [vmem:[%s8723_s7] sm:$0xff]   ;;  %s8734_s7 = sld [smem:[#allocation58_spill]] }
 0x357   : > { %v1664_v52 = vadd.f32 %v1663_v51, %v1491_v30  ;;  %v5259_v53 = vpop.f32.mrb[6].mxu0  ;;  %5268 = vmatprep.subr.bf16.mxu1 %v1726_v49  ;;  %v1546_v30 = vpop.permute.xlu0 %1545  ;;  %5316 = vmatprep.mubr.bf16.mxu0 %v6180_v48 }
 0x358   : > { %v1675_v8 = vadd.f32 %v5259_v53, %v1506_v36  ;;  %v1666_v54 = vpop.f32.mrb[7].mxu0  ;;  %5269 = vmatpush3.bf16.msra.mxu1 %v1726_v49  ;;  %v1716_v59 = vmax.f32 %v1672_v50, 0.0  ;;  %v1737_v49 = vpop.permute.xlu1 %1736 }
 0x359   : > { %v1667_v57 = vadd.f32 %v1666_v54, %v1496_v31  ;;  %5270 = vmatprep.subr.bf16.mxu1 %v1727_v46  ;;  %v1714_v58 = vmax.f32 %v1664_v52, 0.0 }
 0x35a   : > { %v1717_v60 = vmax.f32 %v1675_v8, 0.0 }
 0x35b   : > { %v1715_v16 = vmax.f32 %v1667_v57, 0.0  ;;  %v1742_v50 = vpop.permute.xlu0 %1741 }
 0x35c   : > { %v1729_v63 = vpack.c.bf16 %v1717_v60, %v1716_v59  ;;  %5271 = vmatpush3.bf16.msra.mxu1 %v1727_v46  ;;  %v6178_v46 = vld [vmem:[%s8722_s10 + $0x30] sm:$0xff]   ;;  %v1747_v51 = vpop.permute.xlu1 %1746 }
 0x35d   : > { %v1728_v18 = vpack.c.bf16 %v1715_v16, %v1714_v58  ;;  %v5262_v3 = vpop.f32.mrb[8].mxu0 }
 0x35e   : > { %v1688_v6 = vadd.f32 %v5262_v3, %v1521_v56  ;;  %v1679_v9 = vpop.f32.mrb[9].mxu0 }
 0x35f   : > { %v1680_v13 = vadd.f32 %v1679_v9, %v1511_v43  ;;  %v5263_v25 = vpop.f32.mrb[10].mxu0  ;;  %5272 = vmatprep.subr.bf16.mxu1 %v1728_v18  ;;  %v6175_v43 = vld [vmem:[%s8722_s10 + $0x18] sm:$0xff]   ;;  %v1752_v52 = vpop.permute.xlu0 %1751 }
 0x360   : > { %v1691_v14 = vadd.f32 %v5263_v25, %v1526_v61  ;;  %v1682_v15 = vpop.f32.mrb[11].mxu0  ;;  %5273 = vmatpush3.bf16.msra.mxu1 %v1728_v18  ;;  %v1720_v21 = vmax.f32 %v1688_v6, 0.0  ;;  %v1757_v53 = vpop.permute.xlu1 %1756 }
 0x361   : > { %v1683_v19 = vadd.f32 %v1682_v15, %v1516_v47  ;;  %5274 = vmatprep.subr.bf16.mxu1 %v1729_v63  ;;  %v1718_v23 = vmax.f32 %v1680_v13, 0.0  ;;  %v6179_v47 = vld [vmem:[%s8722_s10 + $0x38] sm:$0xff]   ;;  %s4807_s10 = sshll.u32 %s1021_s15, 4  ;;  %s8554_s10 = int_to_ptr.vmem [resolvable:$true] %s4807_s10 }
 0x362   : > { %v1721_v22 = vmax.f32 %v1691_v14, 0.0  ;;  %s6630_s29 = scalar_lea.vmem %s8554_s10, 16  ;;  %p6637_p4 = scmp.lt.s32.totalorder %s8554_s10, %s6635_s3 }
 0x363   : > { %v1719_v55 = vmax.f32 %v1683_v19, 0.0  ;;  %v1762_v8 = vpop.permute.xlu0 %1761  ;;  %p6631_p5 = scmp.ne.s32.totalorder %s8554_s10, %s6630_s29 }
 0x364   : > { %v1731_v24 = vpack.c.bf16 %v1721_v22, %v1720_v21  ;;  %5275 = vmatpush3.bf16.msra.mxu1 %v1729_v63  ;;  %v1767_v54 = vpop.permute.xlu1 %1766 }
 0x365   : > { %v1730_v26 = vpack.c.bf16 %v1719_v55, %v1718_v23  ;;  %v5266_v27 = vpop.f32.mrb[12].mxu0  ;;  %p6632_p1 = pnand %p6631_p5, %p8736_p10 }
 0x366   : > { %v1704_v28 = vadd.f32 %v5266_v27, %v1541_v20  ;;  %v1695_v29 = vpop.f32.mrb[13].mxu0 }
 0x367   : > { %v1696_v31 = vadd.f32 %v1695_v29, %v1531_v12  ;;  %v5267_v32 = vpop.f32.mrb[14].mxu0  ;;  %5276 = vmatprep.subr.bf16.mxu1 %v1730_v26  ;;  %v1772_v60 = vpop.permute.xlu0 %1771  ;;  %p6633_p2 = pneg %p6632_p1 }
 0x368   : > { %v1707_v33 = vadd.f32 %v5267_v32, %v1546_v30  ;;  %v1698_v34 = vpop.f32.mrb[15].mxu0  ;;  %5277 = vmatpush3.bf16.msra.mxu1 %v1730_v26  ;;  %v1724_v36 = vmax.f32 %v1704_v28, 0.0  ;;  %v1777_v9 = vpop.permute.xlu1 %1776 }
 0x369   : > { %v1699_v35 = vadd.f32 %v1698_v34, %v1536_v5  ;;  %5278 = vmatprep.subr.bf16.mxu1 %v1731_v24  ;;  %v1722_v38 = vmax.f32 %v1696_v31, 0.0 }
 0x36a   : > { %v1725_v37 = vmax.f32 %v1707_v33, 0.0 }
 0x36b   : > { %v1723_v39 = vmax.f32 %v1699_v35, 0.0  ;;  %v1782_v14 = vpop.permute.xlu0 %1781 }
 0x36c   : > { %v1733_v40 = vpack.c.bf16 %v1725_v37, %v1724_v36  ;;  %5279 = vmatpush3.bf16.msra.mxu1 %v1731_v24  ;;  %v1787_v20 = vpop.permute.xlu1 %1786 }
 0x36d   : > { %v1732_v41 = vpack.c.bf16 %v1723_v39, %v1722_v38 }
 0x36f   : > { %5280 = vmatprep.subr.bf16.mxu1 %v1732_v41  ;;  %v1792_v29 = vpop.permute.xlu0 %1791 }
 0x370   : > { %5281 = vmatpush3.bf16.msra.mxu1 %v1732_v41  ;;  %v1797_v37 = vpop.permute.xlu1 %1796 }
 0x371   : > { %5282 = vmatprep.subr.bf16.mxu1 %v1733_v40 }
 0x374   : > { %5283 = vmatpush3.bf16.msra.mxu1 %v1733_v40  ;;  %v1807_v48 = vpop.permute.xlu1 %1806 }
 0x377   : > { %5285 = vmatmul.mubr.bf16.vlgmr.msra.gmra.mrb[0].mxu1 %v6173_v42  ;;  %v1802_v42 = vpop.permute.xlu0 %1801 }
 0x378   : > { %5288 = vmatprep.mubr.bf16.mxu1 %v6174_v2 }
 0x37f   : > { %5289 = vmatmul.mubr.bf16.gmra.mrb[4].mxu1 %v6175_v43 }
 0x380   : > { %5292 = vmatprep.mubr.bf16.mxu1 %v6176_v44 }
 0x387   : > { %5293 = vmatmul.mubr.bf16.gmra.mrb[8].mxu1 %v6177_v45 }
 0x388   : > { %5296 = vmatprep.mubr.bf16.mxu1 %v6178_v46 }
 0x38f   : > { %5297 = vmatmul.mubr.bf16.gmra.mrb[12].mxu1 %v6179_v47 }
 0x44a   : > { %v5286_v56 = vpop.f32.mrb[0].mxu1 }
 0x44b   : > { %v1905_v57 = vadd.f32 %v5286_v56, %v1747_v51  ;;  %v1896_v59 = vpop.f32.mrb[1].mxu1 }
 0x44c   : > { %v1897_v61 = vadd.f32 %v1896_v59, %v1737_v49  ;;  %v5287_v58 = vpop.f32.mrb[2].mxu1 }
 0x44d   : > { %v1908_v16 = vadd.f32 %v5287_v58, %v1752_v52  ;;  %v1899_v63 = vpop.f32.mrb[3].mxu1  ;;  %v1961_v3 = vmax.f32 %v1905_v57, 0.0 }
 0x44e   : > { %v1900_v18 = vadd.f32 %v1899_v63, %v1742_v50  ;;  %v1959_v12 = vmax.f32 %v1897_v61, 0.0 }
 0x44f   : > { %v1962_v6 = vmax.f32 %v1908_v16, 0.0 }
 0x450   : > { %v1960_v13 = vmax.f32 %v1900_v18, 0.0 }
 0x451   : > { %v1976_v25 = vpack.c.bf16 %v1962_v6, %v1961_v3  ;;  %v6181_v3 = vld [vmem:[%s8724_s11 + $0x8] sm:$0xff]   ;;  %v6182_v6 = vld [vmem:[%s8724_s11 + $0x10] sm:$0xff]  }
 0x452   : > { %v1975_v15 = vpack.c.bf16 %v1960_v13, %v1959_v12  ;;  %v5290_v5 = vpop.f32.mrb[4].mxu1  ;;  %v6184_v12 = vld [vmem:[%s8724_s11 + $0x20] sm:$0xff]   ;;  %v6185_v13 = vld [vmem:[%s8724_s11 + $0x28] sm:$0xff]  }
 0x453   : > { %v1921_v19 = vadd.f32 %v5290_v5, %v1767_v54  ;;  %v1912_v21 = vpop.f32.mrb[5].mxu1  ;;  %v6189_v5 = vld [vmem:[%s8724_s11 + $0x48] sm:$0xff]  }
 0x454   : > { %v1913_v22 = vadd.f32 %v1912_v21, %v1757_v53  ;;  %v5291_v23 = vpop.f32.mrb[6].mxu1  ;;  %5300 = vmatprep.subr.bf16.mxu0 %v1975_v15  ;;  %v1812_v53 = vpop.permute.xlu0 %1811  ;;  %v6191_v21 = vld [vmem:[%s8724_s11 + $0x58] sm:$0xff]  }
 0x455   : > { %v1924_v55 = vadd.f32 %v5291_v23, %v1772_v60  ;;  %v1915_v24 = vpop.f32.mrb[7].mxu1  ;;  %5301 = vmatpush3.bf16.msra.mxu0 %v1975_v15  ;;  %v1965_v27 = vmax.f32 %v1921_v19, 0.0  ;;  %v6188_v15 = vld [vmem:[%s8724_s11 + $0x40] sm:$0xff]   ;;  %v6190_v19 = vld [vmem:[%s8724_s11 + $0x50] sm:$0xff]   ;;  %v6193_v23 = vld [vmem:[%s8724_s11 + $0x68] sm:$0xff]  }
 0x456   : > { %v1916_v26 = vadd.f32 %v1915_v24, %v1762_v8  ;;  %5302 = vmatprep.subr.bf16.mxu0 %v1976_v25  ;;  %v1963_v30 = vmax.f32 %v1913_v22, 0.0  ;;  %v6192_v22 = vld [vmem:[%s8724_s11 + $0x60] sm:$0xff]   ;;  %v6195_v24 = vld [vmem:[%s8724_s11 + $0x78] sm:$0xff]  }
 0x457   : > { %v1966_v28 = vmax.f32 %v1924_v55, 0.0  ;;  %v6194_v55 = vld [vmem:[%s8724_s11 + $0x70] sm:$0xff]  }
 0x458   : > { %v1964_v31 = vmax.f32 %v1916_v26, 0.0  ;;  %v7729_v26 = vpop.permute.xlu1 %2065 }
 0x459   : > { %v1978_v32 = vpack.c.bf16 %v1966_v28, %v1965_v27  ;;  %5303 = vmatpush3.bf16.msra.mxu0 %v1976_v25  ;;  %v6186_v25 = vld [vmem:[%s8724_s11 + $0x30] sm:$0xff]  }
 0x45a   : > { %v1977_v33 = vpack.c.bf16 %v1964_v31, %v1963_v30  ;;  %v5294_v34 = vpop.f32.mrb[8].mxu1  ;;  %v6196_v28 = vld [vmem:[#allocation6] ss:$16 sps:$4 sm:$0xff]   ;;  %v6201_v30 = vld [vmem:[#allocation6 + $0x24] ss:$16 sps:$4 sm:$0xff]  }
 0x45b   : > { %v1937_v35 = vadd.f32 %v5294_v34, %v1787_v20  ;;  %v1928_v36 = vpop.f32.mrb[9].mxu1  ;;  %v7727_v20 = vpop.permute.xlu0 %1985 }
 0x45c   : > { %v1929_v38 = vadd.f32 %v1928_v36, %v1777_v9  ;;  %v5295_v39 = vpop.f32.mrb[10].mxu1  ;;  %5304 = vmatprep.subr.bf16.mxu0 %v1977_v33  ;;  %v6183_v9 = vld [vmem:[%s8724_s11 + $0x18] sm:$0xff]   ;;  %v7733_v31 = vpop.permute.xlu1 %2070 }
 0x45d   : > { %v1940_v40 = vadd.f32 %v5295_v39, %v1792_v29  ;;  %v1931_v41 = vpop.f32.mrb[11].mxu1  ;;  %5305 = vmatpush3.bf16.msra.mxu0 %v1977_v33  ;;  %v1969_v43 = vmax.f32 %v1937_v35, 0.0  ;;  %v6198_v29 = vld [vmem:[#allocation6 + $0x4] ss:$16 sps:$4 sm:$0xff]   ;;  %v6202_v35 = vld [vmem:[#allocation6 + $0x40] ss:$16 sps:$4 sm:$0xff]  }
 0x45e   : > { %v1932_v2 = vadd.f32 %v1931_v41, %v1782_v14  ;;  %5306 = vmatprep.subr.bf16.mxu0 %v1978_v32  ;;  %v1967_v45 = vmax.f32 %v1929_v38, 0.0  ;;  %v6187_v14 = vld [vmem:[%s8724_s11 + $0x38] sm:$0xff]   ;;  %s4795_s11 = scalar_lea.sflag [#allocation5], %s7267_s12 }
 0x45f   : > { %v1970_v44 = vmax.f32 %v1940_v40, 0.0  ;;  %v7731_v27 = vpop.permute.xlu0 %1990  ;;  %v6204_v33 = vld [vmem:[#allocation6 + $0x44] ss:$16 sps:$4 sm:$0xff]   ;;  %v6205_v38 = vld [vmem:[#allocation6 + $0x60] ss:$16 sps:$4 sm:$0xff]  }
 0x460   : > { %v1968_v46 = vmax.f32 %v1932_v2, 0.0  ;;  %v7737_v36 = vpop.permute.xlu1 %2075  ;;  %v6210_v40 = vld [vmem:[#allocation6 + $0x84] ss:$16 sps:$4 sm:$0xff]  }
 0x461   : > { %v1980_v47 = vpack.c.bf16 %v1970_v44, %v1969_v43  ;;  %5307 = vmatpush3.bf16.msra.mxu0 %v1978_v32  ;;  %v6199_v32 = vld [vmem:[#allocation6 + $0x20] ss:$16 sps:$4 sm:$0xff]   ;;  %v6213_v2 = vld [vmem:[#allocation6 + $0xa4] ss:$16 sps:$4 sm:$0xff]  }
 0x462   : > { %v1979_v49 = vpack.c.bf16 %v1968_v46, %v1967_v45  ;;  %v5298_v50 = vpop.f32.mrb[12].mxu1  ;;  %v6211_v44 = vld [vmem:[#allocation6 + $0xa0] ss:$16 sps:$4 sm:$0xff]   ;;  %v6216_v46 = vld [vmem:[#allocation6 + $0xc4] ss:$16 sps:$4 sm:$0xff]  }
 0x463   : > { %v1953_v51 = vadd.f32 %v5298_v50, %v1807_v48  ;;  %v1944_v52 = vpop.f32.mrb[13].mxu1  ;;  %v7735_v34 = vpop.permute.xlu0 %1995 }
 0x464   : > { %v1945_v8 = vadd.f32 %v1944_v52, %v1797_v37  ;;  %v5299_v54 = vpop.f32.mrb[14].mxu1  ;;  %5308 = vmatprep.subr.bf16.mxu0 %v1979_v49  ;;  %v6207_v37 = vld [vmem:[#allocation6 + $0x64] ss:$16 sps:$4 sm:$0xff]   ;;  %v7741_v41 = vpop.permute.xlu1 %2080 }
 0x465   : > { %v1956_v56 = vadd.f32 %v5299_v54, %v1812_v53  ;;  %v1947_v57 = vpop.f32.mrb[15].mxu1  ;;  %5309 = vmatpush3.bf16.msra.mxu0 %v1979_v49  ;;  %v1973_v60 = vmax.f32 %v1953_v51, 0.0  ;;  %v6219_v49 = vld [vmem:[#allocation6 + $0xe4] ss:$16 sps:$4 sm:$0xff]   ;;  %v6217_v51 = vld [vmem:[#allocation6 + $0xe0] ss:$16 sps:$4 sm:$0xff]  }
 0x466   : > { %v1948_v59 = vadd.f32 %v1947_v57, %v1802_v42  ;;  %5310 = vmatprep.subr.bf16.mxu0 %v1980_v47  ;;  %v1971_v58 = vmax.f32 %v1945_v8, 0.0  ;;  %v6208_v42 = vld [vmem:[#allocation6 + $0x80] ss:$16 sps:$4 sm:$0xff]   ;;  %v6222_v53 = vld [vmem:[#allocation6 + $0x104] ss:$16 sps:$4 sm:$0xff]  }
 0x467   : > { %v1974_v61 = vmax.f32 %v1956_v56, 0.0  ;;  %v7739_v39 = vpop.permute.xlu0 %2000 }
 0x468   : > { %v1972_v16 = vmax.f32 %v1948_v59, 0.0  ;;  %v7745_v45 = vpop.permute.xlu1 %2085  ;;  %v6220_v59 = vld [vmem:[#allocation6 + $0x100] ss:$16 sps:$4 sm:$0xff]  }
 0x469   : > { %v1982_v63 = vpack.c.bf16 %v1974_v61, %v1973_v60  ;;  %5311 = vmatpush3.bf16.msra.mxu0 %v1980_v47  ;;  %v6214_v47 = vld [vmem:[#allocation6 + $0xc0] ss:$16 sps:$4 sm:$0xff]   ;;  %v6225_v61 = vld [vmem:[#allocation6 + $0x124] ss:$16 sps:$4 sm:$0xff]  }
 0x46a   : > { %v1981_v18 = vpack.c.bf16 %v1972_v16, %v1971_v58  ;;  %v6223_v58 = vld [vmem:[#allocation6 + $0x120] ss:$16 sps:$4 sm:$0xff]  }
 0x46b   : > { %v7743_v43 = vpop.permute.xlu0 %2005 }
 0x46c   : > { %5312 = vmatprep.subr.bf16.mxu0 %v1981_v18  ;;  %v7749_v50 = vpop.permute.xlu1 %2090 }
 0x46d   : > { %5313 = vmatpush3.bf16.msra.mxu0 %v1981_v18  ;;  %v6228_v18 = vld [vmem:[#allocation6 + $0x144] ss:$16 sps:$4 sm:$0xff]  }
 0x46e   : > { %5314 = vmatprep.subr.bf16.mxu0 %v1982_v63 }
 0x46f   : > { %v7747_v48 = vpop.permute.xlu0 %2010 }
 0x470   : > { %v7753_v60 = vpop.permute.xlu1 %2095 }
 0x471   : > { %5315 = vmatpush3.bf16.msra.mxu0 %v1982_v63 }
 0x472   : > { %2853 = vmatprep.subr.bf16.mxu0 %v6198_v29  ;;  %v6237_v29 = vld [vmem:[#allocation6 + $0x1a4] ss:$16 sps:$4 sm:$0xff]  }
 0x473   : > { %v7751_v54 = vpop.permute.xlu0 %2015 }
 0x474   : > { %5317 = vmatmul.mubr.bf16.vlgmr.msra.gmra.mrb[16].mxu0 %v6181_v3 }
 0x475   : > { %5320 = vmatprep.mubr.bf16.mxu0 %v6182_v6  ;;  %2854 = vmatpush1.bf16.msra.mxu0 %v6196_v28  ;;  %v7757_v6 = vpop.permute.xlu1 %2100 }
 0x476   : > { %2855 = vmatprep.subr.bf16.mxu0 %v6201_v30 }
 0x477   : > { %v7755_v16 = vpop.permute.xlu0 %2020 }
 0x479   : > { %2856 = vmatpush1.bf16.msra.mxu0 %v6199_v32  ;;  %v6235_v32 = vld [vmem:[#allocation6 + $0x1a0] ss:$16 sps:$4 sm:$0xff]  }
 0x47a   : > { %2857 = vmatprep.subr.bf16.mxu0 %v6204_v33 }
 0x47c   : > { %5321 = vmatmul.mubr.bf16.gmra.mrb[20].mxu0 %v6183_v9 }
 0x47d   : > { %5324 = vmatprep.mubr.bf16.mxu0 %v6184_v12  ;;  %2858 = vmatpush1.bf16.msra.mxu0 %v6202_v35 }
 0x47e   : > { %2859 = vmatprep.subr.bf16.mxu0 %v6207_v37 }
 0x481   : > { %2860 = vmatpush1.bf16.msra.mxu0 %v6205_v38 }
 0x482   : > { %2861 = vmatprep.subr.bf16.mxu0 %v6210_v40 }
 0x484   : > { %5325 = vmatmul.mubr.bf16.gmra.mrb[24].mxu0 %v6185_v13  ;;  %v6226_v13 = vld [vmem:[#allocation6 + $0x140] ss:$16 sps:$4 sm:$0xff]  }
 0x485   : > { %5328 = vmatprep.mubr.bf16.mxu0 %v6186_v25  ;;  %2862 = vmatpush1.bf16.msra.mxu0 %v6208_v42  ;;  %v6231_v25 = vld [vmem:[#allocation6 + $0x164] ss:$16 sps:$4 sm:$0xff]  }
 0x486   : > { %2863 = vmatprep.subr.bf16.mxu0 %v6213_v2 }
 0x489   : > { %2864 = vmatpush1.bf16.msra.mxu0 %v6211_v44 }
 0x48a   : > { %2865 = vmatprep.subr.bf16.mxu0 %v6216_v46 }
 0x48c   : > { %5329 = vmatmul.mubr.bf16.gmra.mrb[28].mxu0 %v6187_v14  ;;  %v7763_v14 = vpop.permute.xlu0 %2025 }
 0x48d   : > { %5332 = vmatprep.mubr.bf16.mxu0 %v6188_v15  ;;  %2866 = vmatpush1.bf16.msra.mxu0 %v6214_v47  ;;  %v6229_v15 = vld [vmem:[#allocation6 + $0x160] ss:$16 sps:$4 sm:$0xff]  }
 0x48e   : > { %2867 = vmatprep.subr.bf16.mxu0 %v6219_v49 }
 0x490   : > { %v7775_v28 = vpop.permute.xlu0 %2030 }
 0x491   : > { %2868 = vmatpush1.bf16.msra.mxu0 %v6217_v51 }
 0x492   : > { %2869 = vmatprep.subr.bf16.mxu0 %v6222_v53 }
 0x494   : > { %5333 = vmatmul.mubr.bf16.gmra.mrb[32].mxu0 %v6189_v5  ;;  %v7765_v5 = vpop.permute.xlu1 %2105  ;;  %v7783_v37 = vpop.permute.xlu0 %2035 }
 0x495   : > { %5336 = vmatprep.mubr.bf16.mxu0 %v6190_v19  ;;  %2870 = vmatpush1.bf16.msra.mxu0 %v6220_v59 }
 0x496   : > { %2871 = vmatprep.subr.bf16.mxu0 %v6225_v61 }
 0x498   : > { %v7777_v30 = vpop.permute.xlu1 %2110  ;;  %v7792_v44 = vpop.permute.xlu0 %2040 }
 0x499   : > { %2872 = vmatpush1.bf16.msra.mxu0 %v6223_v58 }
 0x49a   : > { %2873 = vmatprep.subr.bf16.mxu0 %v6228_v18 }
 0x49c   : > { %5337 = vmatmul.mubr.bf16.gmra.mrb[36].mxu0 %v6191_v21  ;;  %v6234_v21 = vld [vmem:[#allocation6 + $0x184] ss:$16 sps:$4 sm:$0xff]   ;;  %v7789_v42 = vpop.permute.xlu1 %2115 }
 0x49d   : > { %5340 = vmatprep.mubr.bf16.mxu0 %v6192_v22  ;;  %2874 = vmatpush1.bf16.msra.mxu0 %v6226_v13 }
 0x49e   : > { %2875 = vmatprep.subr.bf16.mxu0 %v6231_v25 }
 0x4a0   : > { %v7797_v59 = vpop.permute.xlu1 %2120 }
 0x4a1   : > { %2876 = vmatpush1.bf16.msra.mxu0 %v6229_v15 }
 0x4a2   : > { %2877 = vmatprep.subr.bf16.mxu0 %v6234_v21  ;;  %v7803_v21 = vpop.permute.xlu0 %2045 }
 0x4a4   : > { %5341 = vmatmul.mubr.bf16.gmra.mrb[40].mxu0 %v6193_v23 }
 0x4a5   : > { %5344 = vmatprep.mubr.bf16.mxu0 %v6194_v55 }
 0x4ac   : > { %5345 = vmatmul.mubr.bf16.gmra.mrb[44].mxu0 %v6195_v24  ;;  %v6232_v24 = vld [vmem:[#allocation6 + $0x180] ss:$16 sps:$4 sm:$0xff]  }
 0x4ad   : > { %2878 = vmatpush1.bf16.msra.mxu0 %v6232_v24 }
 0x4ae   : > { %2879 = vmatprep.subr.bf16.mxu0 %v6237_v29 }
 0x4b1   : > { %2880 = vmatpush1.bf16.msra.mxu0 %v6235_v32  ;;  %v7806_v32 = vpop.permute.xlu1 %2125 }
 0x547   : > { %v5318_v52 = vpop.f32.mrb[16].mxu0 }
 0x548   : > { %v2273_v8 = vpop.f32.mrb[17].mxu0  ;;  %v2282_v2 = vadd.f32 %v5318_v52, %v7735_v34 }
 0x549   : > { %v5319_v56 = vpop.f32.mrb[18].mxu0  ;;  %v2274_v46 = vadd.f32 %v2273_v8, %v7727_v20 }
 0x54a   : > { %v2276_v57 = vpop.f32.mrb[19].mxu0  ;;  %v2285_v49 = vadd.f32 %v5319_v56, %v7739_v39  ;;  %v2402_v13 = vmax.f32 %v2282_v2, 0.0 }
 0x54b   : > { %v2277_v61 = vadd.f32 %v2276_v57, %v7731_v27  ;;  %v2400_v15 = vmax.f32 %v2274_v46, 0.0 }
 0x54c   : > { %v2403_v39 = vmax.f32 %v2285_v49, 0.0 }
 0x54d   : > { %v2401_v24 = vmax.f32 %v2277_v61, 0.0 }
 0x54f   : > { %v5322_v63 = vpop.f32.mrb[20].mxu0 }
 0x550   : > { %v2289_v3 = vpop.f32.mrb[21].mxu0 }
 0x551   : > { %v7759_v9 = vpop.f32.mrb[22].mxu0 }
 0x552   : > { %v7761_v12 = vpop.f32.mrb[23].mxu0 }
 0x553   : > { %v2293_v61 = vadd.f32 %v7761_v12, %v7747_v48  ;;  %v2131_v12 = vpop.permute.xlu1 %2130 }
 0x557   : > { %v7767_v19 = vpop.f32.mrb[24].mxu0 }
 0x558   : > { %v7769_v22 = vpop.f32.mrb[25].mxu0 }
 0x559   : > { %v7771_v23 = vpop.f32.mrb[26].mxu0 }
 0x55a   : > { %v7773_v55 = vpop.f32.mrb[27].mxu0 }
 0x55f   : > { %v7779_v33 = vpop.f32.mrb[28].mxu0 }
 0x560   : > { %v7781_v35 = vpop.f32.mrb[29].mxu0 }
 0x561   : > { %v7785_v38 = vpop.f32.mrb[30].mxu0 }
 0x562   : > { %v7787_v40 = vpop.f32.mrb[31].mxu0 }
 0x567   : > { %v5334_v47 = vpop.f32.mrb[32].mxu0 }
 0x568   : > { %v2346_v51 = vadd.f32 %v5334_v47, %v7737_v36  ;;  %v2337_v53 = vpop.f32.mrb[33].mxu0  ;;  %v6240_v47 = vld [vmem:[#allocation6 + $0x1c4] ss:$16 sps:$4 sm:$0xff]  }
 0x569   : > { %v2338_v58 = vadd.f32 %v2337_v53, %v7729_v26  ;;  %v5335_v18 = vpop.f32.mrb[34].mxu0  ;;  %v2298_v26 = vadd.f32 %v5322_v63, %v7751_v54  ;;  %v6238_v53 = vld [vmem:[#allocation6 + $0x1c0] ss:$16 sps:$4 sm:$0xff]   ;;  %2881 = vmatprep.subr.bf16.mxu0 %v6240_v47 }
 0x56a   : > { %v2418_v25 = vmax.f32 %v2346_v51, 0.0  ;;  %v2349_v34 = vadd.f32 %v5335_v18, %v7741_v41  ;;  %v2340_v52 = vpop.f32.mrb[35].mxu0  ;;  %v2290_v41 = vadd.f32 %v2289_v3, %v7743_v43  ;;  %2882 = vmatpush1.bf16.msra.mxu0 %v6238_v53 }
 0x56b   : > { %v2416_v20 = vmax.f32 %v2338_v58, 0.0  ;;  %v2341_v8 = vadd.f32 %v2340_v52, %v7733_v31  ;;  %v2301_v31 = vadd.f32 %v7759_v9, %v7755_v16  ;;  %v2406_v58 = vmax.f32 %v2298_v26, 0.0  ;;  %v6243_v9 = vld [vmem:[#allocation6 + $0x1e4] ss:$16 sps:$4 sm:$0xff]  }
 0x56c   : > { %v6049_v56 = vpack.i.bf16 %v2402_v13, %v2418_v25  ;;  %v2419_v36 = vmax.f32 %v2349_v34, 0.0  ;;  %v2051_v13 = vpop.permute.xlu0 %2050  ;;  %v2404_v25 = vmax.f32 %v2290_v41, 0.0  ;;  %2883 = vmatprep.subr.bf16.mxu0 %v6243_v9 }
 0x56d   : > { %v6045_v29 = vpack.i.bf16 %v2400_v15, %v2416_v20  ;;  %v2417_v27 = vmax.f32 %v2341_v8, 0.0  ;;  %v2407_v34 = vmax.f32 %v2301_v31, 0.0  ;;  %v2405_v15 = vmax.f32 %v2293_v61, 0.0  ;;  %v2136_v31 = vpop.permute.xlu1 %2135 }
 0x56e   : > { %v6051_v57 = vpack.i.bf16 %v2403_v39, %v2419_v36 }
 0x56f   : > { %v6047_v2 = vpack.i.bf16 %v2401_v24, %v2417_v27  ;;  %v5338_v46 = vpop.f32.mrb[36].mxu0  ;;  %6046 = vxpose.xlu1.b32.start [1/16] %v6045_v29, 128  ;;  %v6246_v29 = vld [vmem:[#allocation6 + $0xc] ss:$16 sps:$4 sm:$0xff]   ;;  %v2317_v27 = vadd.f32 %v7771_v23, %v7792_v44 }
 0x570   : > { %v2362_v49 = vadd.f32 %v5338_v46, %v7753_v60  ;;  %v2353_v51 = vpop.f32.mrb[37].mxu0  ;;  %v2309_v46 = vadd.f32 %v7773_v55, %v7775_v28 }
 0x571   : > { %v2354_v54 = vadd.f32 %v2353_v51, %v7745_v45  ;;  %v5339_v63 = vpop.f32.mrb[38].mxu0  ;;  %v6241_v45 = vld [vmem:[#allocation6 + $0x1e0] ss:$16 sps:$4 sm:$0xff]  }
 0x572   : > { %v2422_v43 = vmax.f32 %v2362_v49, 0.0  ;;  %v2365_v3 = vadd.f32 %v5339_v63, %v7757_v6  ;;  %v2356_v18 = vpop.f32.mrb[39].mxu0  ;;  %v2314_v6 = vadd.f32 %v7767_v19, %v7783_v37  ;;  %2884 = vmatpush1.bf16.msra.mxu0 %v6241_v45  ;;  %v2409_v61 = vmax.f32 %v2309_v46, 0.0  ;;  %v6249_v46 = vld [vmem:[#allocation6 + $0x2c] ss:$16 sps:$4 sm:$0xff]  }
 0x573   : > { %v2420_v16 = vmax.f32 %v2354_v54, 0.0  ;;  %v2357_v60 = vadd.f32 %v2356_v18, %v7749_v50  ;;  %6048 = vxpose.xlu1.b32.cont [2/16] %v6047_v2, 128  ;;  %v2306_v50 = vadd.f32 %v7769_v22, %v7763_v14  ;;  %v2056_v2 = vpop.permute.xlu0 %2055  ;;  %2966 = vmatprep.subr.bf16.mxu0 %v6246_v29  ;;  %v2141_v18 = vpop.permute.xlu1 %2140 }
 0x574   : > { %v7817_v52 = vpack.i.bf16 %v2406_v58, %v2422_v43  ;;  %v2423_v48 = vmax.f32 %v2365_v3, 0.0  ;;  %v2410_v47 = vmax.f32 %v2314_v6, 0.0 }
 0x575   : > { %v6053_v20 = vpack.i.bf16 %v2404_v25, %v2420_v16  ;;  %v2421_v8 = vmax.f32 %v2357_v60, 0.0  ;;  %v2408_v49 = vmax.f32 %v2306_v50, 0.0  ;;  %v2325_v25 = vadd.f32 %v7787_v40, %v2051_v13  ;;  %v3267_v13 = vld [vmem:[%s1031_s14] sm:$0x1]  ;;  %s8733_s14 = sld [smem:[#allocation57_spill]] }
 0x576   : > { %v6059_v39 = vpack.i.bf16 %v2407_v34, %v2423_v48  ;;  %3284 = vperm.xlu0 %6157, %v3267_v13  }
 0x577   : > { %v6055_v36 = vpack.i.bf16 %v2405_v15, %v2421_v8  ;;  %v5342_v24 = vpop.f32.mrb[40].mxu0  ;;  %6050 = vxpose.xlu1.b32.cont [3/16] %v6049_v56, 128  ;;  %v2061_v63 = vpop.permute.xlu0 %2060 }
 0x578   : > { %v2378_v26 = vadd.f32 %v5342_v24, %v7789_v42  ;;  %v2369_v41 = vpop.f32.mrb[41].mxu0  ;;  %v2411_v42 = vmax.f32 %v2317_v27, 0.0  ;;  %v2333_v3 = vadd.f32 %v7785_v38, %v2061_v63  ;;  %v2413_v38 = vmax.f32 %v2325_v25, 0.0 }
 0x579   : > { %v2370_v19 = vadd.f32 %v2369_v41, %v7765_v5  ;;  %v5343_v37 = vpop.f32.mrb[42].mxu0  ;;  %v2330_v5 = vadd.f32 %v7779_v33, %v2056_v2  ;;  %v6244_v41 = vld [vmem:[#allocation6 + $0x8] ss:$16 sps:$4 sm:$0xff]  }
 0x57a   : > { %v2426_v14 = vmax.f32 %v2378_v26, 0.0  ;;  %v2381_v22 = vadd.f32 %v5343_v37, %v7797_v59  ;;  %v2372_v56 = vpop.f32.mrb[43].mxu0  ;;  %v2322_v59 = vadd.f32 %v7781_v35, %v7803_v21  ;;  %v2415_v21 = vmax.f32 %v2333_v3, 0.0  ;;  %6158 = vset.pattern.permute.xlu0 %v6756_v0 }
 0x57b   : > { %v2424_v51 = vmax.f32 %v2370_v19, 0.0  ;;  %v2373_v23 = vadd.f32 %v2372_v56, %v7777_v30  ;;  %6052 = vxpose.xlu1.b32.cont [4/16] %v6051_v57, 128  ;;  %v2414_v9 = vmax.f32 %v2330_v5, 0.0  ;;  %3311 = vperm.xlu0 %6158, %v3267_v13   ;;  %v6247_v19 = vld [vmem:[#allocation6 + $0x28] ss:$16 sps:$4 sm:$0xff]   ;;  %v6258_v5 = vld [vmem:[#allocation6 + $0x8c] ss:$16 sps:$4 sm:$0xff]  }
 0x57c   : > { %v6065_v44 = vpack.i.bf16 %v2410_v47, %v2426_v14  ;;  %v2427_v53 = vmax.f32 %v2381_v22, 0.0  ;;  %v2412_v45 = vmax.f32 %v2322_v59, 0.0  ;;  %v6252_v22 = vld [vmem:[#allocation6 + $0x4c] ss:$16 sps:$4 sm:$0xff]  }
 0x57d   : > { %v6061_v55 = vpack.i.bf16 %v2408_v49, %v2424_v51  ;;  %v2425_v28 = vmax.f32 %v2373_v23, 0.0  ;;  %v6250_v23 = vld [vmem:[#allocation6 + $0x48] ss:$16 sps:$4 sm:$0xff]  }
 0x57e   : > { %v6067_v54 = vpack.i.bf16 %v2411_v42, %v2427_v53  ;;  %v6253_v53 = vld [vmem:[#allocation6 + $0x68] ss:$16 sps:$4 sm:$0xff]  }
 0x57f   : > { %v6063_v58 = vpack.i.bf16 %v2409_v61, %v2425_v28  ;;  %v5346_v43 = vpop.f32.mrb[44].mxu0  ;;  %6054 = vxpose.xlu1.b32.cont [5/16] %v6053_v20, 128  ;;  %6159 = vset.pattern.permute.xlu0 %v6758_v7 }
 0x580   : > { %v2394_v30 = vadd.f32 %v5346_v43, %v2136_v31  ;;  %v2385_v57 = vpop.f32.mrb[45].mxu0  ;;  %3274 = vperm.xlu0 %6159, %v3267_v13   ;;  %v6256_v43 = vld [vmem:[#allocation6 + $0x88] ss:$16 sps:$4 sm:$0xff]  }
 0x581   : > { %v2386_v16 = vadd.f32 %v2385_v57, %v7806_v32  ;;  %v5347_v60 = vpop.f32.mrb[46].mxu0 }
 0x582   : > { %v2430_v33 = vmax.f32 %v2394_v30, 0.0  ;;  %v2397_v34 = vadd.f32 %v5347_v60, %v2141_v18  ;;  %v2388_v48 = vpop.f32.mrb[47].mxu0  ;;  %v6261_v30 = vld [vmem:[#allocation6 + $0xac] ss:$16 sps:$4 sm:$0xff]  }
 0x583   : > { %v2428_v15 = vmax.f32 %v2386_v16, 0.0  ;;  %v2389_v35 = vadd.f32 %v2388_v48, %v2131_v12  ;;  %6056 = vxpose.xlu1.b32.cont [6/16] %v6055_v36, 128  ;;  %v6264_v16 = vld [vmem:[#allocation6 + $0xcc] ss:$16 sps:$4 sm:$0xff]   ;;  %v6262_v48 = vld [vmem:[#allocation6 + $0xc8] ss:$16 sps:$4 sm:$0xff]  }
 0x584   : > { %v6073_v20 = vpack.i.bf16 %v2414_v9, %v2430_v33  ;;  %v2431_v8 = vmax.f32 %v2397_v34, 0.0  ;;  %6160 = vset.pattern.permute.xlu0 %v6757_v1  ;;  %v6259_v1 = vld [vmem:[#allocation6 + $0xa8] ss:$16 sps:$4 sm:$0xff]  }
 0x585   : > { %v6069_v6 = vpack.i.bf16 %v2412_v45, %v2428_v15  ;;  %v2429_v50 = vmax.f32 %v2389_v35, 0.0  ;;  %v6267_v15 = vld [vmem:[#allocation6 + $0xec] ss:$16 sps:$4 sm:$0xff]   ;;  %v6265_v35 = vld [vmem:[#allocation6 + $0xe8] ss:$16 sps:$4 sm:$0xff]  }
 0x586   : > { %v6075_v24 = vpack.i.bf16 %v2415_v21, %v2431_v8 }
 0x587   : > { %v6071_v40 = vpack.i.bf16 %v2413_v38, %v2429_v50  ;;  %6058 = vxpose.xlu1.b32.cont [7/16] %v7817_v52, 128  ;;  %v6270_v38 = vld [vmem:[#allocation6 + $0x10c] ss:$16 sps:$4 sm:$0xff]  }
 0x58b   : > { %6060 = vxpose.xlu1.b32.cont [8/16] %v6059_v39, 128 }
 0x58f   : > { %6062 = vxpose.xlu1.b32.cont [9/16] %v6061_v55, 128 }
 0x593   : > { %6064 = vxpose.xlu1.b32.cont [10/16] %v6063_v58, 128 }
 0x597   : > { %6066 = vxpose.xlu1.b32.cont [11/16] %v6065_v44, 128  ;;  %v6255_v44 = vld [vmem:[#allocation6 + $0x6c] ss:$16 sps:$4 sm:$0xff]  }
 0x59b   : > { %6068 = vxpose.xlu1.b32.cont [12/16] %v6067_v54, 128 }
 0x59f   : > { %6070 = vxpose.xlu1.b32.cont [13/16] %v6069_v6, 128 }
 0x5a3   : > { %6072 = vxpose.xlu1.b32.cont [14/16] %v6071_v40, 128 }
 0x5a7   : > { %6074 = vxpose.xlu1.b32.cont [15/16] %v6073_v20, 128 }
 0x5ab   : > { %6076 = vxpose.xlu1.b32.end [16/16] %v6075_v24, 128 }
 0x5ef   : > { %v6077_v32 = vpop.trf.xlu1 }
 0x5f0   : > { %v6081_v12 = vunpack.i.h.bf16 %v6077_v32  ;;  %v6078_v36 = vunpack.i.l.bf16 %v6077_v32  ;;  %v6268_v32 = vld [vmem:[#allocation6 + $0x108] ss:$16 sps:$4 sm:$0xff]  }
 0x5f3   : > { %v6082_v29 = vpop.trf.xlu1 }
 0x5f4   : > { %v6086_v52 = vunpack.i.h.bf16 %v6082_v29  ;;  %v6083_v39 = vunpack.i.l.bf16 %v6082_v29 }
 0x5f6   : > { %v7842_v27 = vpack.c.bf16 %v6086_v52, %v6081_v12  ;;  %v7844_v26 = vpack.c.bf16 %v6083_v39, %v6078_v36  ;;  %v6273_v12 = vld [vmem:[#allocation6 + $0x12c] ss:$16 sps:$4 sm:$0xff]   ;;  %v6271_v36 = vld [vmem:[#allocation6 + $0x128] ss:$16 sps:$4 sm:$0xff]  }
 0x5f7   : > { %v6087_v2 = vpop.trf.xlu1 }
 0x5f8   : > { %2885 = vmatprep.mubr.bf16.mxu0 %v7844_v26  ;;  %v6091_v37 = vunpack.i.h.bf16 %v6087_v2  ;;  %v6088_v47 = vunpack.i.l.bf16 %v6087_v2 }
 0x5f9   : > { %2886 = vmatmul.mubr.bf16.vlgmr.msra.gmra.mrb[48].mxu0 %v7842_v27 }
 0x5fa   : > { %2967 = vmatpush1.bf16.msra.mxu0 %v6244_v41  ;;  %v6276_v41 = vld [vmem:[#allocation6 + $0x14c] ss:$16 sps:$4 sm:$0xff]  }
 0x5fb   : > { %v6092_v14 = vpop.trf.xlu1  ;;  %2968 = vmatprep.subr.bf16.mxu0 %v6249_v46 }
 0x5fc   : > { %v6096_v56 = vunpack.i.h.bf16 %v6092_v14  ;;  %v6093_v31 = vunpack.i.l.bf16 %v6092_v14 }
 0x5fe   : > { %2969 = vmatpush1.bf16.msra.mxu0 %v6247_v19  ;;  %v7850_v49 = vpack.c.bf16 %v6093_v31, %v6088_v47  ;;  %v7852_v51 = vpack.c.bf16 %v6096_v56, %v6091_v37  ;;  %v6274_v47 = vld [vmem:[#allocation6 + $0x148] ss:$16 sps:$4 sm:$0xff]  }
 0x5ff   : > { %v6097_v42 = vpop.trf.xlu1  ;;  %2970 = vmatprep.subr.bf16.mxu0 %v6252_v22  ;;  %v6279_v22 = vld [vmem:[#allocation6 + $0x16c] ss:$16 sps:$4 sm:$0xff]   ;;  %v6277_v56 = vld [vmem:[#allocation6 + $0x168] ss:$16 sps:$4 sm:$0xff]  }
 0x600   : > { %2895 = vmatprep.mubr.bf16.mxu0 %v7850_v49  ;;  %v6101_v61 = vunpack.i.h.bf16 %v6097_v42  ;;  %v6098_v55 = vunpack.i.l.bf16 %v6097_v42 }
 0x601   : > { %2896 = vmatmul.mubr.bf16.gmra.mrb[52].mxu0 %v7852_v51 }
 0x602   : > { %2971 = vmatpush1.bf16.msra.mxu0 %v6250_v23 }
 0x603   : > { %v6102_v28 = vpop.trf.xlu1  ;;  %2972 = vmatprep.subr.bf16.mxu0 %v6255_v44  ;;  %v6282_v44 = vld [vmem:[#allocation6 + $0x18c] ss:$16 sps:$4 sm:$0xff]  }
 0x604   : > { %v6106_v54 = vunpack.i.h.bf16 %v6102_v28  ;;  %v6103_v63 = vunpack.i.l.bf16 %v6102_v28 }
 0x606   : > { %2973 = vmatpush1.bf16.msra.mxu0 %v6253_v53  ;;  %v7857_v59 = vpack.c.bf16 %v6103_v63, %v6098_v55  ;;  %v7859_v58 = vpack.c.bf16 %v6106_v54, %v6101_v61  ;;  %v6285_v63 = vld [vmem:[#allocation6 + $0x1ac] ss:$16 sps:$4 sm:$0xff]  }
 0x607   : > { %v6107_v3 = vpop.trf.xlu1  ;;  %2974 = vmatprep.subr.bf16.mxu0 %v6258_v5  ;;  %v6280_v5 = vld [vmem:[#allocation6 + $0x188] ss:$16 sps:$4 sm:$0xff]  }
 0x608   : > { %2905 = vmatprep.mubr.bf16.mxu0 %v7857_v59  ;;  %v6111_v57 = vunpack.i.h.bf16 %v6107_v3  ;;  %v6108_v18 = vunpack.i.l.bf16 %v6107_v3 }
 0x609   : > { %2906 = vmatmul.mubr.bf16.gmra.mrb[56].mxu0 %v7859_v58 }
 0x60a   : > { %2975 = vmatpush1.bf16.msra.mxu0 %v6256_v43  ;;  %v6283_v43 = vld [vmem:[#allocation6 + $0x1a8] ss:$16 sps:$4 sm:$0xff]  }
 0x60b   : > { %v6112_v25 = vpop.trf.xlu1  ;;  %2976 = vmatprep.subr.bf16.mxu0 %v6261_v30 }
 0x60c   : > { %v6116_v60 = vunpack.i.h.bf16 %v6112_v25  ;;  %v6113_v9 = vunpack.i.l.bf16 %v6112_v25 }
 0x60e   : > { %2977 = vmatpush1.bf16.msra.mxu0 %v6259_v1  ;;  %v7863_v33 = vpack.c.bf16 %v6113_v9, %v6108_v18  ;;  %v7865_v34 = vpack.c.bf16 %v6116_v60, %v6111_v57  ;;  %v6288_v57 = vld [vmem:[#allocation6 + $0x1cc] ss:$16 sps:$4 sm:$0xff]   ;;  %v6286_v9 = vld [vmem:[#allocation6 + $0x1c8] ss:$16 sps:$4 sm:$0xff]  }
 0x60f   : > { %v6117_v45 = vpop.trf.xlu1  ;;  %2978 = vmatprep.subr.bf16.mxu0 %v6264_v16 }
 0x610   : > { %2915 = vmatprep.mubr.bf16.mxu0 %v7863_v33  ;;  %v6121_v21 = vunpack.i.h.bf16 %v6117_v45  ;;  %v6118_v20 = vunpack.i.l.bf16 %v6117_v45  ;;  %v6289_v45 = vld [vmem:[#allocation6 + $0x1e8] ss:$16 sps:$4 sm:$0xff]  }
 0x611   : > { %2916 = vmatmul.mubr.bf16.gmra.mrb[60].mxu0 %v7865_v34 }
 0x612   : > { %2979 = vmatpush1.bf16.msra.mxu0 %v6262_v48  ;;  %v6291_v48 = vld [vmem:[#allocation6 + $0x1ec] ss:$16 sps:$4 sm:$0xff]  }
 0x613   : > { %v6122_v8 = vpop.trf.xlu1  ;;  %2980 = vmatprep.subr.bf16.mxu0 %v6267_v15 }
 0x614   : > { %v6126_v6 = vunpack.i.h.bf16 %v6122_v8  ;;  %v6123_v50 = vunpack.i.l.bf16 %v6122_v8  ;;  %v3662_v8 = vld [vmem:[#allocation15 + $0x8] sm:$0xff] }
 0x616   : > { %2981 = vmatpush1.bf16.msra.mxu0 %v6265_v35  ;;  %v7869_v24 = vpack.c.bf16 %v6123_v50, %v6118_v20  ;;  %v7871_v40 = vpack.c.bf16 %v6126_v6, %v6121_v21 }
 0x617   : > { %v6127_v13 = vpop.trf.xlu1  ;;  %2982 = vmatprep.subr.bf16.mxu0 %v6270_v38  ;;  %v3666_v38 = vld [vmem:[#allocation15 + $0x28] sm:$0xff] }
 0x618   : > { %2925 = vmatprep.mubr.bf16.mxu0 %v7869_v24  ;;  %v6131_v29 = vunpack.i.h.bf16 %v6127_v13  ;;  %v6128_v52 = vunpack.i.l.bf16 %v6127_v13 }
 0x619   : > { %2926 = vmatmul.mubr.bf16.gmra.mrb[64].mxu0 %v7871_v40 }
 0x61a   : > { %2983 = vmatpush1.bf16.msra.mxu0 %v6268_v32  ;;  %v3665_v32 = vld [vmem:[#allocation15 + $0x20] sm:$0xff] }
 0x61b   : > { %v6132_v39 = vpop.trf.xlu1  ;;  %2984 = vmatprep.subr.bf16.mxu0 %v6273_v12 }
 0x61c   : > { %v6136_v2 = vunpack.i.h.bf16 %v6132_v39  ;;  %v6133_v46 = vunpack.i.l.bf16 %v6132_v39 }
 0x61e   : > { %2985 = vmatpush1.bf16.msra.mxu0 %v6271_v36  ;;  %v2507_v19 = vpack.c.bf16 %v6133_v46, %v6128_v52  ;;  %v2506_v37 = vpack.c.bf16 %v6136_v2, %v6131_v29  ;;  %v3271_v52 = vld [vmem:[#allocation9] sm:$0x1]  ;;  %v3670_v46 = vld [vmem:[#allocation15 + $0x48] sm:$0xff] }
 0x61f   : > { %v6137_v14 = vpop.trf.xlu1  ;;  %2986 = vmatprep.subr.bf16.mxu0 %v6276_v41 }
 0x620   : > { %2935 = vmatprep.mubr.bf16.mxu0 %v2507_v19  ;;  %v6141_v31 = vunpack.i.h.bf16 %v6137_v14  ;;  %v6138_v23 = vunpack.i.l.bf16 %v6137_v14  ;;  %v3673_v14 = vld [vmem:[#allocation15 + $0x60] sm:$0xff] }
 0x621   : > { %2936 = vmatmul.mubr.bf16.gmra.mrb[68].mxu0 %v2506_v37 }
 0x622   : > { %2987 = vmatpush1.bf16.msra.mxu0 %v6274_v47  ;;  %v3669_v47 = vld [vmem:[#allocation15 + $0x40] sm:$0xff] }
 0x623   : > { %v6142_v42 = vpop.trf.xlu1  ;;  %2988 = vmatprep.subr.bf16.mxu0 %v6279_v22 }
 0x624   : > { %v6146_v53 = vunpack.i.h.bf16 %v6142_v42  ;;  %v6143_v61 = vunpack.i.l.bf16 %v6142_v42  ;;  %v3664_v42 = vld [vmem:[#allocation15 + $0x18] sm:$0xff] }
 0x626   : > { %2989 = vmatpush1.bf16.msra.mxu0 %v6277_v56  ;;  %v2509_v55 = vpack.c.bf16 %v6143_v61, %v6138_v23  ;;  %v2508_v28 = vpack.c.bf16 %v6146_v53, %v6141_v31  ;;  %v5373_v31 = vpack.c.bf16 %v3673_v14, %v3669_v47  ;;  %v3663_v61 = vld [vmem:[#allocation15 + $0x10] sm:$0xff]  ;;  %v3454_v47 = vld [vmem:[#allocation14 + $0x188] sm:$0xff] }
 0x627   : > { %v6147_v54 = vpop.trf.xlu1  ;;  %2990 = vmatprep.subr.bf16.mxu0 %v6282_v44  ;;  %v3668_v44 = vld [vmem:[#allocation15 + $0x38] sm:$0xff]  ;;  %v3458_v14 = vld [vmem:[#allocation14 + $0x1a8] sm:$0xff] }
 0x628   : > { %2945 = vmatprep.mubr.bf16.mxu0 %v2509_v55  ;;  %v6151_v3 = vunpack.i.h.bf16 %v6147_v54  ;;  %v6148_v30 = vunpack.i.l.bf16 %v6147_v54  ;;  %v5375_v53 = vpack.c.bf16 %v3668_v44, %v3664_v42  ;;  %v6760_v54 = vmov 0.0   ;;  %v7902_v42 = vld [vmem:[%s8726_s23] sm:$0xf]  ;;  %s8731_s23 = sld [smem:[#allocation55_spill]] }
 0x629   : > { %2946 = vmatmul.mubr.bf16.gmra.mrb[72].mxu0 %v2508_v28  ;;  %3745 = vmatprep.mubr.f32.mxu1 %v6760_v54  ;;  %v3462_v44 = vld [vmem:[#allocation14 + $0x1c8] sm:$0xff] }
 0x62a   : > { %2991 = vmatpush1.bf16.msra.mxu0 %v6280_v5 }
 0x62b   : > { %v6152_v1 = vpop.trf.xlu1  ;;  %2992 = vmatprep.subr.bf16.mxu0 %v6285_v63  ;;  %v3672_v63 = vld [vmem:[#allocation15 + $0x58] sm:$0xff] }
 0x62c   : > { %v6156_v18 = vunpack.i.h.bf16 %v6152_v1  ;;  %v6153_v25 = vunpack.i.l.bf16 %v6152_v1  ;;  %v3675_v1 = vld [vmem:[#allocation15 + $0x70] sm:$0xff] }
 0x62e   : > { %2993 = vmatpush1.bf16.msra.mxu0 %v6283_v43  ;;  %v2511_v16 = vpack.c.bf16 %v6153_v25, %v6148_v30  ;;  %v2510_v60 = vpack.c.bf16 %v6156_v18, %v6151_v3  ;;  %v3676_v43 = vld [vmem:[#allocation15 + $0x78] sm:$0xff]  ;;  %v3671_v30 = vld [vmem:[#allocation15 + $0x50] sm:$0xff]  ;;  %v3406_v18 = vld [vmem:[#allocation14 + $0x8] sm:$0xff] }
 0x62f   : > { %2994 = vmatprep.subr.bf16.mxu0 %v6288_v57  ;;  %v5379_v3 = vpack.c.bf16 %v3676_v43, %v3672_v63  ;;  %v5381_v57 = vpack.c.bf16 %v3675_v1, %v3671_v30  ;;  %v3410_v25 = vld [vmem:[#allocation14 + $0x28] sm:$0xff]  ;;  %v7910_v43 = vrot.slane %v7902_v42, %v7508_v10 }
 0x630   : > { %2955 = vmatprep.mubr.bf16.mxu0 %v2511_v16  ;;  %v3474_v30 = vld [vmem:[#allocation14 + $0x228] sm:$0xff] }
 0x631   : > { %2956 = vmatmul.mubr.bf16.gmra.mrb[76].mxu0 %v2510_v60 }
 0x632   : > { %2995 = vmatpush1.bf16.msra.mxu0 %v6286_v9  ;;  %2998 = vmatprep.mubr.bf16.mxu0 %v7844_v26  ;;  %v6759_v26 = vmov 1966171168   ;;  %v3409_v9 = vld [vmem:[#allocation14 + $0x20] sm:$0xff] }
 0x633   : > { %2996 = vmatprep.subr.bf16.mxu0 %v6291_v48 }
 0x636   : > { %2997 = vmatpush1.bf16.msra.mxu0 %v6289_v45  ;;  %v3414_v45 = vld [vmem:[#allocation14 + $0x48] sm:$0xff] }
 0x639   : > { %2999 = vmatmul.mubr.bf16.vlgmr.msra.gmra.mrb[80].mxu0 %v7842_v27  ;;  %v3285_v27 = vpop.permute.xlu0 %3284 }
 0x63a   : > { %3008 = vmatprep.mubr.bf16.mxu0 %v7850_v49  ;;  %v3235_v49 = vunpack.c.l.s4 %v6759_v26 }
 0x641   : > { %3009 = vmatmul.mubr.bf16.gmra.mrb[84].mxu0 %v7852_v51  ;;  %v3312_v51 = vpop.permute.xlu0 %3311 }
 0x642   : > { %3018 = vmatprep.mubr.bf16.mxu0 %v7857_v59  ;;  %v3236_v59 = vunpack.c.0.s8 %v3235_v49  ;;  %v3317_v35 = vrot.slane %v3312_v51, %v7511_v11  ;;  %v3413_v49 = vld [vmem:[#allocation14 + $0x40] sm:$0xff] }
 0x643   : > { %v3417_v51 = vld [vmem:[#allocation14 + $0x60] sm:$0xff] }
 0x645   : > { %v3275_v21 = vpop.permute.xlu0 %3274 }
 0x646   : > { %v3280_v50 = vrot.slane %v3275_v21, %v7511_v11  ;;  %v3425_v21 = vld [vmem:[#allocation14 + $0xa0] sm:$0xff] }
 0x649   : > { %3019 = vmatmul.mubr.bf16.gmra.mrb[88].mxu0 %v7859_v58  ;;  %v3269_v58 = vld [vmem:[#allocation8] sm:$0x7] }
 0x64a   : > { %3028 = vmatprep.mubr.bf16.mxu0 %v7863_v33  ;;  %v3290_v33 = vrot.slane %v3285_v27, %v7511_v11  ;;  %v3318_v6 = vmul.f32 %v3317_v35, %v3269_v58  ;;  %v3281_v29 = vmul.f32 %v3280_v50, %v3269_v58  ;;  %v3418_v27 = vld [vmem:[#allocation14 + $0x68] sm:$0xff]  ;;  %v3421_v35 = vld [vmem:[#allocation14 + $0x80] sm:$0xff] }
 0x64b   : > { %v5387_v26 = vpack.c.bf16 %v3418_v27, %v3414_v45  ;;  %v3429_v50 = vld [vmem:[#allocation14 + $0xc0] sm:$0xff] }
 0x64c   : > { %v3291_v15 = vmul.f32 %v3290_v33, %v3269_v58  ;;  %v3282_v2 = vadd.f32 %v3281_v29, %v3271_v52  ;;  %v3422_v58 = vld [vmem:[#allocation14 + $0x88] sm:$0xff]  ;;  %v3441_v29 = vld [vmem:[#allocation14 + $0x120] sm:$0xff] }
 0x64d   : > { %v3426_v33 = vld [vmem:[#allocation14 + $0xa8] sm:$0xff] }
 0x651   : > { %3029 = vmatmul.mubr.bf16.gmra.mrb[92].mxu0 %v7865_v34  ;;  %v7887_v34 = vsub.s32 %v3236_v59, %v7492_v4  ;;  %v5389_v59 = vpack.c.bf16 %v3417_v51, %v3413_v49  ;;  %v3478_v49 = vld [vmem:[#allocation14 + $0x248] sm:$0xff] }
 0x652   : > { %3038 = vmatprep.mubr.bf16.mxu0 %v7869_v24  ;;  %v5367_v24 = vpack.c.bf16 %v3666_v38, %v3662_v8  ;;  %v3430_v8 = vld [vmem:[#allocation14 + $0xc8] sm:$0xff] }
 0x653   : > { %v3299_v20 = vrot.slane %v3291_v15, %v7887_v34  ;;  %v3326_v36 = vrot.slane %v3318_v6, %v7887_v34  ;;  %v5391_v15 = vpack.c.bf16 %v3426_v33, %v3422_v58  ;;  %v3434_v38 = vld [vmem:[#allocation14 + $0xe8] sm:$0xff]  ;;  %v3477_v33 = vld [vmem:[#allocation14 + $0x240] sm:$0xff] }
 0x654   : > { %5368 = vmatprep.subr.bf16.mxu1 %v5367_v24  ;;  %v5395_v6 = vpack.c.bf16 %v3434_v38, %v3430_v8  ;;  %v3433_v24 = vld [vmem:[#allocation14 + $0xe0] sm:$0xff]  ;;  %v3482_v51 = vld [vmem:[#allocation14 + $0x268] sm:$0xff] }
 0x655   : > { %v3300_v13 = vcombine.high %v3299_v20, %v3299_v20  ;;  %v3333_v41 = vrot.slane %v3326_v36, %v7887_v34  ;;  %v5393_v20 = vpack.c.bf16 %v3425_v21, %v3421_v35  ;;  %v3437_v36 = vld [vmem:[#allocation14 + $0x100] sm:$0xff]  ;;  %v5419_v58 = vpack.c.bf16 %v3482_v51, %v3478_v49 }
 0x656   : > { %v5401_v52 = vpack.c.bf16 %v3441_v29, %v3437_v36  ;;  %v3489_v36 = vld [vmem:[#allocation14 + $0x2a0] sm:$0xff] }
 0x657   : > { %v3307_v39 = vrot.slane %v3300_v13, %v7887_v34  ;;  %v3334_v22 = vcombine.high %v3333_v41, %v3333_v41  ;;  %v3442_v13 = vld [vmem:[#allocation14 + $0x128] sm:$0xff] }
 0x658   : > { %v3450_v41 = vld [vmem:[#allocation14 + $0x168] sm:$0xff] }
 0x659   : > { %3039 = vmatmul.mubr.bf16.gmra.mrb[96].mxu0 %v7871_v40  ;;  %v3661_v40 = vld [vmem:[#allocation15] sm:$0xff]  ;;  %v3309_v56 = vadd.f32 %v3307_v39, %v3282_v2  ;;  %v3446_v39 = vld [vmem:[#allocation14 + $0x148] sm:$0xff] }
 0x65a   : > { %3048 = vmatprep.mubr.bf16.mxu0 %v2507_v19  ;;  %v5369_v12 = vpack.c.bf16 %v3665_v32, %v3661_v40  ;;  %v3674_v19 = vld [vmem:[#allocation15 + $0x68] sm:$0xff]  ;;  %v5397_v40 = vpack.c.bf16 %v3433_v24, %v3429_v50  ;;  %v5403_v2 = vpack.c.bf16 %v3450_v41, %v3446_v39 }
 0x65b   : > { %v3336_v23 = vadd.f32 %v3334_v22, %v3309_v56  ;;  %v3438_v32 = vld [vmem:[#allocation14 + $0x108] sm:$0xff]  ;;  %v5407_v22 = vpack.c.bf16 %v3458_v14, %v3454_v47  ;;  %v3453_v56 = vld [vmem:[#allocation14 + $0x180] sm:$0xff] }
 0x65c   : > { %5370 = vmatpush1.bf16.msra.mxu1 %v5369_v12  ;;  %v5399_v12 = vpack.c.bf16 %v3442_v13, %v3438_v32  ;;  %v3486_v50 = vld [vmem:[#allocation14 + $0x288] sm:$0xff] }
 0x65d   : > { %v3490_v24 = vld [vmem:[#allocation14 + $0x2a8] sm:$0xff] }
 0x65e   : > { %v5423_v13 = vpack.c.bf16 %v3490_v24, %v3486_v50  ;;  %v3494_v14 = vld [vmem:[#allocation14 + $0x2c8] sm:$0xff] }
 0x661   : > { %3049 = vmatmul.mubr.bf16.gmra.mrb[100].mxu0 %v2506_v37  ;;  %v5371_v37 = vpack.c.bf16 %v3674_v19, %v3670_v46  ;;  %v3445_v46 = vld [vmem:[#allocation14 + $0x140] sm:$0xff] }
 0x662   : > { %3058 = vmatprep.mubr.bf16.mxu0 %v2509_v55  ;;  %v3667_v55 = vld [vmem:[#allocation15 + $0x30] sm:$0xff]  ;;  %v3449_v19 = vld [vmem:[#allocation14 + $0x160] sm:$0xff] }
 0x663   : > { %5372 = vmatprep.subr.bf16.mxu1 %v5371_v37  ;;  %v5377_v5 = vpack.c.bf16 %v3667_v55, %v3663_v61  ;;  %v5405_v37 = vpack.c.bf16 %v3449_v19, %v3445_v46  ;;  %v3461_v55 = vld [vmem:[#allocation14 + $0x1c0] sm:$0xff] }
 0x664   : > { %5374 = vmatpush1.bf16.msra.mxu1 %v5373_v31  ;;  %v3457_v31 = vld [vmem:[#allocation14 + $0x1a0] sm:$0xff] }
 0x665   : > { %5376 = vmatprep.subr.bf16.mxu1 %v5375_v53  ;;  %v3466_v53 = vld [vmem:[#allocation14 + $0x1e8] sm:$0xff] }
 0x666   : > { %v5411_v61 = vpack.c.bf16 %v3466_v53, %v3462_v44  ;;  %v3493_v53 = vld [vmem:[#allocation14 + $0x2c0] sm:$0xff] }
 0x669   : > { %3059 = vmatmul.mubr.bf16.gmra.mrb[104].mxu0 %v2508_v28  ;;  %v3337_v28 = vmax.f32 %v3336_v23, 0.0  ;;  %v5409_v23 = vpack.c.bf16 %v3457_v31, %v3453_v56 }
 0x66a   : > { %3068 = vmatprep.mubr.bf16.mxu0 %v2511_v16  ;;  %v5383_v16 = vpack.c.bf16 %v3410_v25, %v3406_v18  ;;  %v3469_v18 = vld [vmem:[#allocation14 + $0x200] sm:$0xff] }
 0x66b   : > { %5140 = vmatmul.mubr.msk.f32.vlgmr.msra.gmra.mrb[16].mxu1 %vm3677_vm1, %v3337_v28  ;;  %v3473_v25 = vld [vmem:[#allocation14 + $0x220] sm:$0xff] }
 0x66c   : > { %5378 = vmatpush1.bf16.msra.mxu1 %v5377_v5  ;;  %3816 = vmatprep.mubr.f32.mxu1 %v6760_v54  ;;  %v7906_v5 = vrot.slane %v7902_v42, %v7511_v11 }
 0x66d   : > { %5380 = vmatprep.subr.bf16.mxu1 %v5379_v3  ;;  %v3470_v3 = vld [vmem:[#allocation14 + $0x208] sm:$0xff] }
 0x670   : > { %5382 = vmatpush1.bf16.msra.mxu1 %v5381_v57  ;;  %v5415_v57 = vpack.c.bf16 %v3474_v30, %v3470_v3 }
 0x671   : > { %3069 = vmatmul.mubr.bf16.gmra.mrb[108].mxu0 %v2510_v60  ;;  %v3405_v60 = vld [vmem:[#allocation14] sm:$0xff]  ;;  %5384 = vmatprep.subr.bf16.mxu1 %v5383_v16 }
 0x672   : > { %v5385_v48 = vpack.c.bf16 %v3409_v9, %v3405_v60  ;;  %v5417_v9 = vpack.c.bf16 %v3473_v25, %v3469_v18 }
 0x673   : > { %5141 = vmatmul.mubr.msk.f32.vlgmr.msra.gmra.mrb[18].mxu1 %vm3677_vm1, %v3337_v28  ;;  %v3465_v28 = vld [vmem:[#allocation14 + $0x1e0] sm:$0xff] }
 0x674   : > { %5386 = vmatpush1.bf16.msra.mxu1 %v5385_v48  ;;  %v5413_v63 = vpack.c.bf16 %v3465_v28, %v3461_v55 }
 0x675   : > { %5388 = vmatprep.subr.bf16.mxu1 %v5387_v26 }
 0x678   : > { %5390 = vmatpush1.bf16.msra.mxu1 %v5389_v59 }
 0x679   : > { %5392 = vmatprep.subr.bf16.mxu1 %v5391_v15  ;;  %v3481_v15 = vld [vmem:[#allocation14 + $0x260] sm:$0xff] }
 0x67c   : > { %5394 = vmatpush1.bf16.msra.mxu1 %v5393_v20  ;;  %v5421_v20 = vpack.c.bf16 %v3481_v15, %v3477_v33  ;;  %v3510_v33 = vld [vmem:[#allocation14 + $0x348] sm:$0xff] }
 0x67d   : > { %5396 = vmatprep.subr.bf16.mxu1 %v5395_v6  ;;  %v3514_v15 = vld [vmem:[#allocation14 + $0x368] sm:$0xff] }
 0x680   : > { %5398 = vmatpush1.bf16.msra.mxu1 %v5397_v40 }
 0x681   : > { %5400 = vmatprep.subr.bf16.mxu1 %v5399_v12  ;;  %v3485_v12 = vld [vmem:[#allocation14 + $0x280] sm:$0xff] }
 0x682   : > { %v5425_v39 = vpack.c.bf16 %v3489_v36, %v3485_v12  ;;  %v3518_v12 = vld [vmem:[#allocation14 + $0x388] sm:$0xff] }
 0x683   : > { %v3522_v36 = vld [vmem:[#allocation14 + $0x3a8] sm:$0xff] }
 0x684   : > { %5402 = vmatpush1.bf16.msra.mxu1 %v5401_v52 }
 0x685   : > { %5404 = vmatprep.subr.bf16.mxu1 %v5403_v2 }
 0x688   : > { %5406 = vmatpush1.bf16.msra.mxu1 %v5405_v37 }
 0x689   : > { %5408 = vmatprep.subr.bf16.mxu1 %v5407_v22  ;;  %v3498_v22 = vld [vmem:[#allocation14 + $0x2e8] sm:$0xff] }
 0x68a   : > { %v5427_v44 = vpack.c.bf16 %v3498_v22, %v3494_v14  ;;  %v3530_v22 = vld [vmem:[#allocation14 + $0x3e8] sm:$0xff] }
 0x68c   : > { %5410 = vmatpush1.bf16.msra.mxu1 %v5409_v23  ;;  %v6761_v23 = vmov -inf  }
 0x68d   : > { %5412 = vmatprep.subr.bf16.mxu1 %v5411_v61  ;;  %1041 = vst.msk [vmem:[#allocation2] sm:$0xf] %vm7920_vm2, %v6761_v23  ;;  %v3497_v61 = vld [vmem:[#allocation14 + $0x2e0] sm:$0xff] }
 0x690   : > { %5414 = vmatpush1.bf16.msra.mxu1 %v5413_v63  ;;  %v5429_v63 = vpack.c.bf16 %v3497_v61, %v3493_v53 }
 0x691   : > { %5416 = vmatprep.subr.bf16.mxu1 %v5415_v57  ;;  %v3506_v57 = vld [vmem:[#allocation14 + $0x328] sm:$0xff] }
 0x694   : > { %5418 = vmatpush1.bf16.msra.mxu1 %v5417_v9  ;;  %v3505_v9 = vld [vmem:[#allocation14 + $0x320] sm:$0xff] }
 0x695   : > { %5420 = vmatprep.subr.bf16.mxu1 %v5419_v58 }
 0x698   : > { %5422 = vmatpush1.bf16.msra.mxu1 %v5421_v20  ;;  %v5435_v20 = vpack.c.bf16 %v3514_v15, %v3510_v33 }
 0x699   : > { %5424 = vmatprep.subr.bf16.mxu1 %v5423_v13 }
 0x69c   : > { %5426 = vmatpush1.bf16.msra.mxu1 %v5425_v39  ;;  %v5439_v39 = vpack.c.bf16 %v3522_v36, %v3518_v12 }
 0x69d   : > { %5428 = vmatprep.subr.bf16.mxu1 %v5427_v44 }
 0x6a0   : > { %5430 = vmatpush1.bf16.msra.mxu1 %v5429_v63 }
 0x6cc   : > { %v2887_v1 = vpop.f32.mrb[48].mxu0 }
 0x6cd   : > { %v2888_v16 = vadd.f32 %v2887_v1, %v7906_v5  ;;  %v2889_v60 = vpop.f32.mrb[49].mxu0  ;;  %v3502_v1 = vld [vmem:[#allocation14 + $0x308] sm:$0xff] }
 0x6ce   : > { %v2890_v48 = vadd.f32 %v2889_v60, %v7910_v43  ;;  %v2891_v45 = vpop.f32.mrb[50].mxu0  ;;  %v3501_v60 = vld [vmem:[#allocation14 + $0x300] sm:$0xff] }
 0x6cf   : > { %v2892_v27 = vadd.f32 %v2891_v45, %v7906_v5  ;;  %v2893_v26 = vpop.f32.mrb[51].mxu0  ;;  %v3079_v35 = vmax.f32 %v2888_v16, 0.0  ;;  %v5431_v16 = vpack.c.bf16 %v3506_v57, %v3502_v1 }
 0x6d0   : > { %v2894_v59 = vadd.f32 %v2893_v26, %v7910_v43  ;;  %v3080_v8 = vmax.f32 %v2890_v48, 0.0 }
 0x6d1   : > { %v3083_v21 = vmax.f32 %v2892_v27, 0.0  ;;  %v5433_v27 = vpack.c.bf16 %v3505_v9, %v3501_v60  ;;  %5432 = vmatprep.subr.bf16.mxu1 %v5431_v16  ;;  %v3534_v16 = vld [vmem:[#allocation14 + $0x408] sm:$0xff] }
 0x6d2   : > { %v3084_v38 = vmax.f32 %v2894_v59, 0.0  ;;  %v3538_v60 = vld [vmem:[#allocation14 + $0x428] sm:$0xff] }
 0x6d3   : > { %v3143_v6 = vmax.f32 %v3079_v35, %v3083_v21  ;;  %5434 = vmatpush1.bf16.msra.mxu1 %v5433_v27 }
 0x6d4   : > { %v3164_v40 = vmax.f32 %v3080_v8, %v3084_v38  ;;  %v2897_v32 = vpop.f32.mrb[52].mxu0  ;;  %v3509_v8 = vld [vmem:[#allocation14 + $0x340] sm:$0xff]  ;;  %5436 = vmatprep.subr.bf16.mxu1 %v5435_v20 }
 0x6d5   : > { %v2898_v29 = vadd.f32 %v2897_v32, %v7906_v5  ;;  %v2899_v52 = vpop.f32.mrb[53].mxu0  ;;  %v3513_v38 = vld [vmem:[#allocation14 + $0x360] sm:$0xff] }
 0x6d6   : > { %v2900_v41 = vadd.f32 %v2899_v52, %v7910_v43  ;;  %v2901_v2 = vpop.f32.mrb[54].mxu0  ;;  %v5437_v24 = vpack.c.bf16 %v3513_v38, %v3509_v8 }
 0x6d7   : > { %v3087_v46 = vmax.f32 %v2898_v29, 0.0  ;;  %v2902_v19 = vadd.f32 %v2901_v2, %v7906_v5  ;;  %v2903_v37 = vpop.f32.mrb[55].mxu0  ;;  %v3521_v2 = vld [vmem:[#allocation14 + $0x3a0] sm:$0xff] }
 0x6d8   : > { %v3088_v56 = vmax.f32 %v2900_v41, 0.0  ;;  %v2904_v31 = vadd.f32 %v2903_v37, %v7910_v43  ;;  %5438 = vmatpush1.bf16.msra.mxu1 %v5437_v24  ;;  %v3517_v41 = vld [vmem:[#allocation14 + $0x380] sm:$0xff] }
 0x6d9   : > { %v3144_v55 = vmax.f32 %v3143_v6, %v3087_v46  ;;  %v3091_v28 = vmax.f32 %v2902_v19, 0.0  ;;  %v3526_v46 = vld [vmem:[#allocation14 + $0x3c8] sm:$0xff]  ;;  %v5441_v14 = vpack.c.bf16 %v3521_v2, %v3517_v41  ;;  %5440 = vmatprep.subr.bf16.mxu1 %v5439_v39 }
 0x6da   : > { %v3165_v62 = vmax.f32 %v3164_v40, %v3088_v56  ;;  %v3092_v3 = vmax.f32 %v2904_v31, 0.0  ;;  %v3525_v56 = vld [vmem:[#allocation14 + $0x3c0] sm:$0xff]  ;;  %v5443_v53 = vpack.c.bf16 %v3530_v22, %v3526_v46 }
 0x6db   : > { %v3145_v30 = vmax.f32 %v3144_v55, %v3091_v28  ;;  %v3529_v31 = vld [vmem:[#allocation14 + $0x3e0] sm:$0xff] }
 0x6dc   : > { %v3166_v18 = vmax.f32 %v3165_v62, %v3092_v3  ;;  %v2907_v25 = vpop.f32.mrb[56].mxu0  ;;  %5442 = vmatpush1.bf16.msra.mxu1 %v5441_v14  ;;  %v5445_v63 = vpack.c.bf16 %v3529_v31, %v3525_v56 }
 0x6dd   : > { %v2908_v48 = vadd.f32 %v2907_v25, %v7906_v5  ;;  %v2909_v45 = vpop.f32.mrb[57].mxu0  ;;  %5444 = vmatprep.subr.bf16.mxu1 %v5443_v53 }
 0x6de   : > { %v2910_v26 = vadd.f32 %v2909_v45, %v7910_v43  ;;  %v2911_v49 = vpop.f32.mrb[58].mxu0  ;;  %v5447_v45 = vpack.c.bf16 %v3538_v60, %v3534_v16 }
 0x6df   : > { %v3095_v51 = vmax.f32 %v2908_v48, 0.0  ;;  %v2912_v59 = vadd.f32 %v2911_v49, %v7906_v5  ;;  %v2913_v58 = vpop.f32.mrb[59].mxu0 }
 0x6e0   : > { %v3096_v35 = vmax.f32 %v2910_v26, 0.0  ;;  %v2914_v21 = vadd.f32 %v2913_v58, %v7910_v43  ;;  %5446 = vmatpush1.bf16.msra.mxu1 %v5445_v63 }
 0x6e1   : > { %v3146_v6 = vmax.f32 %v3145_v30, %v3095_v51  ;;  %v3099_v50 = vmax.f32 %v2912_v59, 0.0  ;;  %5448 = vmatprep.subr.bf16.mxu1 %v5447_v45 }
 0x6e2   : > { %v3167_v40 = vmax.f32 %v3166_v18, %v3096_v35  ;;  %v3100_v32 = vmax.f32 %v2914_v21, 0.0 }
 0x6e3   : > { %v3147_v13 = vmax.f32 %v3146_v6, %v3099_v50 }
 0x6e4   : > { %v3168_v29 = vmax.f32 %v3167_v40, %v3100_v32  ;;  %v2917_v52 = vpop.f32.mrb[60].mxu0 }
 0x6e5   : > { %v2918_v19 = vadd.f32 %v2917_v52, %v7906_v5  ;;  %v2919_v37 = vpop.f32.mrb[61].mxu0 }
 0x6e6   : > { %v2920_v23 = vadd.f32 %v2919_v37, %v7910_v43  ;;  %v2921_v44 = vpop.f32.mrb[62].mxu0 }
 0x6e7   : > { %v3103_v61 = vmax.f32 %v2918_v19, 0.0  ;;  %v2922_v55 = vadd.f32 %v2921_v44, %v7906_v5  ;;  %v2923_v28 = vpop.f32.mrb[63].mxu0 }
 0x6e8   : > { %v3104_v62 = vmax.f32 %v2920_v23, 0.0  ;;  %v2924_v3 = vadd.f32 %v2923_v28, %v7910_v43 }
 0x6e9   : > { %v3148_v30 = vmax.f32 %v3147_v13, %v3103_v61  ;;  %v3107_v1 = vmax.f32 %v2922_v55, 0.0 }
 0x6ea   : > { %v3169_v57 = vmax.f32 %v3168_v29, %v3104_v62  ;;  %v3108_v18 = vmax.f32 %v2924_v3, 0.0 }
 0x6eb   : > { %v3149_v25 = vmax.f32 %v3148_v30, %v3107_v1 }
 0x6ec   : > { %v3170_v9 = vmax.f32 %v3169_v57, %v3108_v18  ;;  %v2927_v48 = vpop.f32.mrb[64].mxu0 }
 0x6ed   : > { %v2928_v27 = vadd.f32 %v2927_v48, %v7906_v5  ;;  %v2929_v26 = vpop.f32.mrb[65].mxu0 }
 0x6ee   : > { %v2930_v49 = vadd.f32 %v2929_v26, %v7910_v43  ;;  %v2931_v51 = vpop.f32.mrb[66].mxu0 }
 0x6ef   : > { %v3111_v59 = vmax.f32 %v2928_v27, 0.0  ;;  %v2932_v58 = vadd.f32 %v2931_v51, %v7906_v5  ;;  %v2933_v33 = vpop.f32.mrb[67].mxu0  ;;  %v7950_v27 = vsub.s32 3, %v7492_v4 }
 0x6f0   : > { %v3112_v15 = vmax.f32 %v2930_v49, 0.0  ;;  %v2934_v35 = vadd.f32 %v2933_v33, %v7910_v43  ;;  %v7956_v33 = vrot.slane %v7902_v42, %v7523_v17 }
 0x6f1   : > { %v3150_v21 = vmax.f32 %v3149_v25, %v3111_v59  ;;  %v3115_v20 = vmax.f32 %v2932_v58, 0.0 }
 0x6f2   : > { %v3171_v8 = vmax.f32 %v3170_v9, %v3112_v15  ;;  %v3116_v38 = vmax.f32 %v2934_v35, 0.0 }
 0x6f3   : > { %v3151_v6 = vmax.f32 %v3150_v21, %v3115_v20 }
 0x6f4   : > { %v3172_v50 = vmax.f32 %v3171_v8, %v3116_v38  ;;  %v2937_v24 = vpop.f32.mrb[68].mxu0  ;;  %v7960_v8 = vrot.slane %v7902_v42, %v7950_v27 }
 0x6f5   : > { %v2938_v40 = vadd.f32 %v2937_v24, %v7906_v5  ;;  %v2939_v32 = vpop.f32.mrb[69].mxu0 }
 0x6f6   : > { %v2940_v13 = vadd.f32 %v2939_v32, %v7910_v43  ;;  %v2941_v12 = vpop.f32.mrb[70].mxu0 }
 0x6f7   : > { %v3119_v36 = vmax.f32 %v2938_v40, 0.0  ;;  %v2942_v29 = vadd.f32 %v2941_v12, %v7906_v5  ;;  %v2943_v52 = vpop.f32.mrb[71].mxu0 }
 0x6f8   : > { %v3120_v39 = vmax.f32 %v2940_v13, 0.0  ;;  %v2944_v41 = vadd.f32 %v2943_v52, %v7910_v43 }
 0x6f9   : > { %v3152_v2 = vmax.f32 %v3151_v6, %v3119_v36  ;;  %v3123_v46 = vmax.f32 %v2942_v29, 0.0 }
 0x6fa   : > { %v3173_v19 = vmax.f32 %v3172_v50, %v3120_v39  ;;  %v3124_v37 = vmax.f32 %v2944_v41, 0.0 }
 0x6fb   : > { %v3153_v14 = vmax.f32 %v3152_v2, %v3123_v46 }
 0x6fc   : > { %v3174_v22 = vmax.f32 %v3173_v19, %v3124_v37  ;;  %v2947_v56 = vpop.f32.mrb[72].mxu0 }
 0x6fd   : > { %v2948_v31 = vadd.f32 %v2947_v56, %v7906_v5  ;;  %v2949_v23 = vpop.f32.mrb[73].mxu0 }
 0x6fe   : > { %v2950_v44 = vadd.f32 %v2949_v23, %v7910_v43  ;;  %v2951_v53 = vpop.f32.mrb[74].mxu0 }
 0x6ff   : > { %v3127_v61 = vmax.f32 %v2948_v31, 0.0  ;;  %v2952_v55 = vadd.f32 %v2951_v53, %v7906_v5  ;;  %v2953_v28 = vpop.f32.mrb[75].mxu0 }
 0x700   : > { %v3128_v63 = vmax.f32 %v2950_v44, 0.0  ;;  %v2954_v62 = vadd.f32 %v2953_v28, %v7910_v43 }
 0x701   : > { %v3154_v3 = vmax.f32 %v3153_v14, %v3127_v61  ;;  %v3131_v30 = vmax.f32 %v2952_v55, 0.0 }
 0x702   : > { %v3175_v1 = vmax.f32 %v3174_v22, %v3128_v63  ;;  %v3132_v57 = vmax.f32 %v2954_v62, 0.0 }
 0x703   : > { %v3155_v18 = vmax.f32 %v3154_v3, %v3131_v30 }
 0x704   : > { %v3176_v25 = vmax.f32 %v3175_v1, %v3132_v57  ;;  %v2957_v16 = vpop.f32.mrb[76].mxu0 }
 0x705   : > { %v2958_v60 = vadd.f32 %v2957_v16, %v7906_v5  ;;  %v2959_v9 = vpop.f32.mrb[77].mxu0 }
 0x706   : > { %v2960_v48 = vadd.f32 %v2959_v9, %v7910_v43  ;;  %v2961_v45 = vpop.f32.mrb[78].mxu0 }
 0x707   : > { %v3135_v26 = vmax.f32 %v2958_v60, 0.0  ;;  %v2962_v49 = vadd.f32 %v2961_v45, %v7906_v5  ;;  %v2963_v51 = vpop.f32.mrb[79].mxu0  ;;  %v3268_v60 = vld [vmem:[%s8729_s17] sm:$0x1] }
 0x708   : > { %v3136_v59 = vmax.f32 %v2960_v48, 0.0  ;;  %v2964_v58 = vadd.f32 %v2963_v51, %v7910_v43  ;;  %3351 = vperm.xlu0 %6160, %v3268_v60  }
 0x709   : > { %v3156_v15 = vmax.f32 %v3155_v18, %v3135_v26  ;;  %v3139_v35 = vmax.f32 %v2962_v49, 0.0 }
 0x70a   : > { %v3177_v21 = vmax.f32 %v3176_v25, %v3136_v59  ;;  %v3140_v20 = vmax.f32 %v2964_v58, 0.0 }
 0x70b   : > { %v3157_v4 = vmax.f32 %v3156_v15, %v3139_v35 }
 0x70c   : > { %v3178_v38 = vmax.f32 %v3177_v21, %v3140_v20  ;;  %v3000_v6 = vpop.f32.mrb[80].mxu0  ;;  %6161 = vset.pattern.permute.xlu0 %v6756_v0 }
 0x70d   : > { %v3158_v5 = vrot.slane %v3157_v4, 4  ;;  %v3001_v50 = vadd.f32 %v3000_v6, %v7956_v33  ;;  %v3002_v24 = vpop.f32.mrb[81].mxu0  ;;  %3378 = vperm.xlu0 %6161, %v3268_v60  }
 0x70e   : > { %v3179_v43 = vrot.slane %v3178_v38, 4  ;;  %v3003_v40 = vadd.f32 %v3002_v24, %v7960_v8  ;;  %v3004_v32 = vpop.f32.mrb[82].mxu0 }
 0x70f   : > { %v3159_v13 = vmax.f32 %v3157_v4, %v3158_v5  ;;  %v3005_v12 = vadd.f32 %v3004_v32, %v7956_v33  ;;  %v3006_v36 = vpop.f32.mrb[83].mxu0  ;;  %v3081_v39 = vmax.f32 %v3001_v50, 0.0 }
 0x710   : > { %v3180_v29 = vmax.f32 %v3178_v38, %v3179_v43  ;;  %v3007_v52 = vadd.f32 %v3006_v36, %v7960_v8  ;;  %v3082_v46 = vmax.f32 %v3003_v40, 0.0 }
 0x711   : > { %v3160_v42 = vrot.slane %v3159_v13, 2  ;;  %v3085_v41 = vmax.f32 %v3005_v12, 0.0  ;;  %6162 = vset.pattern.permute.xlu0 %v6758_v7 }
 0x712   : > { %v3181_v2 = vrot.slane %v3180_v29, 2  ;;  %v3086_v19 = vmax.f32 %v3007_v52, 0.0  ;;  %3341 = vperm.xlu0 %6162, %v3268_v60  }
 0x713   : > { %v3161_v37 = vmax.f32 %v3159_v13, %v3160_v42  ;;  %v3185_v14 = vmax.f32 %v3081_v39, %v3085_v41 }
 0x714   : > { %v3182_v22 = vmax.f32 %v3180_v29, %v3181_v2  ;;  %v3206_v56 = vmax.f32 %v3082_v46, %v3086_v19  ;;  %v3010_v31 = vpop.f32.mrb[84].mxu0 }
 0x715   : > { %v3162_v23 = vrot.slane %v3161_v37, 1  ;;  %v3011_v44 = vadd.f32 %v3010_v31, %v7956_v33  ;;  %v3012_v53 = vpop.f32.mrb[85].mxu0 }
 0x716   : > { %v3183_v61 = vrot.slane %v3182_v22, 1  ;;  %v3013_v55 = vadd.f32 %v3012_v53, %v7960_v8  ;;  %v3014_v28 = vpop.f32.mrb[86].mxu0  ;;  %6163 = vset.pattern.permute.xlu0 %v6756_v0 }
 0x717   : > { %v7968_v63 = vmax.f32 %v3161_v37, %v3162_v23  ;;  %v3089_v62 = vmax.f32 %v3011_v44, 0.0  ;;  %v3015_v3 = vadd.f32 %v3014_v28, %v7956_v33  ;;  %v3016_v30 = vpop.f32.mrb[87].mxu0 }
 0x718   : > { %v7971_v1 = vmax.f32 %v3182_v22, %v3183_v61  ;;  %v3090_v57 = vmax.f32 %v3013_v55, 0.0  ;;  %v3017_v18 = vadd.f32 %v3016_v30, %v7960_v8 }
 0x719   : > { %v3186_v25 = vmax.f32 %v3185_v14, %v3089_v62  ;;  %v3093_v16 = vmax.f32 %v3015_v3, 0.0 }
 0x71a   : > { %v3232_v9 = vcombine.low %v7968_v63, %v7971_v1  ;;  %v3207_v48 = vmax.f32 %v3206_v56, %v3090_v57  ;;  %v3094_v45 = vmax.f32 %v3017_v18, 0.0 }
 0x71b   : > { %v3187_v26 = vmax.f32 %v3186_v25, %v3093_v16 }
 0x71c   : > { %v3208_v49 = vmax.f32 %v3207_v48, %v3094_v45  ;;  %v3020_v51 = vpop.f32.mrb[88].mxu0 }
 0x71d   : > { %v3021_v59 = vadd.f32 %v3020_v51, %v7956_v33  ;;  %v3022_v58 = vpop.f32.mrb[89].mxu0 }
 0x71e   : > { %v3023_v15 = vadd.f32 %v3022_v58, %v7960_v8  ;;  %v3024_v35 = vpop.f32.mrb[90].mxu0 }
 0x71f   : > { %v3097_v21 = vmax.f32 %v3021_v59, 0.0  ;;  %v3025_v20 = vadd.f32 %v3024_v35, %v7956_v33  ;;  %v3026_v4 = vpop.f32.mrb[91].mxu0 }
 0x720   : > { %v3098_v38 = vmax.f32 %v3023_v15, 0.0  ;;  %v3027_v6 = vadd.f32 %v3026_v4, %v7960_v8 }
 0x721   : > { %v3188_v5 = vmax.f32 %v3187_v26, %v3097_v21  ;;  %v3101_v50 = vmax.f32 %v3025_v20, 0.0 }
 0x722   : > { %v3209_v24 = vmax.f32 %v3208_v49, %v3098_v38  ;;  %v3102_v43 = vmax.f32 %v3027_v6, 0.0 }
 0x723   : > { %v3189_v40 = vmax.f32 %v3188_v5, %v3101_v50 }
 0x724   : > { %v3210_v32 = vmax.f32 %v3209_v24, %v3102_v43  ;;  %v3030_v13 = vpop.f32.mrb[92].mxu0 }
 0x725   : > { %v3031_v12 = vadd.f32 %v3030_v13, %v7956_v33  ;;  %v3032_v36 = vpop.f32.mrb[93].mxu0 }
 0x726   : > { %v3033_v29 = vadd.f32 %v3032_v36, %v7960_v8  ;;  %v3034_v52 = vpop.f32.mrb[94].mxu0 }
 0x727   : > { %v3105_v42 = vmax.f32 %v3031_v12, 0.0  ;;  %v3035_v39 = vadd.f32 %v3034_v52, %v7956_v33  ;;  %v3036_v41 = vpop.f32.mrb[95].mxu0 }
 0x728   : > { %v3106_v2 = vmax.f32 %v3033_v29, 0.0  ;;  %v3037_v46 = vadd.f32 %v3036_v41, %v7960_v8 }
 0x729   : > { %v3190_v19 = vmax.f32 %v3189_v40, %v3105_v42  ;;  %v3109_v7 = vmax.f32 %v3035_v39, 0.0 }
 0x72a   : > { %v3211_v37 = vmax.f32 %v3210_v32, %v3106_v2  ;;  %v3110_v14 = vmax.f32 %v3037_v46, 0.0 }
 0x72b   : > { %v3191_v22 = vmax.f32 %v3190_v19, %v3109_v7 }
 0x72c   : > { %v3212_v56 = vmax.f32 %v3211_v37, %v3110_v14  ;;  %v3040_v31 = vpop.f32.mrb[96].mxu0 }
 0x72d   : > { %v3041_v23 = vadd.f32 %v3040_v31, %v7956_v33  ;;  %v3042_v44 = vpop.f32.mrb[97].mxu0 }
 0x72e   : > { %v3043_v53 = vadd.f32 %v3042_v44, %v7960_v8  ;;  %v3044_v61 = vpop.f32.mrb[98].mxu0 }
 0x72f   : > { %v3113_v55 = vmax.f32 %v3041_v23, 0.0  ;;  %v3045_v28 = vadd.f32 %v3044_v61, %v7956_v33  ;;  %v3046_v62 = vpop.f32.mrb[99].mxu0 }
 0x730   : > { %v3114_v3 = vmax.f32 %v3043_v53, 0.0  ;;  %v3047_v0 = vadd.f32 %v3046_v62, %v7960_v8 }
 0x731   : > { %v3192_v30 = vmax.f32 %v3191_v22, %v3113_v55  ;;  %v3117_v57 = vmax.f32 %v3045_v28, 0.0 }
 0x732   : > { %v3213_v18 = vmax.f32 %v3212_v56, %v3114_v3  ;;  %v3118_v25 = vmax.f32 %v3047_v0, 0.0 }
 0x733   : > { %v3193_v16 = vmax.f32 %v3192_v30, %v3117_v57 }
 0x734   : > { %v3214_v60 = vmax.f32 %v3213_v18, %v3118_v25  ;;  %v3050_v48 = vpop.f32.mrb[100].mxu0 }
 0x735   : > { %v3051_v45 = vadd.f32 %v3050_v48, %v7956_v33  ;;  %v3052_v26 = vpop.f32.mrb[101].mxu0 }
 0x736   : > { %v3053_v49 = vadd.f32 %v3052_v26, %v7960_v8  ;;  %v3054_v51 = vpop.f32.mrb[102].mxu0 }
 0x737   : > { %v3121_v59 = vmax.f32 %v3051_v45, 0.0  ;;  %v3055_v58 = vadd.f32 %v3054_v51, %v7956_v33  ;;  %v3056_v15 = vpop.f32.mrb[103].mxu0 }
 0x738   : > { %v3122_v35 = vmax.f32 %v3053_v49, 0.0  ;;  %v3057_v21 = vadd.f32 %v3056_v15, %v7960_v8 }
 0x739   : > { %v3194_v20 = vmax.f32 %v3193_v16, %v3121_v59  ;;  %v3125_v4 = vmax.f32 %v3055_v58, 0.0 }
 0x73a   : > { %v3215_v38 = vmax.f32 %v3214_v60, %v3122_v35  ;;  %v3126_v6 = vmax.f32 %v3057_v21, 0.0 }
 0x73b   : > { %v3195_v5 = vmax.f32 %v3194_v20, %v3125_v4  ;;  %v3227_v20 = vld [vmem:[#allocation2] sm:$0xf] }
 0x73c   : > { %v3216_v50 = vmax.f32 %v3215_v38, %v3126_v6  ;;  %v3060_v24 = vpop.f32.mrb[104].mxu0  ;;  %v3533_v6 = vld [vmem:[#allocation14 + $0x400] sm:$0xff] }
 0x73d   : > { %v3061_v43 = vadd.f32 %v3060_v24, %v7956_v33  ;;  %v3062_v40 = vpop.f32.mrb[105].mxu0  ;;  %v3546_v24 = vld [vmem:[#allocation14 + $0x468] sm:$0xff] }
 0x73e   : > { %v3063_v32 = vadd.f32 %v3062_v40, %v7960_v8  ;;  %v3064_v13 = vpop.f32.mrb[106].mxu0 }
 0x73f   : > { %v3129_v12 = vmax.f32 %v3061_v43, 0.0  ;;  %v3065_v36 = vadd.f32 %v3064_v13, %v7956_v33  ;;  %v3066_v29 = vpop.f32.mrb[107].mxu0  ;;  %v3545_v13 = vld [vmem:[#allocation14 + $0x460] sm:$0xff] }
 0x740   : > { %v3130_v52 = vmax.f32 %v3063_v32, 0.0  ;;  %v3067_v42 = vadd.f32 %v3066_v29, %v7960_v8  ;;  %v3541_v32 = vld [vmem:[#allocation14 + $0x440] sm:$0xff] }
 0x741   : > { %v3196_v39 = vmax.f32 %v3195_v5, %v3129_v12  ;;  %v3133_v41 = vmax.f32 %v3065_v36, 0.0  ;;  %v3537_v5 = vld [vmem:[#allocation14 + $0x420] sm:$0xff]  ;;  %v3550_v12 = vld [vmem:[#allocation14 + $0x488] sm:$0xff]  ;;  %v5453_v29 = vpack.c.bf16 %v3545_v13, %v3541_v32 }
 0x742   : > { %v3217_v2 = vmax.f32 %v3216_v50, %v3130_v52  ;;  %v3134_v46 = vmax.f32 %v3067_v42, 0.0  ;;  %v3542_v50 = vld [vmem:[#allocation14 + $0x448] sm:$0xff]  ;;  %v3549_v42 = vld [vmem:[#allocation14 + $0x480] sm:$0xff] }
 0x743   : > { %v3197_v19 = vmax.f32 %v3196_v39, %v3133_v41  ;;  %v5451_v40 = vpack.c.bf16 %v3546_v24, %v3542_v50  ;;  %v3554_v36 = vld [vmem:[#allocation14 + $0x4a8] sm:$0xff]  ;;  %v3553_v39 = vld [vmem:[#allocation14 + $0x4a0] sm:$0xff] }
 0x744   : > { %v3218_v7 = vmax.f32 %v3217_v2, %v3134_v46  ;;  %v3070_v37 = vpop.f32.mrb[108].mxu0  ;;  %v5455_v52 = vpack.c.bf16 %v3554_v36, %v3550_v12  ;;  %v3558_v41 = vld [vmem:[#allocation14 + $0x4c8] sm:$0xff]  ;;  %v5457_v46 = vpack.c.bf16 %v3553_v39, %v3549_v42  ;;  %v3613_v32 = vld [vmem:[#allocation14 + $0x680] sm:$0xff] }
 0x745   : > { %v3071_v14 = vadd.f32 %v3070_v37, %v7956_v33  ;;  %v3072_v22 = vpop.f32.mrb[109].mxu0  ;;  %v3562_v2 = vld [vmem:[#allocation14 + $0x4e8] sm:$0xff]  ;;  %v3561_v37 = vld [vmem:[#allocation14 + $0x4e0] sm:$0xff] }
 0x746   : > { %v3073_v56 = vadd.f32 %v3072_v22, %v7960_v8  ;;  %v3074_v31 = vpop.f32.mrb[110].mxu0  ;;  %v3570_v22 = vld [vmem:[#allocation14 + $0x528] sm:$0xff]  ;;  %v3617_v13 = vld [vmem:[#allocation14 + $0x6a0] sm:$0xff] }
 0x747   : > { %v3137_v23 = vmax.f32 %v3071_v14, 0.0  ;;  %v3075_v44 = vadd.f32 %v3074_v31, %v7956_v33  ;;  %v3076_v53 = vpop.f32.mrb[111].mxu0  ;;  %v3566_v14 = vld [vmem:[#allocation14 + $0x508] sm:$0xff]  ;;  %v3621_v42 = vld [vmem:[#allocation14 + $0x6c0] sm:$0xff] }
 0x748   : > { %v3138_v61 = vmax.f32 %v3073_v56, 0.0  ;;  %v3077_v55 = vadd.f32 %v3076_v53, %v7960_v8  ;;  %v3240_v8 = vrot.slane %v3232_v9, %v7887_v34  ;;  %v5449_v9 = vpack.c.bf16 %v3537_v5, %v3533_v6  ;;  %v3574_v53 = vld [vmem:[#allocation14 + $0x548] sm:$0xff]  ;;  %v3605_v6 = vld [vmem:[#allocation14 + $0x640] sm:$0xff] }
 0x749   : > { %v3198_v28 = vmax.f32 %v3197_v19, %v3137_v23  ;;  %v3141_v62 = vmax.f32 %v3075_v44, 0.0  ;;  %v5459_v19 = vpack.c.bf16 %v3562_v2, %v3558_v41  ;;  %v5463_v31 = vpack.c.bf16 %v3570_v22, %v3566_v14  ;;  %v3565_v23 = vld [vmem:[#allocation14 + $0x500] sm:$0xff]  ;;  %v3614_v50 = vld [vmem:[#allocation14 + $0x688] sm:$0xff] }
 0x74a   : > { %v3219_v3 = vmax.f32 %v3218_v7, %v3138_v61  ;;  %v3142_v0 = vmax.f32 %v3077_v55, 0.0  ;;  %v3557_v7 = vld [vmem:[#allocation14 + $0x4c0] sm:$0xff]  ;;  %v3578_v61 = vld [vmem:[#allocation14 + $0x568] sm:$0xff] }
 0x74b   : > { %v3199_v30 = vmax.f32 %v3198_v28, %v3141_v62  ;;  %v5461_v56 = vpack.c.bf16 %v3561_v37, %v3557_v7  ;;  %v3569_v44 = vld [vmem:[#allocation14 + $0x520] sm:$0xff]  ;;  %v5467_v28 = vpack.c.bf16 %v3578_v61, %v3574_v53  ;;  %v3618_v24 = vld [vmem:[#allocation14 + $0x6a8] sm:$0xff] }
 0x74c   : > { %v3220_v57 = vmax.f32 %v3219_v3, %v3142_v0  ;;  %v5465_v55 = vpack.c.bf16 %v3569_v44, %v3565_v23  ;;  %v3573_v62 = vld [vmem:[#allocation14 + $0x540] sm:$0xff]  ;;  %v3582_v0 = vld [vmem:[#allocation14 + $0x588] sm:$0xff] }
 0x74d   : > { %v3200_v18 = vrot.slane %v3199_v30, 4  ;;  %v3577_v3 = vld [vmem:[#allocation14 + $0x560] sm:$0xff]  ;;  %v3622_v12 = vld [vmem:[#allocation14 + $0x6c8] sm:$0xff] }
 0x74e   : > { %v3221_v25 = vrot.slane %v3220_v57, 4  ;;  %v3609_v5 = vld [vmem:[#allocation14 + $0x660] sm:$0xff]  ;;  %v3626_v36 = vld [vmem:[#allocation14 + $0x6e8] sm:$0xff] }
 0x74f   : > { %v3201_v16 = vmax.f32 %v3199_v30, %v3200_v18  ;;  %v3586_v30 = vld [vmem:[#allocation14 + $0x5a8] sm:$0xff]  ;;  %v3625_v39 = vld [vmem:[#allocation14 + $0x6e0] sm:$0xff] }
 0x750   : > { %v3222_v60 = vmax.f32 %v3220_v57, %v3221_v25  ;;  %v5469_v57 = vpack.c.bf16 %v3577_v3, %v3573_v62  ;;  %v5471_v18 = vpack.c.bf16 %v3586_v30, %v3582_v0  ;;  %v3581_v25 = vld [vmem:[#allocation14 + $0x580] sm:$0xff]  ;;  %v3630_v41 = vld [vmem:[#allocation14 + $0x708] sm:$0xff] }
 0x751   : > { %v3202_v48 = vrot.slane %v3201_v16, 2  ;;  %v3634_v2 = vld [vmem:[#allocation14 + $0x728] sm:$0xff]  ;;  %v3629_v7 = vld [vmem:[#allocation14 + $0x700] sm:$0xff] }
 0x752   : > { %v3223_v45 = vrot.slane %v3222_v60, 2  ;;  %v3633_v37 = vld [vmem:[#allocation14 + $0x720] sm:$0xff]  ;;  %v3638_v14 = vld [vmem:[#allocation14 + $0x748] sm:$0xff] }
 0x753   : > { %v3203_v26 = vmax.f32 %v3201_v16, %v3202_v48  ;;  %v3585_v16 = vld [vmem:[#allocation14 + $0x5a0] sm:$0xff]  ;;  %v3594_v48 = vld [vmem:[#allocation14 + $0x5e8] sm:$0xff] }
 0x754   : > { %v3224_v49 = vmax.f32 %v3222_v60, %v3223_v45  ;;  %v3590_v60 = vld [vmem:[#allocation14 + $0x5c8] sm:$0xff]  ;;  %v5473_v45 = vpack.c.bf16 %v3585_v16, %v3581_v25  ;;  %v3637_v23 = vld [vmem:[#allocation14 + $0x740] sm:$0xff] }
 0x755   : > { %v3204_v51 = vrot.slane %v3203_v26, 1  ;;  %v3642_v22 = vld [vmem:[#allocation14 + $0x768] sm:$0xff]  ;;  %v3641_v44 = vld [vmem:[#allocation14 + $0x760] sm:$0xff] }
 0x756   : > { %v3225_v33 = vrot.slane %v3224_v49, 1  ;;  %v3646_v53 = vld [vmem:[#allocation14 + $0x788] sm:$0xff]  ;;  %v3645_v62 = vld [vmem:[#allocation14 + $0x780] sm:$0xff] }
 0x757   : > { %v3205_v59 = vmax.f32 %v3203_v26, %v3204_v51  ;;  %v5475_v26 = vpack.c.bf16 %v3594_v48, %v3590_v60  ;;  %v3593_v51 = vld [vmem:[#allocation14 + $0x5e0] sm:$0xff]  ;;  %v3650_v61 = vld [vmem:[#allocation14 + $0x7a8] sm:$0xff]  ;;  %v3408_v60 = vld [vmem:[#allocation14 + $0x18] sm:$0xff] }
 0x758   : > { %v3226_v58 = vmax.f32 %v3224_v49, %v3225_v33  ;;  %v3589_v49 = vld [vmem:[#allocation14 + $0x5c0] sm:$0xff]  ;;  %v3598_v33 = vld [vmem:[#allocation14 + $0x608] sm:$0xff]  ;;  %v3412_v48 = vld [vmem:[#allocation14 + $0x38] sm:$0xff] }
 0x759   : > { %v3649_v3 = vld [vmem:[#allocation14 + $0x7a0] sm:$0xff]  ;;  %v3654_v0 = vld [vmem:[#allocation14 + $0x7c8] sm:$0xff] }
 0x75a   : > { %v3233_v15 = vcombine.low %v3205_v59, %v3226_v58  ;;  %v3602_v59 = vld [vmem:[#allocation14 + $0x628] sm:$0xff]  ;;  %v5477_v58 = vpack.c.bf16 %v3593_v51, %v3589_v49  ;;  %v3653_v25 = vld [vmem:[#allocation14 + $0x7c0] sm:$0xff]  ;;  %v3407_v49 = vld [vmem:[#allocation14 + $0x10] sm:$0xff] }
 0x75b   : > { %v3658_v30 = vld [vmem:[#allocation14 + $0x7e8] sm:$0xff]  ;;  %v3657_v16 = vld [vmem:[#allocation14 + $0x7e0] sm:$0xff]  ;;  %v3411_v51 = vld [vmem:[#allocation14 + $0x30] sm:$0xff] }
 0x75c   : > { %v3247_v35 = vrot.slane %v3233_v15, %v7887_v34  ;;  %v5479_v15 = vpack.c.bf16 %v3602_v59, %v3598_v33  ;;  %v3416_v33 = vld [vmem:[#allocation14 + $0x58] sm:$0xff] }
 0x75d   : > { %v3420_v59 = vld [vmem:[#allocation14 + $0x78] sm:$0xff] }
 0x75e   : > { %v3248_v21 = vcombine.low %v3240_v8, %v3247_v35  ;;  %v3597_v8 = vld [vmem:[#allocation14 + $0x600] sm:$0xff] }
 0x75f   : > { %v3601_v35 = vld [vmem:[#allocation14 + $0x620] sm:$0xff] }
 0x760   : > { %v3255_v4 = vrot.slane %v3248_v21, %v7887_v34  ;;  %v3606_v21 = vld [vmem:[#allocation14 + $0x648] sm:$0xff] }
 0x762   : > { %v3257_v38 = vmax.f32 %v3227_v20, %v3255_v4  ;;  %v3610_v20 = vld [vmem:[#allocation14 + $0x668] sm:$0xff]  ;;  %v5481_v4 = vpack.c.bf16 %v3601_v35, %v3597_v8  ;;  %v5515_v8 = vpack.c.bf16 %v3420_v59, %v3416_v33  ;;  %v3415_v35 = vld [vmem:[#allocation14 + $0x50] sm:$0xff]  ;;  %v4333_v59 = vld [vmem:[%s8730_s0 + $0x50] sm:$0xff] }
 0x763   : > { %v4331_v33 = vld [vmem:[%s8730_s0 + $0x40] sm:$0xff] }
 0x764   : > { %3262 = vst.msk [vmem:[#allocation2] sm:$0xf] %vm7920_vm2, %v3257_v38  ;;  %v5483_v38 = vpack.c.bf16 %v3610_v20, %v3606_v21  ;;  %v3419_v21 = vld [vmem:[#allocation14 + $0x70] sm:$0xff]  ;;  %v3424_v20 = vld [vmem:[#allocation14 + $0x98] sm:$0xff] }
 0x76b   : > { %v8013_v43 = vld [vmem:[#allocation2] sm:$0xf] }
 0x76c   : > { %v8017_v63 = vrot.slane %v8013_v43, %v7508_v10  ;;  %v8021_v1 = vrot.slane %v8013_v43, %v7511_v11  ;;  %v8026_v47 = vrot.slane %v8013_v43, %v7950_v27 }
 0x76e   : > { %3908 = vmatprep.mubr.f32.mxu1 %v8017_v63 }
 0x76f   : > { %3909 = vmatmul.mubr.f32.vlgmr.msra.gmra.mrb[16].mxu1 %v8021_v1 }
 0x770   : > { %5450 = vmatpush1.bf16.msra.mxu1 %v5449_v9  ;;  %3979 = vmatprep.mubr.f32.mxu1 %v8026_v47  ;;  %v5485_v9 = vpack.c.bf16 %v3609_v5, %v3605_v6  ;;  %v3423_v5 = vld [vmem:[#allocation14 + $0x90] sm:$0xff] }
 0x771   : > { %5452 = vmatprep.subr.bf16.mxu1 %v5451_v40  ;;  %v5487_v40 = vpack.c.bf16 %v3618_v24, %v3614_v50  ;;  %v3427_v50 = vld [vmem:[#allocation14 + $0xb0] sm:$0xff]  ;;  %v3432_v24 = vld [vmem:[#allocation14 + $0xd8] sm:$0xff] }
 0x774   : > { %5454 = vmatpush1.bf16.msra.mxu1 %v5453_v29  ;;  %v5489_v29 = vpack.c.bf16 %v3617_v13, %v3613_v32  ;;  %v3431_v32 = vld [vmem:[#allocation14 + $0xd0] sm:$0xff] }
 0x775   : > { %5456 = vmatprep.subr.bf16.mxu1 %v5455_v52  ;;  %v5491_v52 = vpack.c.bf16 %v3626_v36, %v3622_v12  ;;  %v3435_v13 = vld [vmem:[#allocation14 + $0xf0] sm:$0xff]  ;;  %v3440_v12 = vld [vmem:[#allocation14 + $0x118] sm:$0xff] }
 0x776   : > { %v3444_v36 = vld [vmem:[#allocation14 + $0x138] sm:$0xff] }
 0x778   : > { %5458 = vmatpush1.bf16.msra.mxu1 %v5457_v46  ;;  %v5493_v46 = vpack.c.bf16 %v3625_v39, %v3621_v42  ;;  %v3443_v42 = vld [vmem:[#allocation14 + $0x130] sm:$0xff]  ;;  %v3448_v39 = vld [vmem:[#allocation14 + $0x158] sm:$0xff] }
 0x779   : > { %5460 = vmatprep.subr.bf16.mxu1 %v5459_v19  ;;  %v5495_v19 = vpack.c.bf16 %v3634_v2, %v3630_v41  ;;  %v3452_v41 = vld [vmem:[#allocation14 + $0x178] sm:$0xff] }
 0x77c   : > { %5462 = vmatpush1.bf16.msra.mxu1 %v5461_v56  ;;  %v5497_v56 = vpack.c.bf16 %v3633_v37, %v3629_v7  ;;  %v3451_v7 = vld [vmem:[#allocation14 + $0x170] sm:$0xff]  ;;  %v3456_v37 = vld [vmem:[#allocation14 + $0x198] sm:$0xff] }
 0x77d   : > { %5464 = vmatprep.subr.bf16.mxu1 %v5463_v31  ;;  %v5499_v31 = vpack.c.bf16 %v3642_v22, %v3638_v14  ;;  %v3460_v14 = vld [vmem:[#allocation14 + $0x1b8] sm:$0xff]  ;;  %v3455_v22 = vld [vmem:[#allocation14 + $0x190] sm:$0xff] }
 0x780   : > { %5466 = vmatpush1.bf16.msra.mxu1 %v5465_v55  ;;  %v5501_v55 = vpack.c.bf16 %v3641_v44, %v3637_v23  ;;  %v4326_v23 = vld [vmem:[%s8730_s0 + $0x18] sm:$0xff]  ;;  %v4323_v44 = vld [vmem:[%s8730_s0] sm:$0xff] }
 0x781   : > { %5468 = vmatprep.subr.bf16.mxu1 %v5467_v28  ;;  %v5503_v28 = vpack.c.bf16 %v3650_v61, %v3646_v53 }
 0x784   : > { %5470 = vmatpush1.bf16.msra.mxu1 %v5469_v57  ;;  %v5505_v57 = vpack.c.bf16 %v3649_v3, %v3645_v62  ;;  %v4330_v62 = vld [vmem:[%s8730_s0 + $0x38] sm:$0xff]  ;;  %v5535_v3 = vpack.c.bf16 %v3460_v14, %v3456_v37  ;;  %v3488_v37 = vld [vmem:[#allocation14 + $0x298] sm:$0xff] }
 0x785   : > { %5472 = vmatprep.subr.bf16.mxu1 %v5471_v18  ;;  %v5507_v18 = vpack.c.bf16 %v3658_v30, %v3654_v0  ;;  %v3492_v14 = vld [vmem:[#allocation14 + $0x2b8] sm:$0xff] }
 0x788   : > { %5474 = vmatpush1.bf16.msra.mxu1 %v5473_v45  ;;  %v5509_v45 = vpack.c.bf16 %v3657_v16, %v3653_v25  ;;  %v4332_v25 = vld [vmem:[%s8730_s0 + $0x48] sm:$0xff] }
 0x789   : > { %5476 = vmatprep.subr.bf16.mxu1 %v5475_v26  ;;  %v5511_v26 = vpack.c.bf16 %v3412_v48, %v3408_v60  ;;  %v3464_v16 = vld [vmem:[#allocation14 + $0x1d8] sm:$0xff]  ;;  %v4334_v48 = vld [vmem:[%s8730_s0 + $0x58] sm:$0xff] }
 0x78a   : > { %v3468_v60 = vld [vmem:[#allocation14 + $0x1f8] sm:$0xff] }
 0x78c   : > { %5478 = vmatpush1.bf16.msra.mxu1 %v5477_v58  ;;  %v5513_v58 = vpack.c.bf16 %v3411_v51, %v3407_v49  ;;  %v3463_v49 = vld [vmem:[#allocation14 + $0x1d0] sm:$0xff]  ;;  %v5663_v51 = vpack.c.bf16 %v4334_v48, %v4332_v25 }
 0x78d   : > { %5480 = vmatprep.subr.bf16.mxu1 %v5479_v15  ;;  %v8032_v15 = vrot.slane %v8013_v43, %v7523_v17  ;;  %v5521_v43 = vpack.c.bf16 %v3427_v50, %v3423_v5  ;;  %v3471_v5 = vld [vmem:[#allocation14 + $0x210] sm:$0xff] }
 0x790   : > { %5482 = vmatpush1.bf16.msra.mxu1 %v5481_v4  ;;  %v3428_v4 = vld [vmem:[#allocation14 + $0xb8] sm:$0xff] }
 0x791   : > { %5484 = vmatprep.subr.bf16.mxu1 %v5483_v38  ;;  %v5517_v38 = vpack.c.bf16 %v3419_v21, %v3415_v35  ;;  %v5519_v6 = vpack.c.bf16 %v3428_v4, %v3424_v20  ;;  %v4336_v35 = vld [vmem:[%s8730_s0 + $0x68] sm:$0xff]  ;;  %v4338_v21 = vld [vmem:[%s8730_s0 + $0x78] sm:$0xff] }
 0x792   : > { %v3472_v20 = vld [vmem:[#allocation14 + $0x218] sm:$0xff]  ;;  %v5667_v50 = vpack.c.bf16 %v4338_v21, %v4336_v35  ;;  %v4351_v21 = vld [vmem:[%s8730_s0 + $0xe0] sm:$0xff] }
 0x793   : > { %v3476_v4 = vld [vmem:[#allocation14 + $0x238] sm:$0xff] }
 0x794   : > { %5486 = vmatpush1.bf16.msra.mxu1 %v5485_v9  ;;  %v3436_v9 = vld [vmem:[#allocation14 + $0xf8] sm:$0xff] }
 0x795   : > { %5488 = vmatprep.subr.bf16.mxu1 %v5487_v40  ;;  %v5523_v40 = vpack.c.bf16 %v3436_v9, %v3432_v24  ;;  %v4335_v24 = vld [vmem:[%s8730_s0 + $0x60] sm:$0xff]  ;;  %v4337_v9 = vld [vmem:[%s8730_s0 + $0x70] sm:$0xff] }
 0x798   : > { %5490 = vmatpush1.bf16.msra.mxu1 %v5489_v29  ;;  %v5525_v29 = vpack.c.bf16 %v3435_v13, %v3431_v32  ;;  %v4340_v32 = vld [vmem:[%s8730_s0 + $0x88] sm:$0xff]  ;;  %v4342_v13 = vld [vmem:[%s8730_s0 + $0x98] sm:$0xff] }
 0x799   : > { %5492 = vmatprep.subr.bf16.mxu1 %v5491_v52  ;;  %v5527_v52 = vpack.c.bf16 %v3444_v36, %v3440_v12  ;;  %v3480_v12 = vld [vmem:[#allocation14 + $0x258] sm:$0xff] }
 0x79a   : > { %v3484_v36 = vld [vmem:[#allocation14 + $0x278] sm:$0xff] }
 0x79c   : > { %5494 = vmatpush1.bf16.msra.mxu1 %v5493_v46  ;;  %v5531_v46 = vpack.c.bf16 %v3452_v41, %v3448_v39  ;;  %v4339_v39 = vld [vmem:[%s8730_s0 + $0x80] sm:$0xff]  ;;  %v4341_v41 = vld [vmem:[%s8730_s0 + $0x90] sm:$0xff] }
 0x79d   : > { %5496 = vmatprep.subr.bf16.mxu1 %v5495_v19  ;;  %v3447_v19 = vld [vmem:[#allocation14 + $0x150] sm:$0xff] }
 0x79e   : > { %v5533_v53 = vpack.c.bf16 %v3451_v7, %v3447_v19  ;;  %v4344_v19 = vld [vmem:[%s8730_s0 + $0xa8] sm:$0xff]  ;;  %v4346_v7 = vld [vmem:[%s8730_s0 + $0xb8] sm:$0xff] }
 0x7a0   : > { %5498 = vmatpush1.bf16.msra.mxu1 %v5497_v56  ;;  %v3459_v56 = vld [vmem:[#allocation14 + $0x1b0] sm:$0xff] }
 0x7a1   : > { %5500 = vmatprep.subr.bf16.mxu1 %v5499_v31  ;;  %v4324_v31 = vld [vmem:[%s8730_s0 + $0x8] sm:$0xff] }
 0x7a2   : > { %v5655_v61 = vpack.c.bf16 %v4326_v23, %v4324_v31  ;;  %v3487_v31 = vld [vmem:[#allocation14 + $0x290] sm:$0xff]  ;;  %v5675_v23 = vpack.c.bf16 %v4346_v7, %v4344_v19 }
 0x7a3   : > { %v4359_v7 = vld [vmem:[%s8730_s0 + $0x120] sm:$0xff] }
 0x7a4   : > { %5502 = vmatpush1.bf16.msra.mxu1 %v5501_v55  ;;  %v4325_v55 = vld [vmem:[%s8730_s0 + $0x10] sm:$0xff]  ;;  %5656 = vmatprep.subr.bf16.mxu0 %v5655_v61  ;;  %v5551_v61 = vpack.c.bf16 %v3492_v14, %v3488_v37 }
 0x7a5   : > { %5504 = vmatprep.subr.bf16.mxu1 %v5503_v28  ;;  %v4328_v28 = vld [vmem:[%s8730_s0 + $0x28] sm:$0xff]  ;;  %v5657_v0 = vpack.c.bf16 %v4325_v55, %v4323_v44  ;;  %v4343_v44 = vld [vmem:[%s8730_s0 + $0xa0] sm:$0xff]  ;;  %v4361_v37 = vld [vmem:[%s8730_s0 + $0x130] sm:$0xff] }
 0x7a6   : > { %v5659_v30 = vpack.c.bf16 %v4330_v62, %v4328_v28  ;;  %v3491_v55 = vld [vmem:[#allocation14 + $0x2b0] sm:$0xff]  ;;  %v4350_v62 = vld [vmem:[%s8730_s0 + $0xd8] sm:$0xff] }
 0x7a7   : > { %5658 = vmatpush1.bf16.msra.mxu0 %v5657_v0  ;;  %v4348_v28 = vld [vmem:[%s8730_s0 + $0xc8] sm:$0xff] }
 0x7a8   : > { %5506 = vmatpush1.bf16.msra.mxu1 %v5505_v57  ;;  %v4327_v57 = vld [vmem:[%s8730_s0 + $0x20] sm:$0xff]  ;;  %5660 = vmatprep.subr.bf16.mxu0 %v5659_v30  ;;  %v3500_v0 = vld [vmem:[#allocation14 + $0x2f8] sm:$0xff]  ;;  %v5679_v25 = vpack.c.bf16 %v4350_v62, %v4348_v28 }
 0x7a9   : > { %5508 = vmatprep.subr.bf16.mxu1 %v5507_v18  ;;  %v4329_v18 = vld [vmem:[%s8730_s0 + $0x30] sm:$0xff]  ;;  %v4363_v62 = vld [vmem:[%s8730_s0 + $0x140] sm:$0xff] }
 0x7ac   : > { %5510 = vmatpush1.bf16.msra.mxu1 %v5509_v45  ;;  %v5661_v45 = vpack.c.bf16 %v4329_v18, %v4327_v57  ;;  %v5553_v57 = vpack.c.bf16 %v3491_v55, %v3487_v31  ;;  %v3495_v18 = vld [vmem:[#allocation14 + $0x2d0] sm:$0xff]  ;;  %v4366_v31 = vld [vmem:[%s8730_s0 + $0x158] sm:$0xff] }
 0x7ad   : > { %5512 = vmatprep.subr.bf16.mxu1 %v5511_v26  ;;  %v5537_v26 = vpack.c.bf16 %v3459_v56, %v3455_v22  ;;  %v5673_v22 = vpack.c.bf16 %v4341_v41, %v4339_v39  ;;  %v3524_v39 = vld [vmem:[#allocation14 + $0x3b8] sm:$0xff]  ;;  %v3527_v55 = vld [vmem:[#allocation14 + $0x3d0] sm:$0xff] }
 0x7ae   : > { %5662 = vmatpush1.bf16.msra.mxu0 %v5661_v45  ;;  %v3499_v45 = vld [vmem:[#allocation14 + $0x2f0] sm:$0xff] }
 0x7af   : > { %3980 = vmatmul.mubr.f32.vlgmr.msra.gmra.mrb[16].mxu1 %v8032_v15  ;;  %5664 = vmatprep.subr.bf16.mxu0 %v5663_v51  ;;  %v3504_v51 = vld [vmem:[#allocation14 + $0x318] sm:$0xff] }
 0x7b0   : > { %5514 = vmatpush1.bf16.msra.mxu1 %v5513_v58  ;;  %4050 = vmatprep.mubr.f32.mxu1 %v8017_v63  ;;  %v3439_v63 = vld [vmem:[#allocation14 + $0x110] sm:$0xff]  ;;  %v5539_v58 = vpack.c.bf16 %v3468_v60, %v3464_v16  ;;  %v4349_v60 = vld [vmem:[%s8730_s0 + $0xd0] sm:$0xff] }
 0x7b1   : > { %5516 = vmatprep.subr.bf16.mxu1 %v5515_v8  ;;  %v5529_v2 = vpack.c.bf16 %v3443_v42, %v3439_v63  ;;  %v3467_v8 = vld [vmem:[#allocation14 + $0x1f0] sm:$0xff]  ;;  %v5671_v42 = vpack.c.bf16 %v4342_v13, %v4340_v32 }
 0x7b2   : > { %v3479_v63 = vld [vmem:[#allocation14 + $0x250] sm:$0xff] }
 0x7b3   : > { %v4347_v16 = vld [vmem:[%s8730_s0 + $0xc0] sm:$0xff] }
 0x7b4   : > { %5518 = vmatpush1.bf16.msra.mxu1 %v5517_v38  ;;  %v5665_v38 = vpack.c.bf16 %v4333_v59, %v4331_v33  ;;  %v3508_v33 = vld [vmem:[#allocation14 + $0x338] sm:$0xff]  ;;  %v5681_v59 = vpack.c.bf16 %v4349_v60, %v4347_v16  ;;  %v4355_v13 = vld [vmem:[%s8730_s0 + $0x100] sm:$0xff] }
 0x7b5   : > { %5520 = vmatprep.subr.bf16.mxu1 %v5519_v6  ;;  %v5541_v6 = vpack.c.bf16 %v3467_v8, %v3463_v49  ;;  %v4354_v49 = vld [vmem:[%s8730_s0 + $0xf8] sm:$0xff]  ;;  %v3503_v8 = vld [vmem:[#allocation14 + $0x310] sm:$0xff]  ;;  %v3540_v16 = vld [vmem:[#allocation14 + $0x438] sm:$0xff] }
 0x7b6   : > { %5666 = vmatpush1.bf16.msra.mxu0 %v5665_v38  ;;  %v3507_v38 = vld [vmem:[#allocation14 + $0x330] sm:$0xff] }
 0x7b7   : > { %5668 = vmatprep.subr.bf16.mxu0 %v5667_v50  ;;  %v3512_v50 = vld [vmem:[#allocation14 + $0x358] sm:$0xff] }
 0x7b8   : > { %5522 = vmatpush1.bf16.msra.mxu1 %v5521_v43  ;;  %v5543_v43 = vpack.c.bf16 %v3476_v4, %v3472_v20  ;;  %v4353_v20 = vld [vmem:[%s8730_s0 + $0xf0] sm:$0xff]  ;;  %v5559_v4 = vpack.c.bf16 %v3508_v33, %v3504_v51  ;;  %v3535_v33 = vld [vmem:[#allocation14 + $0x410] sm:$0xff] }
 0x7b9   : > { %5524 = vmatprep.subr.bf16.mxu1 %v5523_v40  ;;  %v3475_v40 = vld [vmem:[#allocation14 + $0x230] sm:$0xff] }
 0x7bc   : > { %5526 = vmatpush1.bf16.msra.mxu1 %v5525_v29  ;;  %v5669_v29 = vpack.c.bf16 %v4337_v9, %v4335_v24  ;;  %v3516_v24 = vld [vmem:[#allocation14 + $0x378] sm:$0xff]  ;;  %v5685_v9 = vpack.c.bf16 %v4353_v20, %v4351_v21  ;;  %v4374_v21 = vld [vmem:[%s8730_s0 + $0x198] sm:$0xff] }
 0x7bd   : > { %5528 = vmatprep.subr.bf16.mxu1 %v5527_v52  ;;  %v5545_v52 = vpack.c.bf16 %v3475_v40, %v3471_v5  ;;  %v4358_v5 = vld [vmem:[%s8730_s0 + $0x118] sm:$0xff]  ;;  %v3511_v40 = vld [vmem:[#allocation14 + $0x350] sm:$0xff] }
 0x7be   : > { %5670 = vmatpush1.bf16.msra.mxu0 %v5669_v29  ;;  %v3515_v29 = vld [vmem:[#allocation14 + $0x370] sm:$0xff] }
 0x7bf   : > { %5672 = vmatprep.subr.bf16.mxu0 %v5671_v42  ;;  %v3520_v42 = vld [vmem:[#allocation14 + $0x398] sm:$0xff] }
 0x7c0   : > { %5530 = vmatpush1.bf16.msra.mxu1 %v5529_v2  ;;  %v5547_v2 = vpack.c.bf16 %v3484_v36, %v3480_v12  ;;  %v4357_v12 = vld [vmem:[%s8730_s0 + $0x110] sm:$0xff]  ;;  %v5563_v36 = vpack.c.bf16 %v3516_v24, %v3512_v50  ;;  %v5567_v14 = vpack.c.bf16 %v3524_v39, %v3520_v42  ;;  %v3547_v24 = vld [vmem:[#allocation14 + $0x470] sm:$0xff] }
 0x7c1   : > { %5532 = vmatprep.subr.bf16.mxu1 %v5531_v46  ;;  %v3483_v46 = vld [vmem:[#allocation14 + $0x270] sm:$0xff]  ;;  %v5689_v41 = vpack.c.bf16 %v4357_v12, %v4355_v13  ;;  %v3556_v13 = vld [vmem:[#allocation14 + $0x4b8] sm:$0xff] }
 0x7c2   : > { %v5549_v56 = vpack.c.bf16 %v3483_v46, %v3479_v63  ;;  %5674 = vmatpush1.bf16.msra.mxu0 %v5673_v22  ;;  %v4362_v63 = vld [vmem:[%s8730_s0 + $0x138] sm:$0xff]  ;;  %v3519_v46 = vld [vmem:[#allocation14 + $0x390] sm:$0xff]  ;;  %v4377_v42 = vld [vmem:[%s8730_s0 + $0x1b0] sm:$0xff] }
 0x7c3   : > { %5676 = vmatprep.subr.bf16.mxu0 %v5675_v23  ;;  %v3523_v22 = vld [vmem:[#allocation14 + $0x3b0] sm:$0xff]  ;;  %v3528_v23 = vld [vmem:[#allocation14 + $0x3d8] sm:$0xff] }
 0x7c4   : > { %5534 = vmatpush1.bf16.msra.mxu1 %v5533_v53  ;;  %v4345_v53 = vld [vmem:[%s8730_s0 + $0xb0] sm:$0xff] }
 0x7c5   : > { %5536 = vmatprep.subr.bf16.mxu1 %v5535_v3  ;;  %v3496_v3 = vld [vmem:[#allocation14 + $0x2d8] sm:$0xff]  ;;  %v5677_v30 = vpack.c.bf16 %v4345_v53, %v4343_v44  ;;  %v5693_v53 = vpack.c.bf16 %v4361_v37, %v4359_v7 }
 0x7c6   : > { %v5555_v48 = vpack.c.bf16 %v3500_v0, %v3496_v3  ;;  %v3532_v44 = vld [vmem:[#allocation14 + $0x3f8] sm:$0xff] }
 0x7c7   : > { %5678 = vmatpush1.bf16.msra.mxu0 %v5677_v30  ;;  %v4365_v3 = vld [vmem:[%s8730_s0 + $0x150] sm:$0xff]  ;;  %v5571_v0 = vpack.c.bf16 %v3532_v44, %v3528_v23  ;;  %v3531_v30 = vld [vmem:[#allocation14 + $0x3f0] sm:$0xff] }
 0x7c8   : > { %5538 = vmatpush1.bf16.msra.mxu1 %v5537_v26  ;;  %v4352_v26 = vld [vmem:[%s8730_s0 + $0xe8] sm:$0xff]  ;;  %5680 = vmatprep.subr.bf16.mxu0 %v5679_v25  ;;  %v5697_v60 = vpack.c.bf16 %v4365_v3, %v4363_v62 }
 0x7c9   : > { %5540 = vmatprep.subr.bf16.mxu1 %v5539_v58  ;;  %v5557_v58 = vpack.c.bf16 %v3499_v45, %v3495_v18  ;;  %v5683_v35 = vpack.c.bf16 %v4354_v49, %v4352_v26  ;;  %v4370_v18 = vld [vmem:[%s8730_s0 + $0x178] sm:$0xff]  ;;  %v3536_v25 = vld [vmem:[#allocation14 + $0x418] sm:$0xff]  ;;  %v4367_v26 = vld [vmem:[%s8730_s0 + $0x160] sm:$0xff] }
 0x7ca   : > { %v4369_v49 = vld [vmem:[%s8730_s0 + $0x170] sm:$0xff]  ;;  %v5575_v51 = vpack.c.bf16 %v3540_v16, %v3536_v25  ;;  %v3563_v23 = vld [vmem:[#allocation14 + $0x4f0] sm:$0xff] }
 0x7cb   : > { %5682 = vmatpush1.bf16.msra.mxu0 %v5681_v59  ;;  %v3539_v59 = vld [vmem:[#allocation14 + $0x430] sm:$0xff]  ;;  %v5701_v20 = vpack.c.bf16 %v4369_v49, %v4367_v26  ;;  %v3568_v44 = vld [vmem:[#allocation14 + $0x518] sm:$0xff] }
 0x7cc   : > { %5542 = vmatpush1.bf16.msra.mxu1 %v5541_v6  ;;  %v4356_v6 = vld [vmem:[%s8730_s0 + $0x108] sm:$0xff]  ;;  %5684 = vmatprep.subr.bf16.mxu0 %v5683_v35 }
 0x7cd   : > { %5544 = vmatprep.subr.bf16.mxu1 %v5543_v43  ;;  %v5561_v43 = vpack.c.bf16 %v3507_v38, %v3503_v8  ;;  %v5687_v32 = vpack.c.bf16 %v4358_v5, %v4356_v6  ;;  %v3548_v8 = vld [vmem:[#allocation14 + $0x478] sm:$0xff]  ;;  %v3543_v38 = vld [vmem:[#allocation14 + $0x450] sm:$0xff] }
 0x7ce   : > { %v4372_v35 = vld [vmem:[%s8730_s0 + $0x188] sm:$0xff]  ;;  %v4371_v6 = vld [vmem:[%s8730_s0 + $0x180] sm:$0xff]  ;;  %v4373_v5 = vld [vmem:[%s8730_s0 + $0x190] sm:$0xff] }
 0x7cf   : > { %5686 = vmatpush1.bf16.msra.mxu0 %v5685_v9  ;;  %v5703_v9 = vpack.c.bf16 %v4374_v21, %v4372_v35  ;;  %v5705_v12 = vpack.c.bf16 %v4373_v5, %v4371_v6  ;;  %v3567_v62 = vld [vmem:[#allocation14 + $0x510] sm:$0xff] }
 0x7d0   : > { %5546 = vmatpush1.bf16.msra.mxu1 %v5545_v52  ;;  %v4360_v52 = vld [vmem:[%s8730_s0 + $0x128] sm:$0xff]  ;;  %5688 = vmatprep.subr.bf16.mxu0 %v5687_v32 }
 0x7d1   : > { %5548 = vmatprep.subr.bf16.mxu1 %v5547_v2  ;;  %v5565_v2 = vpack.c.bf16 %v3515_v29, %v3511_v40  ;;  %v5691_v19 = vpack.c.bf16 %v4362_v63, %v4360_v52  ;;  %v4378_v40 = vld [vmem:[%s8730_s0 + $0x1b8] sm:$0xff]  ;;  %v3552_v32 = vld [vmem:[#allocation14 + $0x498] sm:$0xff]  ;;  %v3551_v29 = vld [vmem:[#allocation14 + $0x490] sm:$0xff] }
 0x7d2   : > { %v4375_v63 = vld [vmem:[%s8730_s0 + $0x1a0] sm:$0xff]  ;;  %v5583_v39 = vpack.c.bf16 %v3556_v13, %v3552_v32 }
 0x7d3   : > { %5690 = vmatpush1.bf16.msra.mxu0 %v5689_v41  ;;  %v3555_v41 = vld [vmem:[#allocation14 + $0x4b0] sm:$0xff] }
 0x7d4   : > { %5550 = vmatpush1.bf16.msra.mxu1 %v5549_v56  ;;  %v4364_v56 = vld [vmem:[%s8730_s0 + $0x148] sm:$0xff]  ;;  %5692 = vmatprep.subr.bf16.mxu0 %v5691_v19  ;;  %v5709_v19 = vpack.c.bf16 %v4377_v42, %v4375_v63  ;;  %v5585_v7 = vpack.c.bf16 %v3555_v41, %v3551_v29 }
 0x7d5   : > { %5552 = vmatprep.subr.bf16.mxu1 %v5551_v61  ;;  %v5569_v61 = vpack.c.bf16 %v3523_v22, %v3519_v46  ;;  %v5695_v28 = vpack.c.bf16 %v4366_v31, %v4364_v56  ;;  %v3564_v46 = vld [vmem:[#allocation14 + $0x4f8] sm:$0xff]  ;;  %v3559_v31 = vld [vmem:[#allocation14 + $0x4d0] sm:$0xff] }
 0x7d6   : > { %v4381_v22 = vld [vmem:[%s8730_s0 + $0x1d0] sm:$0xff]  ;;  %v3571_v3 = vld [vmem:[#allocation14 + $0x530] sm:$0xff] }
 0x7d7   : > { %5694 = vmatpush1.bf16.msra.mxu0 %v5693_v53  ;;  %v3572_v53 = vld [vmem:[#allocation14 + $0x538] sm:$0xff]  ;;  %v3575_v25 = vld [vmem:[#allocation14 + $0x550] sm:$0xff] }
 0x7d8   : > { %5554 = vmatpush1.bf16.msra.mxu1 %v5553_v57  ;;  %v4368_v57 = vld [vmem:[%s8730_s0 + $0x168] sm:$0xff]  ;;  %5696 = vmatprep.subr.bf16.mxu0 %v5695_v28  ;;  %v5591_v28 = vpack.c.bf16 %v3572_v53, %v3568_v44 }
 0x7d9   : > { %5556 = vmatprep.subr.bf16.mxu1 %v5555_v48  ;;  %v5573_v48 = vpack.c.bf16 %v3531_v30, %v3527_v55  ;;  %v5699_v45 = vpack.c.bf16 %v4370_v18, %v4368_v57  ;;  %v5589_v55 = vpack.c.bf16 %v3563_v23, %v3559_v31  ;;  %v3580_v30 = vld [vmem:[#allocation14 + $0x578] sm:$0xff]  ;;  %v5593_v57 = vpack.c.bf16 %v3571_v3, %v3567_v62  ;;  %v3579_v16 = vld [vmem:[#allocation14 + $0x570] sm:$0xff] }
 0x7da   : > { %v3583_v49 = vld [vmem:[#allocation14 + $0x590] sm:$0xff]  ;;  %v3628_v41 = vld [vmem:[#allocation14 + $0x6f8] sm:$0xff] }
 0x7db   : > { %5698 = vmatpush1.bf16.msra.mxu0 %v5697_v60  ;;  %v3584_v60 = vld [vmem:[#allocation14 + $0x598] sm:$0xff]  ;;  %v3591_v35 = vld [vmem:[#allocation14 + $0x5d0] sm:$0xff] }
 0x7dc   : > { %5558 = vmatpush1.bf16.msra.mxu1 %v5557_v58  ;;  %v3544_v58 = vld [vmem:[#allocation14 + $0x458] sm:$0xff]  ;;  %5700 = vmatprep.subr.bf16.mxu0 %v5699_v45  ;;  %v5597_v45 = vpack.c.bf16 %v3579_v16, %v3575_v25  ;;  %v3595_v21 = vld [vmem:[#allocation14 + $0x5f0] sm:$0xff] }
 0x7dd   : > { %5560 = vmatprep.subr.bf16.mxu1 %v5559_v4  ;;  %v5577_v4 = vpack.c.bf16 %v3539_v59, %v3535_v33  ;;  %v5579_v50 = vpack.c.bf16 %v3548_v8, %v3544_v58  ;;  %v3592_v33 = vld [vmem:[#allocation14 + $0x5d8] sm:$0xff]  ;;  %v3599_v5 = vld [vmem:[#allocation14 + $0x610] sm:$0xff] }
 0x7de   : > { %v3596_v59 = vld [vmem:[#allocation14 + $0x5f8] sm:$0xff]  ;;  %v3607_v32 = vld [vmem:[#allocation14 + $0x650] sm:$0xff] }
 0x7df   : > { %5702 = vmatpush1.bf16.msra.mxu0 %v5701_v20  ;;  %v5603_v8 = vpack.c.bf16 %v3596_v59, %v3592_v33  ;;  %v3600_v20 = vld [vmem:[#allocation14 + $0x618] sm:$0xff]  ;;  %v3611_v13 = vld [vmem:[#allocation14 + $0x670] sm:$0xff] }
 0x7e0   : > { %5562 = vmatpush1.bf16.msra.mxu1 %v5561_v43  ;;  %v4376_v43 = vld [vmem:[%s8730_s0 + $0x1a8] sm:$0xff]  ;;  %5704 = vmatprep.subr.bf16.mxu0 %v5703_v9  ;;  %v5613_v29 = vpack.c.bf16 %v3611_v13, %v3607_v32 }
 0x7e1   : > { %5564 = vmatprep.subr.bf16.mxu1 %v5563_v36  ;;  %v5581_v36 = vpack.c.bf16 %v3547_v24, %v3543_v38  ;;  %v5707_v52 = vpack.c.bf16 %v4378_v40, %v4376_v43  ;;  %v5605_v38 = vpack.c.bf16 %v3595_v21, %v3591_v35  ;;  %v3608_v24 = vld [vmem:[#allocation14 + $0x658] sm:$0xff]  ;;  %v3615_v63 = vld [vmem:[#allocation14 + $0x690] sm:$0xff] }
 0x7e2   : > { %v3612_v9 = vld [vmem:[#allocation14 + $0x678] sm:$0xff]  ;;  %v3619_v42 = vld [vmem:[#allocation14 + $0x6b0] sm:$0xff] }
 0x7e3   : > { %5706 = vmatpush1.bf16.msra.mxu0 %v5705_v12  ;;  %v5611_v40 = vpack.c.bf16 %v3612_v9, %v3608_v24  ;;  %v3616_v12 = vld [vmem:[#allocation14 + $0x698] sm:$0xff]  ;;  %v3631_v23 = vld [vmem:[#allocation14 + $0x710] sm:$0xff]  ;;  %v4133_v24 = vld [vmem:[#allocation17 + $0x28] sm:$0xff] }
 0x7e4   : > { %5566 = vmatpush1.bf16.msra.mxu1 %v5565_v2  ;;  %v3560_v2 = vld [vmem:[#allocation14 + $0x4d8] sm:$0xff]  ;;  %5708 = vmatprep.subr.bf16.mxu0 %v5707_v52  ;;  %v3635_v44 = vld [vmem:[#allocation14 + $0x730] sm:$0xff] }
 0x7e5   : > { %5568 = vmatprep.subr.bf16.mxu1 %v5567_v14  ;;  %v4379_v14 = vld [vmem:[%s8730_s0 + $0x1c0] sm:$0xff]  ;;  %v5587_v56 = vpack.c.bf16 %v3564_v46, %v3560_v2  ;;  %v3270_v53 = vld [vmem:[#allocation11] sm:$0x7] }
 0x7e6   : > { %v3623_v46 = vld [vmem:[#allocation14 + $0x6d0] sm:$0xff]  ;;  %v3648_v25 = vld [vmem:[#allocation14 + $0x798] sm:$0xff] }
 0x7e7   : > { %5710 = vmatpush1.bf16.msra.mxu0 %v5709_v19  ;;  %v3627_v19 = vld [vmem:[#allocation14 + $0x6f0] sm:$0xff]  ;;  %v3652_v16 = vld [vmem:[#allocation14 + $0x7b8] sm:$0xff] }
 0x7e8   : > { %5570 = vmatpush1.bf16.msra.mxu1 %v5569_v61  ;;  %v5713_v61 = vpack.c.bf16 %v4381_v22, %v4379_v14  ;;  %v5621_v14 = vpack.c.bf16 %v3627_v19, %v3623_v46  ;;  %v3651_v33 = vld [vmem:[#allocation14 + $0x7b0] sm:$0xff]  ;;  %v3656_v59 = vld [vmem:[#allocation14 + $0x7d8] sm:$0xff] }
 0x7e9   : > { %5572 = vmatprep.subr.bf16.mxu1 %v5571_v0  ;;  %v3576_v0 = vld [vmem:[#allocation14 + $0x558] sm:$0xff] }
 0x7ea   : > { %v5595_v18 = vpack.c.bf16 %v3580_v30, %v3576_v0  ;;  %v3639_v30 = vld [vmem:[#allocation14 + $0x750] sm:$0xff]  ;;  %v4135_v46 = vld [vmem:[#allocation17 + $0x38] sm:$0xff] }
 0x7ec   : > { %5574 = vmatpush1.bf16.msra.mxu1 %v5573_v48  ;;  %v3588_v48 = vld [vmem:[#allocation14 + $0x5b8] sm:$0xff] }
 0x7ed   : > { %5576 = vmatprep.subr.bf16.mxu1 %v5575_v51  ;;  %v5599_v26 = vpack.c.bf16 %v3588_v48, %v3584_v60  ;;  %v3587_v51 = vld [vmem:[#allocation14 + $0x5b0] sm:$0xff] }
 0x7ee   : > { %v5601_v58 = vpack.c.bf16 %v3587_v51, %v3583_v49  ;;  %v5631_v49 = vpack.c.bf16 %v3652_v16, %v3648_v25  ;;  %v3647_v51 = vld [vmem:[#allocation14 + $0x790] sm:$0xff]  ;;  %v4293_v16 = vld [vmem:[#allocation18] sm:$0xf] }
 0x7ef   : > { %4051 = vmatmul.mubr.f32.vlgmr.msra.gmra.mrb[18].mxu1 %v8021_v1  ;;  %v4380_v1 = vld [vmem:[%s8730_s0 + $0x1c8] sm:$0xff] }
 0x7f0   : > { %5578 = vmatpush1.bf16.msra.mxu1 %v5577_v4  ;;  %4121 = vmatprep.mubr.f32.mxu1 %v8026_v47  ;;  %v4382_v47 = vld [vmem:[%s8730_s0 + $0x1d8] sm:$0xff]  ;;  %v3604_v4 = vld [vmem:[#allocation14 + $0x638] sm:$0xff] }
 0x7f1   : > { %5580 = vmatprep.subr.bf16.mxu1 %v5579_v50  ;;  %v5711_v37 = vpack.c.bf16 %v4382_v47, %v4380_v1  ;;  %v5607_v6 = vpack.c.bf16 %v3604_v4, %v3600_v20  ;;  %v3603_v50 = vld [vmem:[#allocation14 + $0x630] sm:$0xff]  ;;  %v3352_v1 = vpop.permute.xlu0 %3351  ;;  %v5617_v47 = vpack.c.bf16 %v3619_v42, %v3615_v63 }
 0x7f2   : > { %v5609_v43 = vpack.c.bf16 %v3603_v50, %v3599_v5  ;;  %v3338_v5 = vld [vmem:[#allocation12] sm:$0x1]  ;;  %v4129_v50 = vld [vmem:[#allocation17 + $0x8] sm:$0xff] }
 0x7f3   : > { %5712 = vmatprep.subr.bf16.mxu0 %v5711_v37  ;;  %v3636_v37 = vld [vmem:[#allocation14 + $0x738] sm:$0xff]  ;;  %v5639_v13 = vpack.c.bf16 %v4133_v24, %v4129_v50  ;;  %v4310_v50 = vrot.slane %v4293_v16, %v7950_v27  ;;  %v4395_v27 = vld [vmem:[%s8730_s0 + $0x240] sm:$0xff] }
 0x7f4   : > { %5582 = vmatpush1.bf16.msra.mxu1 %v5581_v36  ;;  %5714 = vmatpush1.bf16.msra.mxu0 %v5713_v61  ;;  %v3620_v36 = vld [vmem:[#allocation14 + $0x6b8] sm:$0xff] }
 0x7f5   : > { %5584 = vmatprep.subr.bf16.mxu1 %v5583_v39  ;;  %v5615_v52 = vpack.c.bf16 %v3620_v36, %v3616_v12  ;;  %v3624_v39 = vld [vmem:[#allocation14 + $0x6d8] sm:$0xff]  ;;  %v3379_v22 = vpop.permute.xlu0 %3378  ;;  %v4128_v12 = vld [vmem:[#allocation17] sm:$0xff] }
 0x7f6   : > { %v5619_v2 = vpack.c.bf16 %v3628_v41, %v3624_v39  ;;  %v3640_v61 = vld [vmem:[#allocation14 + $0x758] sm:$0xff]  ;;  %v3384_v3 = vrot.slane %v3379_v22, %v7511_v11  ;;  %v4132_v36 = vld [vmem:[#allocation17 + $0x20] sm:$0xff] }
 0x7f7   : > { %v5641_v63 = vpack.c.bf16 %v4132_v36, %v4128_v12  ;;  %v4139_v22 = vld [vmem:[#allocation17 + $0x58] sm:$0xff] }
 0x7f8   : > { %5586 = vmatpush1.bf16.msra.mxu1 %v5585_v7  ;;  %v3632_v7 = vld [vmem:[#allocation14 + $0x718] sm:$0xff] }
 0x7f9   : > { %5588 = vmatprep.subr.bf16.mxu1 %v5587_v56  ;;  %v3357_v56 = vrot.slane %v3352_v1, %v7511_v11  ;;  %v5623_v31 = vpack.c.bf16 %v3636_v37, %v3632_v7  ;;  %v4136_v1 = vld [vmem:[#allocation17 + $0x40] sm:$0xff]  ;;  %v4130_v37 = vld [vmem:[#allocation17 + $0x10] sm:$0xff] }
 0x7fa   : > { %v4396_v24 = vld [vmem:[%s8730_s0 + $0x248] sm:$0xff]  ;;  %v4397_v12 = vld [vmem:[%s8730_s0 + $0x250] sm:$0xff] }
 0x7fb   : > { %v3358_v62 = vmul.f32 %v3357_v56, %v3270_v53  ;;  %v4143_v56 = vld [vmem:[#allocation17 + $0x78] sm:$0xff] }
 0x7fc   : > { %5590 = vmatpush1.bf16.msra.mxu1 %v5589_v55  ;;  %v3644_v55 = vld [vmem:[#allocation14 + $0x778] sm:$0xff] }
 0x7fd   : > { %5592 = vmatprep.subr.bf16.mxu1 %v5591_v28  ;;  %v5625_v28 = vpack.c.bf16 %v3635_v44, %v3631_v23  ;;  %v5627_v0 = vpack.c.bf16 %v3644_v55, %v3640_v61  ;;  %v3366_v48 = vrot.slane %v3358_v62, %v7887_v34  ;;  %v5651_v44 = vpack.c.bf16 %v4143_v56, %v4139_v22  ;;  %v4142_v61 = vld [vmem:[#allocation17 + $0x70] sm:$0xff] }
 0x7fe   : > { %v4384_v55 = vld [vmem:[%s8730_s0 + $0x1e8] sm:$0xff] }
 0x7ff   : > { %v3367_v35 = vcombine.high %v3366_v48, %v3366_v48  ;;  %v4302_v48 = vrot.slane %v4293_v16, %v7508_v10 }
 0x800   : > { %5594 = vmatpush1.bf16.msra.mxu1 %v5593_v57  ;;  %v3643_v57 = vld [vmem:[#allocation14 + $0x770] sm:$0xff] }
 0x801   : > { %5596 = vmatprep.subr.bf16.mxu1 %v5595_v18  ;;  %v3342_v18 = vpop.permute.xlu0 %3341  ;;  %v5629_v60 = vpack.c.bf16 %v3643_v57, %v3639_v30  ;;  %v4388_v57 = vld [vmem:[%s8730_s0 + $0x208] sm:$0xff] }
 0x804   : > { %5598 = vmatpush1.bf16.msra.mxu1 %v5597_v45  ;;  %v3385_v45 = vmul.f32 %v3384_v3, %v3270_v53  ;;  %v4383_v3 = vld [vmem:[%s8730_s0 + $0x1e0] sm:$0xff] }
 0x805   : > { %5600 = vmatprep.subr.bf16.mxu1 %v5599_v26  ;;  %v3347_v26 = vrot.slane %v3342_v18, %v7511_v11  ;;  %v4390_v18 = vld [vmem:[%s8730_s0 + $0x218] sm:$0xff] }
 0x806   : > { %v3393_v21 = vrot.slane %v3385_v45, %v7887_v34  ;;  %v5719_v25 = vpack.c.bf16 %v4390_v18, %v4388_v57  ;;  %v4415_v57 = vld [vmem:[%s8730_s0 + $0x2e0] sm:$0xff]  ;;  %v4417_v18 = vld [vmem:[%s8730_s0 + $0x2f0] sm:$0xff] }
 0x807   : > { %v3348_v20 = vmul.f32 %v3347_v26, %v3270_v53  ;;  %v4138_v53 = vld [vmem:[#allocation17 + $0x50] sm:$0xff] }
 0x808   : > { %5602 = vmatpush1.bf16.msra.mxu1 %v5601_v58  ;;  %v3660_v58 = vld [vmem:[#allocation14 + $0x7f8] sm:$0xff] }
 0x809   : > { %5604 = vmatprep.subr.bf16.mxu1 %v5603_v8  ;;  %v5633_v8 = vpack.c.bf16 %v3651_v33, %v3647_v51  ;;  %v5635_v4 = vpack.c.bf16 %v3660_v58, %v3656_v59  ;;  %v3349_v32 = vadd.f32 %v3348_v20, %v3338_v5  ;;  %v4387_v51 = vld [vmem:[%s8730_s0 + $0x200] sm:$0xff]  ;;  %v4389_v33 = vld [vmem:[%s8730_s0 + $0x210] sm:$0xff]  ;;  %v4392_v58 = vld [vmem:[%s8730_s0 + $0x228] sm:$0xff] }
 0x80a   : > { %v4393_v5 = vld [vmem:[%s8730_s0 + $0x230] sm:$0xff] }
 0x80c   : > { %5606 = vmatpush1.bf16.msra.mxu1 %v5605_v38  ;;  %v3655_v38 = vld [vmem:[#allocation14 + $0x7d0] sm:$0xff] }
 0x80d   : > { %5608 = vmatprep.subr.bf16.mxu1 %v5607_v6  ;;  %v3659_v6 = vld [vmem:[#allocation14 + $0x7f0] sm:$0xff] }
 0x80e   : > { %v5637_v9 = vpack.c.bf16 %v3659_v6, %v3655_v38  ;;  %v4391_v6 = vld [vmem:[%s8730_s0 + $0x220] sm:$0xff] }
 0x810   : > { %5610 = vmatpush1.bf16.msra.mxu1 %v5609_v43  ;;  %v3374_v43 = vrot.slane %v3367_v35, %v7887_v34 }
 0x811   : > { %5612 = vmatprep.subr.bf16.mxu1 %v5611_v40  ;;  %v3400_v40 = vrot.slane %v3393_v21, %v7887_v34  ;;  %v5721_v21 = vpack.c.bf16 %v4389_v33, %v4387_v51  ;;  %v4426_v51 = vld [vmem:[%s8730_s0 + $0x338] sm:$0xff] }
 0x812   : > { %v3376_v39 = vadd.f32 %v3374_v43, %v3349_v32  ;;  %v5725_v43 = vpack.c.bf16 %v4393_v5, %v4391_v6  ;;  %v4429_v6 = vld [vmem:[%s8730_s0 + $0x350] sm:$0xff]  ;;  %v4432_v5 = vld [vmem:[%s8730_s0 + $0x368] sm:$0xff] }
 0x813   : > { %v3401_v42 = vcombine.high %v3400_v40, %v3400_v40 }
 0x814   : > { %5614 = vmatpush1.bf16.msra.mxu1 %v5613_v29  ;;  %v4137_v29 = vld [vmem:[#allocation17 + $0x48] sm:$0xff] }
 0x815   : > { %5616 = vmatprep.subr.bf16.mxu1 %v5615_v52  ;;  %v4141_v52 = vld [vmem:[#allocation17 + $0x68] sm:$0xff]  ;;  %v3403_v19 = vadd.f32 %v3401_v42, %v3376_v39  ;;  %v5729_v42 = vpack.c.bf16 %v4397_v12, %v4395_v27 }
 0x816   : > { %v5643_v41 = vpack.c.bf16 %v4141_v52, %v4137_v29  ;;  %v4400_v29 = vld [vmem:[%s8730_s0 + $0x268] sm:$0xff]  ;;  %v4402_v52 = vld [vmem:[%s8730_s0 + $0x278] sm:$0xff] }
 0x817   : > { %v3404_v23 = vmax.f32 %v3403_v19, 0.0  ;;  %v5731_v39 = vpack.c.bf16 %v4402_v52, %v4400_v29  ;;  %v4403_v19 = vld [vmem:[%s8730_s0 + $0x280] sm:$0xff]  ;;  %v4437_v29 = vld [vmem:[%s8730_s0 + $0x390] sm:$0xff]  ;;  %v4440_v52 = vld [vmem:[%s8730_s0 + $0x3a8] sm:$0xff] }
 0x818   : > { %5618 = vmatpush1.bf16.msra.mxu1 %v5617_v47  ;;  %v4140_v47 = vld [vmem:[#allocation17 + $0x60] sm:$0xff] }
 0x819   : > { %5620 = vmatprep.subr.bf16.mxu1 %v5619_v2  ;;  %v4131_v2 = vld [vmem:[#allocation17 + $0x18] sm:$0xff]  ;;  %v5645_v34 = vpack.c.bf16 %v4140_v47, %v4136_v1 }
 0x81a   : > { %v5647_v7 = vpack.c.bf16 %v4135_v46, %v4131_v2  ;;  %v4401_v1 = vld [vmem:[%s8730_s0 + $0x270] sm:$0xff]  ;;  %v4404_v47 = vld [vmem:[%s8730_s0 + $0x288] sm:$0xff]  ;;  %v4406_v2 = vld [vmem:[%s8730_s0 + $0x298] sm:$0xff] }
 0x81c   : > { %5622 = vmatpush1.bf16.msra.mxu1 %v5621_v14  ;;  %v4134_v14 = vld [vmem:[#allocation17 + $0x30] sm:$0xff] }
 0x81d   : > { %5624 = vmatprep.subr.bf16.mxu1 %v5623_v31  ;;  %v5649_v31 = vpack.c.bf16 %v4134_v14, %v4130_v37  ;;  %v4408_v37 = vld [vmem:[%s8730_s0 + $0x2a8] sm:$0xff]  ;;  %v4410_v14 = vld [vmem:[%s8730_s0 + $0x2b8] sm:$0xff] }
 0x81e   : > { %v5739_v56 = vpack.c.bf16 %v4410_v14, %v4408_v37  ;;  %v4448_v37 = vld [vmem:[%s8730_s0 + $0x3e8] sm:$0xff]  ;;  %v4450_v14 = vld [vmem:[%s8730_s0 + $0x3f8] sm:$0xff] }
 0x820   : > { %5626 = vmatpush1.bf16.msra.mxu1 %v5625_v28  ;;  %v4386_v28 = vld [vmem:[%s8730_s0 + $0x1f8] sm:$0xff] }
 0x821   : > { %5628 = vmatprep.subr.bf16.mxu1 %v5627_v0  ;;  %v5715_v62 = vpack.c.bf16 %v4386_v28, %v4384_v55  ;;  %v4385_v0 = vld [vmem:[%s8730_s0 + $0x1f0] sm:$0xff]  ;;  %v4411_v55 = vld [vmem:[%s8730_s0 + $0x2c0] sm:$0xff] }
 0x822   : > { %v5717_v30 = vpack.c.bf16 %v4385_v0, %v4383_v3  ;;  %v4413_v28 = vld [vmem:[%s8730_s0 + $0x2d0] sm:$0xff]  ;;  %v4418_v3 = vld [vmem:[%s8730_s0 + $0x2f8] sm:$0xff] }
 0x823   : > { %5716 = vmatprep.subr.bf16.mxu0 %v5715_v62  ;;  %v4416_v62 = vld [vmem:[%s8730_s0 + $0x2e8] sm:$0xff]  ;;  %v5745_v0 = vpack.c.bf16 %v4413_v28, %v4411_v55  ;;  %v4607_v55 = vld [vmem:[%s8731_s23] sm:$0xff] }
 0x824   : > { %5630 = vmatpush1.bf16.msra.mxu1 %v5629_v60  ;;  %5718 = vmatpush1.bf16.msra.mxu0 %v5717_v30  ;;  %v4298_v60 = vrot.slane %v4293_v16, %v7511_v11  ;;  %v5747_v30 = vpack.c.bf16 %v4418_v3, %v4416_v62  ;;  %v4608_v28 = vld [vmem:[%s8731_s23 + $0x8] sm:$0xff]  ;;  %v4625_v62 = vld [vmem:[%s8731_s23 + $0x90] sm:$0xff]  ;;  %v4626_v3 = vld [vmem:[%s8731_s23 + $0x98] sm:$0xff] }
 0x825   : > { %5632 = vmatprep.subr.bf16.mxu1 %v5631_v49  ;;  %5720 = vmatprep.subr.bf16.mxu0 %v5719_v25  ;;  %v4420_v25 = vld [vmem:[%s8730_s0 + $0x308] sm:$0xff] }
 0x828   : > { %5634 = vmatpush1.bf16.msra.mxu1 %v5633_v8  ;;  %v4394_v8 = vld [vmem:[%s8730_s0 + $0x238] sm:$0xff] }
 0x829   : > { %5636 = vmatprep.subr.bf16.mxu1 %v5635_v4  ;;  %v4306_v4 = vrot.slane %v4293_v16, %v7523_v17  ;;  %v5723_v38 = vpack.c.bf16 %v4394_v8, %v4392_v58  ;;  %v4398_v17 = vld [vmem:[%s8730_s0 + $0x258] sm:$0xff]  ;;  %v4423_v58 = vld [vmem:[%s8730_s0 + $0x320] sm:$0xff]  ;;  %v4425_v8 = vld [vmem:[%s8730_s0 + $0x330] sm:$0xff] }
 0x82a   : > { %v4422_v16 = vld [vmem:[%s8730_s0 + $0x318] sm:$0xff] }
 0x82c   : > { %5638 = vmatpush1.bf16.msra.mxu1 %v5637_v9 }
 0x82d   : > { %5640 = vmatprep.subr.bf16.mxu1 %v5639_v13  ;;  %v5727_v13 = vpack.c.bf16 %v4398_v17, %v4396_v24 }
 0x82f   : > { %4122 = vmatmul.mubr.f32.vlgmr.msra.gmra.mrb[18].mxu1 %v8032_v15  ;;  %v5653_v15 = vpack.c.bf16 %v4142_v61, %v4138_v53  ;;  %v4414_v53 = vld [vmem:[%s8730_s0 + $0x2d8] sm:$0xff] }
 0x830   : > { %5642 = vmatpush1.bf16.msra.mxu1 %v5641_v63  ;;  %4211 = vmatprep.mubr.f32.mxu1 %v6760_v54 }
 0x831   : > { %5644 = vmatprep.subr.bf16.mxu1 %v5643_v41  ;;  %v4399_v41 = vld [vmem:[%s8730_s0 + $0x260] sm:$0xff] }
 0x832   : > { %v5733_v46 = vpack.c.bf16 %v4401_v1, %v4399_v41  ;;  %v4439_v41 = vld [vmem:[%s8730_s0 + $0x3a0] sm:$0xff]  ;;  %v4441_v1 = vld [vmem:[%s8730_s0 + $0x3b0] sm:$0xff] }
 0x834   : > { %5646 = vmatpush1.bf16.msra.mxu1 %v5645_v34  ;;  %v5735_v34 = vpack.c.bf16 %v4406_v2, %v4404_v47  ;;  %v4444_v47 = vld [vmem:[%s8730_s0 + $0x3c8] sm:$0xff]  ;;  %v4446_v2 = vld [vmem:[%s8730_s0 + $0x3d8] sm:$0xff] }
 0x835   : > { %5648 = vmatprep.subr.bf16.mxu1 %v5647_v7  ;;  %v4405_v7 = vld [vmem:[%s8730_s0 + $0x290] sm:$0xff] }
 0x836   : > { %v5737_v22 = vpack.c.bf16 %v4405_v7, %v4403_v19  ;;  %v4443_v19 = vld [vmem:[%s8730_s0 + $0x3c0] sm:$0xff]  ;;  %v4445_v7 = vld [vmem:[%s8730_s0 + $0x3d0] sm:$0xff] }
 0x837   : > { %5142 = vmatmul.mubr.msk.f32.vlgmr.msra.gmra.mrb[16].mxu1 %vm3677_vm1, %v3404_v23 }
 0x838   : > { %5650 = vmatpush1.bf16.msra.mxu1 %v5649_v31  ;;  %4282 = vmatprep.mubr.f32.mxu1 %v6760_v54  ;;  %v4407_v31 = vld [vmem:[%s8730_s0 + $0x2a0] sm:$0xff] }
 0x839   : > { %5652 = vmatprep.subr.bf16.mxu1 %v5651_v44  ;;  %v4412_v44 = vld [vmem:[%s8730_s0 + $0x2c8] sm:$0xff] }
 0x83c   : > { %5654 = vmatpush1.bf16.msra.mxu1 %v5653_v15  ;;  %v5743_v15 = vpack.c.bf16 %v4414_v53, %v4412_v44  ;;  %v4623_v44 = vld [vmem:[%s8731_s23 + $0x80] sm:$0xff]  ;;  %v4624_v53 = vld [vmem:[%s8731_s23 + $0x88] sm:$0xff] }
 0x83f   : > { %5143 = vmatmul.mubr.msk.f32.vlgmr.msra.gmra.mrb[18].mxu1 %vm3677_vm1, %v3404_v23  ;;  %v4409_v23 = vld [vmem:[%s8730_s0 + $0x2b0] sm:$0xff] }
 0x840   : > { %v5741_v61 = vpack.c.bf16 %v4409_v23, %v4407_v31  ;;  %v4447_v31 = vld [vmem:[%s8730_s0 + $0x3e0] sm:$0xff]  ;;  %v4449_v23 = vld [vmem:[%s8730_s0 + $0x3f0] sm:$0xff] }
 0x90a   : > { %v4213_v45 = vpop.f32.mrb[16].mxu1 }
 0x90b   : > { %v4315_v26 = vadd.f32 %v4298_v60, %v4213_v45  ;;  %v4215_v49 = vpop.f32.mrb[17].mxu1  ;;  %v5749_v60 = vpack.c.bf16 %v4417_v18, %v4415_v57  ;;  %v4419_v45 = vld [vmem:[%s8730_s0 + $0x300] sm:$0xff]  ;;  %v5787_v57 = vpack.c.bf16 %v4626_v3, %v4625_v62  ;;  %v4609_v18 = vld [vmem:[%s8731_s23 + $0x10] sm:$0xff]  ;;  %v4717_v62 = vld [vmem:[#allocation21 + $0x30] sm:$0xff] }
 0x90c   : > { %v4316_v59 = vadd.f32 %v4302_v48, %v4215_v49  ;;  %v5751_v48 = vpack.c.bf16 %v4422_v16, %v4420_v25  ;;  %v4424_v49 = vld [vmem:[%s8730_s0 + $0x328] sm:$0xff]  ;;  %v4610_v25 = vld [vmem:[%s8731_s23 + $0x18] sm:$0xff]  ;;  %v4627_v16 = vld [vmem:[%s8731_s23 + $0xa0] sm:$0xff] }
 0x90d   : > { %v4319_v20 = vmax.f32 %v4315_v26, 0.0  ;;  %v4421_v26 = vld [vmem:[%s8730_s0 + $0x310] sm:$0xff] }
 0x90e   : > { %v4320_v35 = vmax.f32 %v4316_v59, 0.0  ;;  %v5753_v33 = vpack.c.bf16 %v4421_v26, %v4419_v45  ;;  %v5755_v59 = vpack.c.bf16 %v4426_v51, %v4424_v49  ;;  %v4611_v45 = vld [vmem:[%s8731_s23 + $0x20] sm:$0xff]  ;;  %v4612_v26 = vld [vmem:[%s8731_s23 + $0x28] sm:$0xff]  ;;  %v4629_v49 = vld [vmem:[%s8731_s23 + $0xb0] sm:$0xff] }
 0x90f   : > { %v4630_v51 = vld [vmem:[%s8731_s23 + $0xb8] sm:$0xff]  ;;  %v4718_v3 = vld [vmem:[#allocation21 + $0x38] sm:$0xff] }
 0x910   : > { %4527 = vmatprep.mubr.f32.mxu0 %v4320_v35  ;;  %v4428_v35 = vld [vmem:[%s8730_s0 + $0x348] sm:$0xff] }
 0x911   : > { %4528 = vmatmul.mubr.f32.vlgmr.msra.gmra.mrb[112].mxu0 %v4319_v20  ;;  %v5757_v20 = vpack.c.bf16 %v4425_v8, %v4423_v58  ;;  %v4613_v58 = vld [vmem:[%s8731_s23 + $0x30] sm:$0xff]  ;;  %v4614_v8 = vld [vmem:[%s8731_s23 + $0x38] sm:$0xff] }
 0x912   : > { %5722 = vmatpush1.bf16.msra.mxu0 %v5721_v21  ;;  %v4284_v9 = vpop.f32.mrb[18].mxu1  ;;  %v4430_v21 = vld [vmem:[%s8730_s0 + $0x358] sm:$0xff] }
 0x913   : > { %v8276_v40 = vadd.f32 %v4306_v4, %v4284_v9  ;;  %v4286_v32 = vpop.f32.mrb[19].mxu1  ;;  %5724 = vmatprep.subr.bf16.mxu0 %v5723_v38  ;;  %v5759_v4 = vpack.c.bf16 %v4430_v21, %v4428_v35  ;;  %v4427_v38 = vld [vmem:[%s8730_s0 + $0x340] sm:$0xff]  ;;  %v4632_v21 = vld [vmem:[%s8731_s23 + $0xc8] sm:$0xff] }
 0x914   : > { %v4318_v36 = vadd.f32 %v4310_v50, %v4286_v32  ;;  %v4434_v50 = vld [vmem:[%s8730_s0 + $0x378] sm:$0xff]  ;;  %v5761_v24 = vpack.c.bf16 %v4429_v6, %v4427_v38  ;;  %v4431_v9 = vld [vmem:[%s8730_s0 + $0x360] sm:$0xff]  ;;  %v4436_v32 = vld [vmem:[%s8730_s0 + $0x388] sm:$0xff] }
 0x915   : > { %v5763_v17 = vpack.c.bf16 %v4434_v50, %v4432_v5  ;;  %v4631_v35 = vld [vmem:[%s8731_s23 + $0xc0] sm:$0xff]  ;;  %v4616_v6 = vld [vmem:[%s8731_s23 + $0x48] sm:$0xff]  ;;  %v4633_v5 = vld [vmem:[%s8731_s23 + $0xd0] sm:$0xff] }
 0x916   : > { %v4322_v63 = vmax.f32 %v4318_v36, 0.0  ;;  %5726 = vmatpush1.bf16.msra.mxu0 %v5725_v43  ;;  %v4433_v43 = vld [vmem:[%s8730_s0 + $0x370] sm:$0xff]  ;;  %v4435_v36 = vld [vmem:[%s8730_s0 + $0x380] sm:$0xff]  ;;  %v4634_v50 = vld [vmem:[%s8731_s23 + $0xd8] sm:$0xff] }
 0x917   : > { %5728 = vmatprep.subr.bf16.mxu0 %v5727_v13  ;;  %v4438_v13 = vld [vmem:[%s8730_s0 + $0x398] sm:$0xff]  ;;  %v5765_v27 = vpack.c.bf16 %v4433_v43, %v4431_v9  ;;  %v4615_v38 = vld [vmem:[%s8731_s23 + $0x40] sm:$0xff]  ;;  %v4617_v9 = vld [vmem:[%s8731_s23 + $0x50] sm:$0xff] }
 0x918   : > { %4598 = vmatprep.mubr.f32.mxu0 %v4322_v63  ;;  %v5767_v12 = vpack.c.bf16 %v4438_v13, %v4436_v32  ;;  %v4442_v63 = vld [vmem:[%s8730_s0 + $0x3b8] sm:$0xff]  ;;  %v4635_v32 = vld [vmem:[%s8731_s23 + $0xe0] sm:$0xff]  ;;  %v4636_v13 = vld [vmem:[%s8731_s23 + $0xe8] sm:$0xff]  ;;  %s8552_s0 = scalar_lea.hbm %s8734_s7, %s5145_s1 }
 0x919   : > { %v4618_v43 = vld [vmem:[%s8731_s23 + $0x58] sm:$0xff] }
 0x91a   : > { %5730 = vmatpush1.bf16.msra.mxu0 %v5729_v42  ;;  %v5769_v42 = vpack.c.bf16 %v4437_v29, %v4435_v36  ;;  %v4619_v36 = vld [vmem:[%s8731_s23 + $0x60] sm:$0xff]  ;;  %v4620_v29 = vld [vmem:[%s8731_s23 + $0x68] sm:$0xff] }
 0x91b   : > { %5732 = vmatprep.subr.bf16.mxu0 %v5731_v39  ;;  %v5771_v39 = vpack.c.bf16 %v4442_v63, %v4440_v52  ;;  %v5809_v52 = vpack.c.bf16 %v4620_v29, %v4619_v36  ;;  %v4637_v63 = vld [vmem:[%s8731_s23 + $0xf0] sm:$0xff] }
 0x91e   : > { %5734 = vmatpush1.bf16.msra.mxu0 %v5733_v46  ;;  %v5773_v46 = vpack.c.bf16 %v4441_v1, %v4439_v41  ;;  %v4621_v41 = vld [vmem:[%s8731_s23 + $0x70] sm:$0xff]  ;;  %v4622_v1 = vld [vmem:[%s8731_s23 + $0x78] sm:$0xff] }
 0x91f   : > { %5736 = vmatprep.subr.bf16.mxu0 %v5735_v34  ;;  %v5775_v34 = vpack.c.bf16 %v4446_v2, %v4444_v47  ;;  %v5813_v47 = vpack.c.bf16 %v4622_v1, %v4621_v41  ;;  %v6762_v2 = vmov 0.0|0.0  }
 0x922   : > { %5738 = vmatpush1.bf16.msra.mxu0 %v5737_v22  ;;  %v5777_v22 = vpack.c.bf16 %v4445_v7, %v4443_v19 }
 0x923   : > { %5740 = vmatprep.subr.bf16.mxu0 %v5739_v56  ;;  %v5779_v56 = vpack.c.bf16 %v4450_v14, %v4448_v37 }
 0x926   : > { %5742 = vmatpush1.bf16.msra.mxu0 %v5741_v61  ;;  %v5781_v61 = vpack.c.bf16 %v4449_v23, %v4447_v31 }
 0x927   : > { %5744 = vmatprep.subr.bf16.mxu0 %v5743_v15  ;;  %v5783_v15 = vpack.c.bf16 %v4624_v53, %v4623_v44 }
 0x92a   : > { %5746 = vmatpush1.bf16.msra.mxu0 %v5745_v0  ;;  %v5785_v0 = vpack.c.bf16 %v4608_v28, %v4607_v55 }
 0x92b   : > { %5748 = vmatprep.subr.bf16.mxu0 %v5747_v30  ;;  %v4321_v30 = vmax.f32 %v8276_v40, 0.0  ;;  %v5789_v40 = vpack.c.bf16 %v4610_v25, %v4609_v18 }
 0x92e   : > { %5750 = vmatpush1.bf16.msra.mxu0 %v5749_v60  ;;  %v4628_v60 = vld [vmem:[%s8731_s23 + $0xa8] sm:$0xff] }
 0x92f   : > { %5752 = vmatprep.subr.bf16.mxu0 %v5751_v48  ;;  %v5791_v48 = vpack.c.bf16 %v4628_v60, %v4627_v16 }
 0x932   : > { %5754 = vmatpush1.bf16.msra.mxu0 %v5753_v33  ;;  %v5793_v33 = vpack.c.bf16 %v4612_v26, %v4611_v45 }
 0x933   : > { %5756 = vmatprep.subr.bf16.mxu0 %v5755_v59  ;;  %v5795_v59 = vpack.c.bf16 %v4630_v51, %v4629_v49 }
 0x936   : > { %5758 = vmatpush1.bf16.msra.mxu0 %v5757_v20  ;;  %v5797_v20 = vpack.c.bf16 %v4614_v8, %v4613_v58 }
 0x937   : > { %5760 = vmatprep.subr.bf16.mxu0 %v5759_v4  ;;  %v5799_v4 = vpack.c.bf16 %v4632_v21, %v4631_v35 }
 0x93a   : > { %5762 = vmatpush1.bf16.msra.mxu0 %v5761_v24  ;;  %v5801_v24 = vpack.c.bf16 %v4616_v6, %v4615_v38 }
 0x93b   : > { %5764 = vmatprep.subr.bf16.mxu0 %v5763_v17  ;;  %v5803_v17 = vpack.c.bf16 %v4634_v50, %v4633_v5 }
 0x93e   : > { %5766 = vmatpush1.bf16.msra.mxu0 %v5765_v27  ;;  %v5805_v27 = vpack.c.bf16 %v4618_v43, %v4617_v9 }
 0x93f   : > { %5768 = vmatprep.subr.bf16.mxu0 %v5767_v12  ;;  %v5807_v12 = vpack.c.bf16 %v4636_v13, %v4635_v32 }
 0x942   : > { %5770 = vmatpush1.bf16.msra.mxu0 %v5769_v42  ;;  %v4638_v42 = vld [vmem:[%s8731_s23 + $0xf8] sm:$0xff] }
 0x943   : > { %5772 = vmatprep.subr.bf16.mxu0 %v5771_v39  ;;  %v5811_v39 = vpack.c.bf16 %v4638_v42, %v4637_v63 }
 0x946   : > { %5774 = vmatpush1.bf16.msra.mxu0 %v5773_v46  ;;  %v4451_v46 = vld [vmem:[#allocation20] sm:$0x3] }
 0x947   : > { %5776 = vmatprep.subr.bf16.mxu0 %v5775_v34  ;;  %v4456_v34 = vrot.slane %v4451_v46, %v7511_v11  ;;  %v4460_v19 = vrot.slane %v4451_v46, %v7508_v10  ;;  %v4715_v11 = vld [vmem:[#allocation21 + $0x20] sm:$0xff]  ;;  %v4716_v10 = vld [vmem:[#allocation21 + $0x28] sm:$0xff] }
 0x948   : > { %v5822_v28 = vpack.c.bf16 %v4716_v10, %v4715_v11 }
 0x94a   : > { %5778 = vmatpush1.bf16.msra.mxu0 %v5777_v22  ;;  %v4711_v22 = vld [vmem:[#allocation21] sm:$0xff] }
 0x94b   : > { %5780 = vmatprep.subr.bf16.mxu0 %v5779_v56  ;;  %v4712_v56 = vld [vmem:[#allocation21 + $0x8] sm:$0xff] }
 0x94c   : > { %v5816_v44 = vpack.c.bf16 %v4712_v56, %v4711_v22 }
 0x94e   : > { %5782 = vmatpush1.bf16.msra.mxu0 %v5781_v61  ;;  %v4713_v61 = vld [vmem:[#allocation21 + $0x10] sm:$0xff] }
 0x94f   : > { %5784 = vmatprep.subr.bf16.mxu0 %v5783_v15  ;;  %v4714_v15 = vld [vmem:[#allocation21 + $0x18] sm:$0xff] }
 0x950   : > { %v5819_v55 = vpack.c.bf16 %v4714_v15, %v4713_v61 }
 0x951   : > { %4599 = vmatmul.mubr.f32.vlgmr.msra.gmra.mrb[112].mxu0 %v4321_v30 }
 0x952   : > { %5786 = vmatpush3.bf16.msra.mxu0 %v5785_v0  ;;  %v5825_v0 = vpack.c.bf16 %v4718_v3, %v4717_v62 }
 0x953   : > { %5788 = vmatprep.subr.bf16.mxu0 %v5787_v57  ;;  %v4639_v57 = vld [vmem:[%s8732_s6] sm:$0x1]  ;;  %s8735_s6 = smov %s8734_s7 }
 0x956   : > { %5790 = vmatpush3.bf16.msra.mxu0 %v5789_v40  ;;  %v4719_v40 = vld [vmem:[%s8733_s14] sm:$0x1]  ;;  %s6636_s14 = scalar_lea.vmem %s6635_s3, 32 }
 0x957   : > { %5792 = vmatprep.subr.bf16.mxu0 %v5791_v48  ;;  %p6638_p9 = scmp.lt.s32.totalorder %s6636_s14, %s6630_s29 }
 0x959   : > { %p6639_p8 = por %p6638_p9, %p6637_p4 }
 0x95a   : > { %5794 = vmatpush3.bf16.msra.mxu0 %v5793_v33 }
 0x95b   : > { %5796 = vmatprep.subr.bf16.mxu0 %v5795_v59  ;;  %p6640_p3 = pnand %p6639_p8, %p6633_p2 }
 0x95e   : > { %5798 = vmatpush3.bf16.msra.mxu0 %v5797_v20 }
 0x95f   : > { %5800 = vmatprep.subr.bf16.mxu0 %v5799_v4 }
 0x962   : > { %5802 = vmatpush3.bf16.msra.mxu0 %v5801_v24 }
 0x963   : > { %5804 = vmatprep.subr.bf16.mxu0 %v5803_v17 }
 0x966   : > { %5806 = vmatpush3.bf16.msra.mxu0 %v5805_v27 }
 0x967   : > { %5808 = vmatprep.subr.bf16.mxu0 %v5807_v12 }
 0x96a   : > { %5810 = vmatpush3.bf16.msra.mxu0 %v5809_v52 }
 0x96b   : > { %5812 = vmatprep.subr.bf16.mxu0 %v5811_v39 }
 0x96e   : > { %5814 = vmatpush3.bf16.msra.mxu0 %v5813_v47 }
 0x96f   : > { %5815 = vmatprep.subr.bf16.mxu0 %v6762_v2 }
 0xa24   : > { %v4600_v7 = vpop.f32.mrb[112].mxu0 }
 0xa25   : > { %v5827_v37 = vadd.f32 %v4600_v7, %v4456_v34  ;;  %v4602_v14 = vpop.f32.mrb[113].mxu0 }
 0xa26   : > { %v5828_v31 = vadd.f32 %v4602_v14, %v4460_v19 }
 0xa27   : > { %v4605_v53 = vmax.f32 %v5827_v37, 0.0 }
 0xa28   : > { %v4606_v23 = vmax.f32 %v5828_v31, 0.0 }
 0xa2a   : > { %4704 = vmatprep.mubr.f32.mxu0 %v4606_v23 }
 0xa2b   : > { %4705 = vmatmul.mubr.f32.vlgmr.msra.gmra.mrb[114].mxu0 %v4605_v53 }
 0xa2c   : > { %5817 = vmatpush3.bf16.msra.mxu0 %v5816_v44  ;;  %5364 = vmatprep.mubr.msk.f32.mxu0 %vm6763_vm3, %v6760_v54 }
 0xa2d   : > { %5818 = vmatprep.subr.bf16.mxu0 %v6762_v2 }
 0xa30   : > { %5820 = vmatpush3.bf16.msra.mxu0 %v5819_v55 }
 0xa31   : > { %5821 = vmatprep.subr.bf16.mxu0 %v6762_v2 }
 0xa34   : > { %5823 = vmatpush3.bf16.msra.mxu0 %v5822_v28 }
 0xa35   : > { %5824 = vmatprep.subr.bf16.mxu0 %v6762_v2 }
 0xa38   : > { %5826 = vmatpush3.bf16.msra.mxu0 %v5825_v0 }
 0xafe   : > { %v5232_v30 = vpop.f32.mrb[114].mxu0 }
 0xaff   : > { %v5233_v18 = vpop.f32.mrb[115].mxu0 }
 0xb00   : > { %v5234_v25 = vadd.f32 %v5233_v18, %v5232_v30 }
 0xb02   : > { %v4707_v16 = vadd.f32 %v5234_v25, %v4639_v57 }
 0xb04   : > { %v4710_v60 = vmax.f32 %v4707_v16, 0.0 }
 0xb06   : > { %5365 = vmatmul.mubr.msk.f32.vlgmr.msra.gmra.mrb[116].mxu0 %vm1588_vm0, %v4710_v60 }
 0xbd9   : > { %v4789_v54 = vpop.f32.mrb[116].mxu0 }
 0xbda   : > { %v4790_v48 = vadd.f32 %v4789_v54, %v4719_v40  ;;  %v5366_v45 = vpop.f32.mrb[117].mxu0 }
 0xbdc   : > { %4793 = vst [vmem:[%s1021_s15] sm:$0x1] %v4790_v48 }
 0xbdd   : > { %6643 = shalt.err (!%p6640_p3)
}
 0xbde   : > { %s6644_s12 = scalar_lea.hbm %s8552_s0, 16  ;;  %s6648_s17 = scalar_lea.hbm %s8735_s6, 32 }
 0xbdf   : > { %p6645_p12 = scmp.ne.s32.totalorder %s8552_s0, %s6644_s12  ;;  %p6649_p11 = scmp.lt.u32.totalorder %s8552_s0, %s8735_s6 }
 0xbe0   : > { %p6650_p7 = scmp.lt.u32.totalorder %s6648_s17, %s6644_s12  ;;  %p6652_p5 = scmp.lt.u32.totalorder %s6644_s12, %s8552_s0 }
 0xbe1   : > { %p6646_p13 = pnand %p6645_p12, %p8736_p10 }
 0xbe2   : > { %p6651_p6 = por %p6650_p7, %p6649_p11 }
 0xbe3   : > { %p6647_p0 = pneg %p6646_p13 }
 0xbe4   : > { %p6653_p1 = por %p6652_p5, %p6651_p6 }
 0xbe6   : > { %p6654_p2 = pnand %p6653_p1, %p6647_p0 }
 0xbe8   : > { %6657 = shalt.err (!%p6654_p2)
}
 0xbe9   : > { %5889 = dma.vmem_to_hbm [thread:$0]  (%p8736_p10), %s8554_s10, 16, %s8552_s0, %s4795_s11  }
 0xbea PF: > { %s8737_s29 = sld [smem:[#allocation32_spill]]  ;;  %p8738_p4 = scmp.ne.s32.totalorder %s8706_s30, 0 }
 0xbeb   : > { %p8739_p9 = scmp.ge.s32.totalorder %s6736_s5, 2 }
 0xbed   : > { %p5930_p8 = pnand %p8739_p9, %p8738_p4 }
 0xbf0   : > { %s4819_s16 = sand.u32 1, %s8737_s29  }
 0xbf1   : > { %s4820_s3 = scalar_lea.sflag [#allocation5], %s4819_s16 }
 0xbf2   : > { %6711 = dma.done.wait (!%p5930_p8), %s4820_s3, 16  }
 0xbf3   : > { %6713 = vsyncadd (!%p5930_p8), %s4820_s3, 4294967280  ;;  %s49_s5 = sadd.s32 1, %s6736_s5   ;;  %s8740_s7 = smov %s6720_s4 }
 0xbf4   : > { %p46_p3 = scmp.ge.s32.totalorder %s49_s5, 4   ;;  %s8741_s4 = smov %s6724_s8 }
 0xbf5   : > { %s8742_s8 = smov %s7218_s28  ;;  %s8743_s30 = smov %s6732_s9 }
 0xbf6   : > { %s8744_s9 = smov %s8746_s13  ;;  %48 = sbr.rel (!%p46_p3) target bundleno = 36 (0x24), region = 231 }
 0xbfd   :  { %4824 = vsyncpa [#allocation4], 1 }
 0xbfe   :  { %4826 = vsyncpa [#allocation4 + $0x1], 1 }
 0xbff   :  { %4827 = vsyncpa [#allocation7], 1 }
 0xc00   :  { %4828 = vsyncpa [#allocation10], 1 }
 0xc01   :  { %4829 = vsyncpa [#allocation13], 1 }
 0xc02   :  { %4830 = vsyncpa [#allocation16], 1 }
 0xc03   :  { %4831 = vsyncpa [#allocation19], 1 }
 0xc04   :  { %4832 = vsyncpa [#allocation22], 1 }
 0xc05   :  { %4833 = vsyncpa [#allocation5], 1 }
 0xc06   :  { %4835 = vsyncpa [#allocation5 + $0x1], 1 }

</bundles_post_ra>
